<compile_context>
chip_gen: v5e
topology: v5e:2x2
jax: 0.10.0
libtpu: 0.0.40
codegen_flags: <defaults>
</compile_context>

<pallas_src>
import functools

import jax
import jax.numpy as jnp
from jax.experimental import pallas as pl
from jax.experimental.pallas import tpu as pltpu


# -----------------------------------------------------------------------------
# In-kernel helpers
# -----------------------------------------------------------------------------
def _lrelu(v, neg_slope):
    return jnp.where(v >= 0, v, neg_slope * v)


def _kconv(a, w_stacked, bias, dilation, n_out, K, left, merge_taps):
    """1-D correlation; K taps either merged into one MXU matmul or accumulated.

    a         : (n_in, C)  compute_dtype, already activated (and masked if needed).
    w_stacked : (K*C, C)   compute_dtype, rows [k*C:(k+1)*C] hold tap k.
    bias      : (1, C)     f32.
    left      : extra left offset of tap slices beyond the minimal trim.
    returns   : (n_out, C) f32.
    """
    taps = [a[left + k * dilation:left + k * dilation + n_out, :] for k in range(K)]
    if merge_taps:
        # (n, K*C) @ (K*C, C): fills the 256-deep MXU contraction on v6e/v7x.
        A = jnp.concatenate(taps, axis=-1)
        acc = jnp.dot(A, w_stacked, preferred_element_type=jnp.float32)
    else:
        # v5e-friendly: three accumulated 128-deep matmuls, no (n, 3*C) concat copy.
        Cch = a.shape[1]
        acc = jnp.dot(taps[0], w_stacked[0:Cch, :],
                      preferred_element_type=jnp.float32)
        for k in range(1, K):
            acc = acc + jnp.dot(taps[k], w_stacked[k * Cch:(k + 1) * Cch, :],
                                preferred_element_type=jnp.float32)
    return acc + bias


def _resblock_kernel(xl_ref, xm_ref, xr_ref, w1_ref, b1_ref, w2_ref, b2_ref,
                     o_ref, *, TT, HB, T, dilations, K, neg_slope,
                     compute_dtype, merge_taps):
    # xl_ref/xr_ref: (1, HB, C) left/right halo blocks of x (clamped at edges)
    # xm_ref       : (1, TT, C) main tile of x
    # w*_ref       : (S, K*C, C) stacked conv weights, already in compute_dtype
    # b*_ref       : (S, 1, C)   biases, f32
    # o_ref        : (1, TT, C)
    t0 = pl.program_id(1) * TT
    half = (K - 1) // 2
    halo = sum(half * (d + 1) for d in dilations)   # receptive halo per side
    extra = HB - halo                               # per-side slack (consumed at stage 0)
    n_stages = len(dilations)

    # Edge tiles are the only ones whose window can touch [<0] or [>=T]; interior
    # tiles skip every mask below (lax.cond takes the identity branch).
    is_edge = jnp.logical_or(t0 < HB, t0 + (TT + HB) > T)

    def mask_oob(v, row0):
        """Zero rows whose global time (row0 + r) lies outside [0, T)."""
        def do_mask(u):
            g = row0 + jax.lax.broadcasted_iota(jnp.int32, (u.shape[0], 1), 0)
            return jnp.where((g >= 0) & (g < T), u, jnp.zeros_like(u))
        return jax.lax.cond(is_edge, do_mask, lambda u: u, v)

    # Assemble the halo'd window: row r <-> global time base + r.
    base = t0 - HB
    xw = jnp.concatenate([xl_ref[0], xm_ref[0], xr_ref[0]], axis=0)
    cur = mask_oob(xw.astype(jnp.float32), base)    # residual carried in f32

    for i, d in enumerate(dilations):
        w1 = w1_ref[i]          # (K*C, C) compute_dtype, resident in VMEM
        b1 = b1_ref[i]          # (1, C)   f32
        w2 = w2_ref[i]
        b2 = b2_ref[i]

        h1 = half * d           # halo consumed by the dilated conv
        h2 = half               # halo consumed by the dilation-1 conv
        s1 = h1 + (extra if i == 0 else 0)   # left/right trim of this stage's conv1
        n1 = cur.shape[0] - 2 * s1
        n2 = n1 - 2 * h2

        # convs1[i]: LeakyReLU -> dilated conv (+bias); bf16 operands, f32 accumulate.
        a1 = _lrelu(cur, neg_slope).astype(compute_dtype)
        xt = _kconv(a1, w1, b1, d, n1, K, s1 - h1, merge_taps)

        # convs2[i]: LeakyReLU -> conv (dilation 1) (+bias), then residual add.
        # Masking commutes with LeakyReLU (both map 0 -> 0), so fold it into the act.
        # TODO(synk): use_additional_convs=False / bias=False variants not implemented.
        a2 = mask_oob(_lrelu(xt, neg_slope).astype(compute_dtype), base + s1)
        y = _kconv(a2, w2, b2, 1, n2, K, 0, merge_taps)

        cur = y + cur[s1 + h2:s1 + h2 + n2, :]
        base = base + s1 + h2
        if i + 1 < n_stages:
            cur = mask_oob(cur, base)   # last stage's OOB rows are dropped on store

    # By construction cur now has exactly TT rows with row 0 at global time t0:
    # the store needs no misaligned slice / re-layout of the (TT, C) result.
    o_ref[0] = cur.astype(o_ref.dtype)


# -----------------------------------------------------------------------------
# Wrapper: full ResidualBlock forward, fused into a single pallas_call.
# -----------------------------------------------------------------------------
def residual_block_forward(x_nct, params, *, kernel_size=3, dilations=(1, 3, 5),
                           neg_slope=0.1, tt_max=1024,
                           compute_dtype=jnp.bfloat16, merge_taps=True,
                           vmem_limit_bytes=48 * 1024 * 1024):
    """x_nct: (B, C, T) like PyTorch.  params: torch-layout weights,
    params["w1"][i]: (C, C, K), params["b1"][i]: (C,), same for w2/b2.

    compute_dtype : dtype of the MXU operands (bf16 recommended; accumulation is f32).
    merge_taps    : True for v6e/v7x (fills 256-deep MXU), False for v5e.
    """
    B, C, T = x_nct.shape
    K = kernel_size
    S = len(dilations)
    half = (K - 1) // 2

    halo = sum(half * (d + 1) for d in dilations)          # total receptive halo/side
    itemsize = jnp.dtype(x_nct.dtype).itemsize
    rm = {4: 8, 2: 16, 1: 32}.get(itemsize, 8)             # sublane multiple for x dtype
    HB = max(rm, -(-halo // rm) * rm)                      # halo block size
    assert T >= HB, f"sequence length T={T} must be >= {HB}"
    TT = max(HB, (min(tt_max, T) // HB) * HB)              # time tile, multiple of HB
    R = TT // HB                                           # HB-blocks per time tile
    num_hb = -(-T // HB)                                   # HB-block grid extent
    nT = -(-T // TT)

    # Channels-last activations.
    x = jnp.transpose(x_nct, (0, 2, 1))                    # (B, T, C)

    # Stack conv weights as (S, K*C, C), pre-cast to the dot dtype (no in-kernel cast).
    def stack_w(ws):
        return jnp.stack(
            [jnp.transpose(w, (2, 1, 0)).reshape(K * C, C) for w in ws]
        ).astype(compute_dtype)

    w1s = stack_w(params["w1"])
    w2s = stack_w(params["w2"])
    b1s = jnp.stack([b.reshape(1, C) for b in params["b1"]]).astype(jnp.float32)
    b2s = jnp.stack([b.reshape(1, C) for b in params["b2"]]).astype(jnp.float32)

    kernel = functools.partial(
        _resblock_kernel, TT=TT, HB=HB, T=T, dilations=tuple(dilations),
        K=K, neg_slope=neg_slope, compute_dtype=compute_dtype,
        merge_taps=merge_taps)

    out = pl.pallas_call(
        kernel,
        out_shape=jax.ShapeDtypeStruct((B, T, C), x.dtype),
        grid_spec=pltpu.PrefetchScalarGridSpec(
            num_scalar_prefetch=0,
            grid=(B, nT),
            in_specs=[
                # left halo block (clamped at the left edge; masked in-kernel)
                pl.BlockSpec((1, HB, C),
                             lambda b, t: (b, jnp.maximum(t * R - 1, 0), 0)),
                # main time tile
                pl.BlockSpec((1, TT, C), lambda b, t: (b, t, 0)),
                # right halo block (clamped at the right edge; masked in-kernel)
                pl.BlockSpec((1, HB, C),
                             lambda b, t: (b, jnp.minimum((t + 1) * R, num_hb - 1), 0)),
                # weights / biases: constant block index -> stay resident in VMEM
                pl.BlockSpec((S, K * C, C), lambda b, t: (0, 0, 0)),
                pl.BlockSpec((S, 1, C), lambda b, t: (0, 0, 0)),
                pl.BlockSpec((S, K * C, C), lambda b, t: (0, 0, 0)),
                pl.BlockSpec((S, 1, C), lambda b, t: (0, 0, 0)),
            ],
            out_specs=pl.BlockSpec((1, TT, C), lambda b, t: (b, t, 0)),
        ),
        compiler_params=pltpu.CompilerParams(
            dimension_semantics=("parallel", "parallel"),
            vmem_limit_bytes=vmem_limit_bytes),
    )(x, x, x, w1s, b1s, w2s, b2s)

    return jnp.transpose(out, (0, 2, 1))                   # back to (B, C, T)


# -----------------------------------------------------------------------------
# Pure-JAX reference mirroring PyTorch semantics (for verification).
# -----------------------------------------------------------------------------
def _torch_conv1d_ref(x_nct, w_oik, b, dil):
    K = w_oik.shape[-1]
    pad = (K - 1) // 2 * dil
    y = jax.lax.conv_general_dilated(
        x_nct, w_oik, window_strides=(1,), padding=[(pad, pad)],
        rhs_dilation=(dil,), dimension_numbers=("NCH", "OIH", "NCH"))
    return y + b[None, :, None]


def residual_block_ref(x_nct, params, dilations=(1, 3, 5), neg_slope=0.1):
    lrelu = lambda v: jnp.where(v >= 0, v, neg_slope * v)
    x = x_nct
    for i, d in enumerate(dilations):
        xt = _torch_conv1d_ref(lrelu(x), params["w1"][i], params["b1"][i], d)
        xt = _torch_conv1d_ref(lrelu(xt), params["w2"][i], params["b2"][i], 1)
        x = xt + x
    return x


# -----------------------------------------------------------------------------
# Deterministic parameter init (PyTorch Conv1d-style uniform init, torch layout).
# -----------------------------------------------------------------------------
def init_params(key, channels, kernel_size, dilations):
    bound = 1.0 / (channels * kernel_size) ** 0.5
    params = {"w1": [], "b1": [], "w2": [], "b2": []}
    for _ in dilations:
        key, k1, k2, k3, k4 = jax.random.split(key, 5)
        params["w1"].append(jax.random.uniform(
            k1, (channels, channels, kernel_size), jnp.float32, -bound, bound))
        params["b1"].append(jax.random.uniform(
            k2, (channels,), jnp.float32, -bound, bound))
        params["w2"].append(jax.random.uniform(
            k3, (channels, channels, kernel_size), jnp.float32, -bound, bound))
        params["b2"].append(jax.random.uniform(
            k4, (channels,), jnp.float32, -bound, bound))
    return params


if __name__ == "__main__":
    # Correctness smoke test.  tt_max=64 forces several time tiles (interior + edge,
    # including a partial last tile: T=200 is not a multiple of TT=64), exercising the
    # halo clamping, the edge/interior fast path, and the zero-padding masks.
    B, C, T = 2, 128, 200
    kernel_size = 3
    dilations = (1, 3, 5)

    key = jax.random.PRNGKey(0)
    key, xkey = jax.random.split(key)
    x = jax.random.normal(xkey, (B, C, T), jnp.float32)     # PyTorch NCW layout
    params = init_params(key, C, kernel_size, dilations)

    ref = residual_block_ref(x, params, dilations)

    configs = [
        # (compute_dtype, merge_taps, rtol, atol)
        (jnp.float32, True, 1e-3, 1e-3),    # f32 MXU path: validates halo/mask math tightly
        (jnp.bfloat16, True, 3e-2, 3e-2),   # production path (v6e/v7x): bf16 operands, merged taps
        (jnp.bfloat16, False, 3e-2, 3e-2),  # v5e path: per-tap accumulated 128-deep matmuls
    ]
    for cdt, merge, rtol, atol in configs:
        fwd = jax.jit(functools.partial(
            residual_block_forward, kernel_size=kernel_size, dilations=dilations,
            tt_max=64, compute_dtype=cdt, merge_taps=merge))
        out = jax.block_until_ready(fwd(x, params))
        assert out.shape == (B, C, T)
        max_err = float(jnp.max(jnp.abs(out - ref)))
        assert jnp.allclose(out, ref, rtol=rtol, atol=atol), (
            f"mismatch vs reference (compute_dtype={cdt.__name__}, "
            f"merge_taps={merge}): max|diff|={max_err}")

    print("KERNEL_OK")
</pallas_src>

<mosaic_0001>
module attributes {stable_mosaic.version = 11 : i64} {
  func.func @_resblock_kernel(%arg0: i32, %arg1: i32, %arg2: memref<1x16x128xf32, #tpu.memory_space<vmem>>, %arg3: memref<1x64x128xf32, #tpu.memory_space<vmem>>, %arg4: memref<1x16x128xf32, #tpu.memory_space<vmem>>, %arg5: memref<3x384x128xf32, #tpu.memory_space<vmem>>, %arg6: memref<3x1x128xf32, #tpu.memory_space<vmem>>, %arg7: memref<3x384x128xf32, #tpu.memory_space<vmem>>, %arg8: memref<3x1x128xf32, #tpu.memory_space<vmem>>, %arg9: memref<1x64x128xf32, #tpu.memory_space<vmem>>) attributes {dimension_semantics = [#tpu.dimension_semantics<parallel>, #tpu.dimension_semantics<parallel>], iteration_bounds = array<i64: 2, 4>, scalar_prefetch = 0 : i64, scratch_operands = 0 : i64, tpu.core_type = #tpu.core_type<tc>, window_params = [{transform_indices = @transform_0, window_bounds = array<i64: 1, 16, 128>}, {transform_indices = @transform_1, window_bounds = array<i64: 1, 64, 128>}, {transform_indices = @transform_2, window_bounds = array<i64: 1, 16, 128>}, {pipeline_mode = #tpu.pipeline_mode<synchronous>, transform_indices = @transform_3, window_bounds = array<i64: 3, 384, 128>}, {pipeline_mode = #tpu.pipeline_mode<synchronous>, transform_indices = @transform_4, window_bounds = array<i64: 3, 1, 128>}, {pipeline_mode = #tpu.pipeline_mode<synchronous>, transform_indices = @transform_5, window_bounds = array<i64: 3, 384, 128>}, {pipeline_mode = #tpu.pipeline_mode<synchronous>, transform_indices = @transform_6, window_bounds = array<i64: 3, 1, 128>}, {transform_indices = @transform_7, window_bounds = array<i64: 1, 64, 128>}]} {
    %c64_i32 = arith.constant 64 : i32
    %0 = arith.muli %arg1, %c64_i32 : i32
    %c16_i32 = arith.constant 16 : i32
    %1 = arith.cmpi slt, %0, %c16_i32 : i32
    %c80_i32 = arith.constant 80 : i32
    %2 = arith.addi %0, %c80_i32 : i32
    %c200_i32 = arith.constant 200 : i32
    %3 = arith.cmpi sgt, %2, %c200_i32 : i32
    %4 = arith.ori %1, %3 : i1
    %c16_i32_0 = arith.constant 16 : i32
    %5 = arith.subi %0, %c16_i32_0 : i32
    %c0 = arith.constant 0 : index
    %c0_1 = arith.constant 0 : index
    %c0_2 = arith.constant 0 : index
    %6 = vector.load %arg2[%c0, %c0_1, %c0_2] : memref<1x16x128xf32, #tpu.memory_space<vmem>>, vector<1x16x128xf32>
    %7 = vector.shape_cast %6 : vector<1x16x128xf32> to vector<16x128xf32>
    %c0_3 = arith.constant 0 : index
    %c0_4 = arith.constant 0 : index
    %c0_5 = arith.constant 0 : index
    %8 = vector.load %arg3[%c0_3, %c0_4, %c0_5] : memref<1x64x128xf32, #tpu.memory_space<vmem>>, vector<1x64x128xf32>
    %9 = vector.shape_cast %8 : vector<1x64x128xf32> to vector<64x128xf32>
    %c0_6 = arith.constant 0 : index
    %c0_7 = arith.constant 0 : index
    %c0_8 = arith.constant 0 : index
    %10 = vector.load %arg4[%c0_6, %c0_7, %c0_8] : memref<1x16x128xf32, #tpu.memory_space<vmem>>, vector<1x16x128xf32>
    %11 = vector.shape_cast %10 : vector<1x16x128xf32> to vector<16x128xf32>
    %12 = tpu.concatenate %7, %9, %11 in 0 : vector<16x128xf32>, vector<64x128xf32>, vector<16x128xf32> -> vector<96x128xf32>
    %13 = arith.extui %4 : i1 to i32
    %c0_i32 = arith.constant 0 : i32
    %14 = arith.cmpi ne, %13, %c0_i32 : i32
    %15 = scf.if %14 -> (vector<96x128xf32>) {
      %143 = tpu.iota {dimensions = array<i32: 0>} : vector<96x1xi32>
      %144 = vector.broadcast %5 : i32 to vector<96x1xi32>
      %145 = arith.addi %144, %143 : vector<96x1xi32>
      %c0_i32_72 = arith.constant 0 : i32
      %146 = vector.broadcast %c0_i32_72 : i32 to vector<96x1xi32>
      %147 = arith.cmpi sge, %145, %146 : vector<96x1xi32>
      %c200_i32_73 = arith.constant 200 : i32
      %148 = vector.broadcast %c200_i32_73 : i32 to vector<96x1xi32>
      %149 = arith.cmpi slt, %145, %148 : vector<96x1xi32>
      %150 = arith.andi %147, %149 : vector<96x1xi1>
      %cst_74 = arith.constant 0.000000e+00 : f32
      %151 = vector.broadcast %cst_74 : f32 to vector<96x128xf32>
      %152 = vector.shape_cast %150 : vector<96x1xi1> to vector<96x1xi1>
      %153 = vector.broadcast %152 : vector<96x1xi1> to vector<96x128xi1>
      %154 = arith.select %153, %12, %151 : vector<96x128xi1>, vector<96x128xf32>
      scf.yield %154 : vector<96x128xf32>
    } else {
      scf.yield %12 : vector<96x128xf32>
    }
    %c0_9 = arith.constant 0 : index
    %c0_10 = arith.constant 0 : index
    %c0_11 = arith.constant 0 : index
    %16 = vector.load %arg5[%c0_9, %c0_10, %c0_11] : memref<3x384x128xf32, #tpu.memory_space<vmem>>, vector<1x384x128xf32>
    %17 = vector.shape_cast %16 : vector<1x384x128xf32> to vector<384x128xf32>
    %c0_12 = arith.constant 0 : index
    %c0_13 = arith.constant 0 : index
    %c0_14 = arith.constant 0 : index
    %18 = vector.load %arg6[%c0_12, %c0_13, %c0_14] : memref<3x1x128xf32, #tpu.memory_space<vmem>>, vector<1x1x128xf32>
    %19 = vector.shape_cast %18 : vector<1x1x128xf32> to vector<1x128xf32>
    %c0_15 = arith.constant 0 : index
    %c0_16 = arith.constant 0 : index
    %c0_17 = arith.constant 0 : index
    %20 = vector.load %arg7[%c0_15, %c0_16, %c0_17] : memref<3x384x128xf32, #tpu.memory_space<vmem>>, vector<1x384x128xf32>
    %21 = vector.shape_cast %20 : vector<1x384x128xf32> to vector<384x128xf32>
    %c0_18 = arith.constant 0 : index
    %c0_19 = arith.constant 0 : index
    %c0_20 = arith.constant 0 : index
    %22 = vector.load %arg8[%c0_18, %c0_19, %c0_20] : memref<3x1x128xf32, #tpu.memory_space<vmem>>, vector<1x1x128xf32>
    %23 = vector.shape_cast %22 : vector<1x1x128xf32> to vector<1x128xf32>
    %cst = arith.constant 0.000000e+00 : f32
    %24 = vector.broadcast %cst : f32 to vector<96x128xf32>
    %25 = arith.cmpf oge, %15, %24 : vector<96x128xf32>
    %cst_21 = arith.constant 1.000000e-01 : f32
    %26 = vector.broadcast %cst_21 : f32 to vector<96x128xf32>
    %27 = arith.mulf %26, %15 : vector<96x128xf32>
    %28 = arith.select %25, %15, %27 : vector<96x128xi1>, vector<96x128xf32>
    %29 = vector.extract_strided_slice %28 {offsets = [4, 0], sizes = [86, 128], strides = [1, 1]} : vector<96x128xf32> to vector<86x128xf32>
    %30 = vector.extract_strided_slice %28 {offsets = [5, 0], sizes = [86, 128], strides = [1, 1]} : vector<96x128xf32> to vector<86x128xf32>
    %31 = vector.extract_strided_slice %28 {offsets = [6, 0], sizes = [86, 128], strides = [1, 1]} : vector<96x128xf32> to vector<86x128xf32>
    %32 = tpu.concatenate %29, %30, %31 in 1 : vector<86x128xf32>, vector<86x128xf32>, vector<86x128xf32> -> vector<86x384xf32>
    %cst_22 = arith.constant dense<0.000000e+00> : vector<86x128xf32>
    %33 = tpu.matmul %32, %17, %cst_22 {dimension_numbers = #tpu.dot_dimension_numbers<[1], [0], [0], [1], [0, 0, 1, 1], [], []>} : vector<86x384xf32>, vector<384x128xf32>, vector<86x128xf32> -> vector<86x128xf32>
    %34 = vector.broadcast %19 : vector<1x128xf32> to vector<86x128xf32>
    %35 = arith.addf %33, %34 : vector<86x128xf32>
    %cst_23 = arith.constant 0.000000e+00 : f32
    %36 = vector.broadcast %cst_23 : f32 to vector<86x128xf32>
    %37 = arith.cmpf oge, %35, %36 : vector<86x128xf32>
    %cst_24 = arith.constant 1.000000e-01 : f32
    %38 = vector.broadcast %cst_24 : f32 to vector<86x128xf32>
    %39 = arith.mulf %38, %35 : vector<86x128xf32>
    %40 = arith.select %37, %35, %39 : vector<86x128xi1>, vector<86x128xf32>
    %c5_i32 = arith.constant 5 : i32
    %41 = arith.addi %5, %c5_i32 : i32
    %42 = arith.extui %4 : i1 to i32
    %c0_i32_25 = arith.constant 0 : i32
    %43 = arith.cmpi ne, %42, %c0_i32_25 : i32
    %44 = scf.if %43 -> (vector<86x128xf32>) {
      %143 = tpu.iota {dimensions = array<i32: 0>} : vector<86x1xi32>
      %144 = vector.broadcast %41 : i32 to vector<86x1xi32>
      %145 = arith.addi %144, %143 : vector<86x1xi32>
      %c0_i32_72 = arith.constant 0 : i32
      %146 = vector.broadcast %c0_i32_72 : i32 to vector<86x1xi32>
      %147 = arith.cmpi sge, %145, %146 : vector<86x1xi32>
      %c200_i32_73 = arith.constant 200 : i32
      %148 = vector.broadcast %c200_i32_73 : i32 to vector<86x1xi32>
      %149 = arith.cmpi slt, %145, %148 : vector<86x1xi32>
      %150 = arith.andi %147, %149 : vector<86x1xi1>
      %cst_74 = arith.constant 0.000000e+00 : f32
      %151 = vector.broadcast %cst_74 : f32 to vector<86x128xf32>
      %152 = vector.shape_cast %150 : vector<86x1xi1> to vector<86x1xi1>
      %153 = vector.broadcast %152 : vector<86x1xi1> to vector<86x128xi1>
      %154 = arith.select %153, %40, %151 : vector<86x128xi1>, vector<86x128xf32>
      scf.yield %154 : vector<86x128xf32>
    } else {
      scf.yield %40 : vector<86x128xf32>
    }
    %45 = vector.extract_strided_slice %44 {offsets = [0, 0], sizes = [84, 128], strides = [1, 1]} : vector<86x128xf32> to vector<84x128xf32>
    %46 = vector.extract_strided_slice %44 {offsets = [1, 0], sizes = [84, 128], strides = [1, 1]} : vector<86x128xf32> to vector<84x128xf32>
    %47 = vector.extract_strided_slice %44 {offsets = [2, 0], sizes = [84, 128], strides = [1, 1]} : vector<86x128xf32> to vector<84x128xf32>
    %48 = tpu.concatenate %45, %46, %47 in 1 : vector<84x128xf32>, vector<84x128xf32>, vector<84x128xf32> -> vector<84x384xf32>
    %cst_26 = arith.constant dense<0.000000e+00> : vector<84x128xf32>
    %49 = tpu.matmul %48, %21, %cst_26 {dimension_numbers = #tpu.dot_dimension_numbers<[1], [0], [0], [1], [0, 0, 1, 1], [], []>} : vector<84x384xf32>, vector<384x128xf32>, vector<84x128xf32> -> vector<84x128xf32>
    %50 = vector.broadcast %23 : vector<1x128xf32> to vector<84x128xf32>
    %51 = arith.addf %49, %50 : vector<84x128xf32>
    %52 = vector.extract_strided_slice %15 {offsets = [6, 0], sizes = [84, 128], strides = [1, 1]} : vector<96x128xf32> to vector<84x128xf32>
    %53 = arith.addf %51, %52 : vector<84x128xf32>
    %c5_i32_27 = arith.constant 5 : i32
    %54 = arith.addi %5, %c5_i32_27 : i32
    %c1_i32 = arith.constant 1 : i32
    %55 = arith.addi %54, %c1_i32 : i32
    %56 = arith.extui %4 : i1 to i32
    %c0_i32_28 = arith.constant 0 : i32
    %57 = arith.cmpi ne, %56, %c0_i32_28 : i32
    %58 = scf.if %57 -> (vector<84x128xf32>) {
      %143 = tpu.iota {dimensions = array<i32: 0>} : vector<84x1xi32>
      %144 = vector.broadcast %55 : i32 to vector<84x1xi32>
      %145 = arith.addi %144, %143 : vector<84x1xi32>
      %c0_i32_72 = arith.constant 0 : i32
      %146 = vector.broadcast %c0_i32_72 : i32 to vector<84x1xi32>
      %147 = arith.cmpi sge, %145, %146 : vector<84x1xi32>
      %c200_i32_73 = arith.constant 200 : i32
      %148 = vector.broadcast %c200_i32_73 : i32 to vector<84x1xi32>
      %149 = arith.cmpi slt, %145, %148 : vector<84x1xi32>
      %150 = arith.andi %147, %149 : vector<84x1xi1>
      %cst_74 = arith.constant 0.000000e+00 : f32
      %151 = vector.broadcast %cst_74 : f32 to vector<84x128xf32>
      %152 = vector.shape_cast %150 : vector<84x1xi1> to vector<84x1xi1>
      %153 = vector.broadcast %152 : vector<84x1xi1> to vector<84x128xi1>
      %154 = arith.select %153, %53, %151 : vector<84x128xi1>, vector<84x128xf32>
      scf.yield %154 : vector<84x128xf32>
    } else {
      scf.yield %53 : vector<84x128xf32>
    }
    %c1 = arith.constant 1 : index
    %c0_29 = arith.constant 0 : index
    %c0_30 = arith.constant 0 : index
    %59 = vector.load %arg5[%c1, %c0_29, %c0_30] : memref<3x384x128xf32, #tpu.memory_space<vmem>>, vector<1x384x128xf32>
    %60 = vector.shape_cast %59 : vector<1x384x128xf32> to vector<384x128xf32>
    %c1_31 = arith.constant 1 : index
    %c0_32 = arith.constant 0 : index
    %c0_33 = arith.constant 0 : index
    %61 = vector.load %arg6[%c1_31, %c0_32, %c0_33] : memref<3x1x128xf32, #tpu.memory_space<vmem>>, vector<1x1x128xf32>
    %62 = vector.shape_cast %61 : vector<1x1x128xf32> to vector<1x128xf32>
    %c1_34 = arith.constant 1 : index
    %c0_35 = arith.constant 0 : index
    %c0_36 = arith.constant 0 : index
    %63 = vector.load %arg7[%c1_34, %c0_35, %c0_36] : memref<3x384x128xf32, #tpu.memory_space<vmem>>, vector<1x384x128xf32>
    %64 = vector.shape_cast %63 : vector<1x384x128xf32> to vector<384x128xf32>
    %c1_37 = arith.constant 1 : index
    %c0_38 = arith.constant 0 : index
    %c0_39 = arith.constant 0 : index
    %65 = vector.load %arg8[%c1_37, %c0_38, %c0_39] : memref<3x1x128xf32, #tpu.memory_space<vmem>>, vector<1x1x128xf32>
    %66 = vector.shape_cast %65 : vector<1x1x128xf32> to vector<1x128xf32>
    %cst_40 = arith.constant 0.000000e+00 : f32
    %67 = vector.broadcast %cst_40 : f32 to vector<84x128xf32>
    %68 = arith.cmpf oge, %58, %67 : vector<84x128xf32>
    %cst_41 = arith.constant 1.000000e-01 : f32
    %69 = vector.broadcast %cst_41 : f32 to vector<84x128xf32>
    %70 = arith.mulf %69, %58 : vector<84x128xf32>
    %71 = arith.select %68, %58, %70 : vector<84x128xi1>, vector<84x128xf32>
    %72 = vector.extract_strided_slice %71 {offsets = [0, 0], sizes = [78, 128], strides = [1, 1]} : vector<84x128xf32> to vector<78x128xf32>
    %73 = vector.extract_strided_slice %71 {offsets = [3, 0], sizes = [78, 128], strides = [1, 1]} : vector<84x128xf32> to vector<78x128xf32>
    %74 = vector.extract_strided_slice %71 {offsets = [6, 0], sizes = [78, 128], strides = [1, 1]} : vector<84x128xf32> to vector<78x128xf32>
    %75 = tpu.concatenate %72, %73, %74 in 1 : vector<78x128xf32>, vector<78x128xf32>, vector<78x128xf32> -> vector<78x384xf32>
    %cst_42 = arith.constant dense<0.000000e+00> : vector<78x128xf32>
    %76 = tpu.matmul %75, %60, %cst_42 {dimension_numbers = #tpu.dot_dimension_numbers<[1], [0], [0], [1], [0, 0, 1, 1], [], []>} : vector<78x384xf32>, vector<384x128xf32>, vector<78x128xf32> -> vector<78x128xf32>
    %77 = vector.broadcast %62 : vector<1x128xf32> to vector<78x128xf32>
    %78 = arith.addf %76, %77 : vector<78x128xf32>
    %cst_43 = arith.constant 0.000000e+00 : f32
    %79 = vector.broadcast %cst_43 : f32 to vector<78x128xf32>
    %80 = arith.cmpf oge, %78, %79 : vector<78x128xf32>
    %cst_44 = arith.constant 1.000000e-01 : f32
    %81 = vector.broadcast %cst_44 : f32 to vector<78x128xf32>
    %82 = arith.mulf %81, %78 : vector<78x128xf32>
    %83 = arith.select %80, %78, %82 : vector<78x128xi1>, vector<78x128xf32>
    %c3_i32 = arith.constant 3 : i32
    %84 = arith.addi %55, %c3_i32 : i32
    %85 = arith.extui %4 : i1 to i32
    %c0_i32_45 = arith.constant 0 : i32
    %86 = arith.cmpi ne, %85, %c0_i32_45 : i32
    %87 = scf.if %86 -> (vector<78x128xf32>) {
      %143 = tpu.iota {dimensions = array<i32: 0>} : vector<78x1xi32>
      %144 = vector.broadcast %84 : i32 to vector<78x1xi32>
      %145 = arith.addi %144, %143 : vector<78x1xi32>
      %c0_i32_72 = arith.constant 0 : i32
      %146 = vector.broadcast %c0_i32_72 : i32 to vector<78x1xi32>
      %147 = arith.cmpi sge, %145, %146 : vector<78x1xi32>
      %c200_i32_73 = arith.constant 200 : i32
      %148 = vector.broadcast %c200_i32_73 : i32 to vector<78x1xi32>
      %149 = arith.cmpi slt, %145, %148 : vector<78x1xi32>
      %150 = arith.andi %147, %149 : vector<78x1xi1>
      %cst_74 = arith.constant 0.000000e+00 : f32
      %151 = vector.broadcast %cst_74 : f32 to vector<78x128xf32>
      %152 = vector.shape_cast %150 : vector<78x1xi1> to vector<78x1xi1>
      %153 = vector.broadcast %152 : vector<78x1xi1> to vector<78x128xi1>
      %154 = arith.select %153, %83, %151 : vector<78x128xi1>, vector<78x128xf32>
      scf.yield %154 : vector<78x128xf32>
    } else {
      scf.yield %83 : vector<78x128xf32>
    }
    %88 = vector.extract_strided_slice %87 {offsets = [0, 0], sizes = [76, 128], strides = [1, 1]} : vector<78x128xf32> to vector<76x128xf32>
    %89 = vector.extract_strided_slice %87 {offsets = [1, 0], sizes = [76, 128], strides = [1, 1]} : vector<78x128xf32> to vector<76x128xf32>
    %90 = vector.extract_strided_slice %87 {offsets = [2, 0], sizes = [76, 128], strides = [1, 1]} : vector<78x128xf32> to vector<76x128xf32>
    %91 = tpu.concatenate %88, %89, %90 in 1 : vector<76x128xf32>, vector<76x128xf32>, vector<76x128xf32> -> vector<76x384xf32>
    %cst_46 = arith.constant dense<0.000000e+00> : vector<76x128xf32>
    %92 = tpu.matmul %91, %64, %cst_46 {dimension_numbers = #tpu.dot_dimension_numbers<[1], [0], [0], [1], [0, 0, 1, 1], [], []>} : vector<76x384xf32>, vector<384x128xf32>, vector<76x128xf32> -> vector<76x128xf32>
    %93 = vector.broadcast %66 : vector<1x128xf32> to vector<76x128xf32>
    %94 = arith.addf %92, %93 : vector<76x128xf32>
    %95 = vector.extract_strided_slice %58 {offsets = [4, 0], sizes = [76, 128], strides = [1, 1]} : vector<84x128xf32> to vector<76x128xf32>
    %96 = arith.addf %94, %95 : vector<76x128xf32>
    %c3_i32_47 = arith.constant 3 : i32
    %97 = arith.addi %55, %c3_i32_47 : i32
    %c1_i32_48 = arith.constant 1 : i32
    %98 = arith.addi %97, %c1_i32_48 : i32
    %99 = arith.extui %4 : i1 to i32
    %c0_i32_49 = arith.constant 0 : i32
    %100 = arith.cmpi ne, %99, %c0_i32_49 : i32
    %101 = scf.if %100 -> (vector<76x128xf32>) {
      %143 = tpu.iota {dimensions = array<i32: 0>} : vector<76x1xi32>
      %144 = vector.broadcast %98 : i32 to vector<76x1xi32>
      %145 = arith.addi %144, %143 : vector<76x1xi32>
      %c0_i32_72 = arith.constant 0 : i32
      %146 = vector.broadcast %c0_i32_72 : i32 to vector<76x1xi32>
      %147 = arith.cmpi sge, %145, %146 : vector<76x1xi32>
      %c200_i32_73 = arith.constant 200 : i32
      %148 = vector.broadcast %c200_i32_73 : i32 to vector<76x1xi32>
      %149 = arith.cmpi slt, %145, %148 : vector<76x1xi32>
      %150 = arith.andi %147, %149 : vector<76x1xi1>
      %cst_74 = arith.constant 0.000000e+00 : f32
      %151 = vector.broadcast %cst_74 : f32 to vector<76x128xf32>
      %152 = vector.shape_cast %150 : vector<76x1xi1> to vector<76x1xi1>
      %153 = vector.broadcast %152 : vector<76x1xi1> to vector<76x128xi1>
      %154 = arith.select %153, %96, %151 : vector<76x128xi1>, vector<76x128xf32>
      scf.yield %154 : vector<76x128xf32>
    } else {
      scf.yield %96 : vector<76x128xf32>
    }
    %c2 = arith.constant 2 : index
    %c0_50 = arith.constant 0 : index
    %c0_51 = arith.constant 0 : index
    %102 = vector.load %arg5[%c2, %c0_50, %c0_51] : memref<3x384x128xf32, #tpu.memory_space<vmem>>, vector<1x384x128xf32>
    %103 = vector.shape_cast %102 : vector<1x384x128xf32> to vector<384x128xf32>
    %c2_52 = arith.constant 2 : index
    %c0_53 = arith.constant 0 : index
    %c0_54 = arith.constant 0 : index
    %104 = vector.load %arg6[%c2_52, %c0_53, %c0_54] : memref<3x1x128xf32, #tpu.memory_space<vmem>>, vector<1x1x128xf32>
    %105 = vector.shape_cast %104 : vector<1x1x128xf32> to vector<1x128xf32>
    %c2_55 = arith.constant 2 : index
    %c0_56 = arith.constant 0 : index
    %c0_57 = arith.constant 0 : index
    %106 = vector.load %arg7[%c2_55, %c0_56, %c0_57] : memref<3x384x128xf32, #tpu.memory_space<vmem>>, vector<1x384x128xf32>
    %107 = vector.shape_cast %106 : vector<1x384x128xf32> to vector<384x128xf32>
    %c2_58 = arith.constant 2 : index
    %c0_59 = arith.constant 0 : index
    %c0_60 = arith.constant 0 : index
    %108 = vector.load %arg8[%c2_58, %c0_59, %c0_60] : memref<3x1x128xf32, #tpu.memory_space<vmem>>, vector<1x1x128xf32>
    %109 = vector.shape_cast %108 : vector<1x1x128xf32> to vector<1x128xf32>
    %cst_61 = arith.constant 0.000000e+00 : f32
    %110 = vector.broadcast %cst_61 : f32 to vector<76x128xf32>
    %111 = arith.cmpf oge, %101, %110 : vector<76x128xf32>
    %cst_62 = arith.constant 1.000000e-01 : f32
    %112 = vector.broadcast %cst_62 : f32 to vector<76x128xf32>
    %113 = arith.mulf %112, %101 : vector<76x128xf32>
    %114 = arith.select %111, %101, %113 : vector<76x128xi1>, vector<76x128xf32>
    %115 = vector.extract_strided_slice %114 {offsets = [0, 0], sizes = [66, 128], strides = [1, 1]} : vector<76x128xf32> to vector<66x128xf32>
    %116 = vector.extract_strided_slice %114 {offsets = [5, 0], sizes = [66, 128], strides = [1, 1]} : vector<76x128xf32> to vector<66x128xf32>
    %117 = vector.extract_strided_slice %114 {offsets = [10, 0], sizes = [66, 128], strides = [1, 1]} : vector<76x128xf32> to vector<66x128xf32>
    %118 = tpu.concatenate %115, %116, %117 in 1 : vector<66x128xf32>, vector<66x128xf32>, vector<66x128xf32> -> vector<66x384xf32>
    %cst_63 = arith.constant dense<0.000000e+00> : vector<66x128xf32>
    %119 = tpu.matmul %118, %103, %cst_63 {dimension_numbers = #tpu.dot_dimension_numbers<[1], [0], [0], [1], [0, 0, 1, 1], [], []>} : vector<66x384xf32>, vector<384x128xf32>, vector<66x128xf32> -> vector<66x128xf32>
    %120 = vector.broadcast %105 : vector<1x128xf32> to vector<66x128xf32>
    %121 = arith.addf %119, %120 : vector<66x128xf32>
    %cst_64 = arith.constant 0.000000e+00 : f32
    %122 = vector.broadcast %cst_64 : f32 to vector<66x128xf32>
    %123 = arith.cmpf oge, %121, %122 : vector<66x128xf32>
    %cst_65 = arith.constant 1.000000e-01 : f32
    %124 = vector.broadcast %cst_65 : f32 to vector<66x128xf32>
    %125 = arith.mulf %124, %121 : vector<66x128xf32>
    %126 = arith.select %123, %121, %125 : vector<66x128xi1>, vector<66x128xf32>
    %c5_i32_66 = arith.constant 5 : i32
    %127 = arith.addi %98, %c5_i32_66 : i32
    %128 = arith.extui %4 : i1 to i32
    %c0_i32_67 = arith.constant 0 : i32
    %129 = arith.cmpi ne, %128, %c0_i32_67 : i32
    %130 = scf.if %129 -> (vector<66x128xf32>) {
      %143 = tpu.iota {dimensions = array<i32: 0>} : vector<66x1xi32>
      %144 = vector.broadcast %127 : i32 to vector<66x1xi32>
      %145 = arith.addi %144, %143 : vector<66x1xi32>
      %c0_i32_72 = arith.constant 0 : i32
      %146 = vector.broadcast %c0_i32_72 : i32 to vector<66x1xi32>
      %147 = arith.cmpi sge, %145, %146 : vector<66x1xi32>
      %c200_i32_73 = arith.constant 200 : i32
      %148 = vector.broadcast %c200_i32_73 : i32 to vector<66x1xi32>
      %149 = arith.cmpi slt, %145, %148 : vector<66x1xi32>
      %150 = arith.andi %147, %149 : vector<66x1xi1>
      %cst_74 = arith.constant 0.000000e+00 : f32
      %151 = vector.broadcast %cst_74 : f32 to vector<66x128xf32>
      %152 = vector.shape_cast %150 : vector<66x1xi1> to vector<66x1xi1>
      %153 = vector.broadcast %152 : vector<66x1xi1> to vector<66x128xi1>
      %154 = arith.select %153, %126, %151 : vector<66x128xi1>, vector<66x128xf32>
      scf.yield %154 : vector<66x128xf32>
    } else {
      scf.yield %126 : vector<66x128xf32>
    }
    %131 = vector.extract_strided_slice %130 {offsets = [0, 0], sizes = [64, 128], strides = [1, 1]} : vector<66x128xf32> to vector<64x128xf32>
    %132 = vector.extract_strided_slice %130 {offsets = [1, 0], sizes = [64, 128], strides = [1, 1]} : vector<66x128xf32> to vector<64x128xf32>
    %133 = vector.extract_strided_slice %130 {offsets = [2, 0], sizes = [64, 128], strides = [1, 1]} : vector<66x128xf32> to vector<64x128xf32>
    %134 = tpu.concatenate %131, %132, %133 in 1 : vector<64x128xf32>, vector<64x128xf32>, vector<64x128xf32> -> vector<64x384xf32>
    %cst_68 = arith.constant dense<0.000000e+00> : vector<64x128xf32>
    %135 = tpu.matmul %134, %107, %cst_68 {dimension_numbers = #tpu.dot_dimension_numbers<[1], [0], [0], [1], [0, 0, 1, 1], [], []>} : vector<64x384xf32>, vector<384x128xf32>, vector<64x128xf32> -> vector<64x128xf32>
    %136 = vector.broadcast %109 : vector<1x128xf32> to vector<64x128xf32>
    %137 = arith.addf %135, %136 : vector<64x128xf32>
    %138 = vector.extract_strided_slice %101 {offsets = [6, 0], sizes = [64, 128], strides = [1, 1]} : vector<76x128xf32> to vector<64x128xf32>
    %139 = arith.addf %137, %138 : vector<64x128xf32>
    %c0_69 = arith.constant 0 : index
    %c0_70 = arith.constant 0 : index
    %c0_71 = arith.constant 0 : index
    %140 = vector.load %arg9[%c0_69, %c0_70, %c0_71] : memref<1x64x128xf32, #tpu.memory_space<vmem>>, vector<1x64x128xf32>
    %141 = vector.shape_cast %140 : vector<1x64x128xf32> to vector<64x128xf32>
    %142 = vector.shape_cast %139 : vector<64x128xf32> to vector<1x64x128xf32>
    tpu.vector_store %arg9[%c0_69, %c0_70, %c0_71], %142 {strides = array<i32>} : memref<1x64x128xf32, #tpu.memory_space<vmem>>, vector<1x64x128xf32>,
    return
  }
  func.func @transform_0(%arg0: i32, %arg1: i32) -> (i32, i32, i32) {
    %c4_i32 = arith.constant 4 : i32
    %0 = arith.muli %arg1, %c4_i32 : i32
    %c1_i32 = arith.constant 1 : i32
    %1 = arith.subi %0, %c1_i32 : i32
    %c0_i32 = arith.constant 0 : i32
    %2 = arith.maxsi %1, %c0_i32 : i32
    %c0_i32_0 = arith.constant 0 : i32
    %c0_i32_1 = arith.constant 0 : i32
    return %arg0, %2, %c0_i32_0 : i32, i32, i32
  }
  func.func @transform_1(%arg0: i32, %arg1: i32) -> (i32, i32, i32) {
    %c0_i32 = arith.constant 0 : i32
    %c0_i32_0 = arith.constant 0 : i32
    return %arg0, %arg1, %c0_i32 : i32, i32, i32
  }
  func.func @transform_2(%arg0: i32, %arg1: i32) -> (i32, i32, i32) {
    %c1_i32 = arith.constant 1 : i32
    %0 = arith.addi %arg1, %c1_i32 : i32
    %c4_i32 = arith.constant 4 : i32
    %1 = arith.muli %0, %c4_i32 : i32
    %c12_i32 = arith.constant 12 : i32
    %2 = arith.minsi %1, %c12_i32 : i32
    %c0_i32 = arith.constant 0 : i32
    %c0_i32_0 = arith.constant 0 : i32
    return %arg0, %2, %c0_i32 : i32, i32, i32
  }
  func.func @transform_3(%arg0: i32, %arg1: i32) -> (i32, i32, i32) {
    %c0_i32 = arith.constant 0 : i32
    %c0_i32_0 = arith.constant 0 : i32
    %c0_i32_1 = arith.constant 0 : i32
    %c0_i32_2 = arith.constant 0 : i32
    return %c0_i32, %c0_i32_0, %c0_i32_1 : i32, i32, i32
  }
  func.func @transform_4(%arg0: i32, %arg1: i32) -> (i32, i32, i32) {
    %c0_i32 = arith.constant 0 : i32
    %c0_i32_0 = arith.constant 0 : i32
    %c0_i32_1 = arith.constant 0 : i32
    %c0_i32_2 = arith.constant 0 : i32
    return %c0_i32, %c0_i32_0, %c0_i32_1 : i32, i32, i32
  }
  func.func @transform_5(%arg0: i32, %arg1: i32) -> (i32, i32, i32) {
    %c0_i32 = arith.constant 0 : i32
    %c0_i32_0 = arith.constant 0 : i32
    %c0_i32_1 = arith.constant 0 : i32
    %c0_i32_2 = arith.constant 0 : i32
    return %c0_i32, %c0_i32_0, %c0_i32_1 : i32, i32, i32
  }
  func.func @transform_6(%arg0: i32, %arg1: i32) -> (i32, i32, i32) {
    %c0_i32 = arith.constant 0 : i32
    %c0_i32_0 = arith.constant 0 : i32
    %c0_i32_1 = arith.constant 0 : i32
    %c0_i32_2 = arith.constant 0 : i32
    return %c0_i32, %c0_i32_0, %c0_i32_1 : i32, i32, i32
  }
  func.func @transform_7(%arg0: i32, %arg1: i32) -> (i32, i32, i32) {
    %c0_i32 = arith.constant 0 : i32
    %c0_i32_0 = arith.constant 0 : i32
    return %arg0, %arg1, %c0_i32 : i32, i32, i32
  }
}

</mosaic_0001>

<bundles_post_ra>
// kernel: residual_block_forward.1
= control target key start
LH: loop header
LB: loop body
LE: loop exit
PB: predicated region body
PF: predicated region fallthrough
CT: control target
= control target key end

     0   :  { %12 = vsyncpa [#allocation3], 0  ;;  %s6584_s0 = inlined_call_operand.vmem [shape: f32[2,200,128], index: 0, kind: input, shape index: {}, may-alias: {0,1,2}]   ;;  %s6585_s1 = inlined_call_operand.vmem [shape: f32[2,200,128], index: 1, kind: input, shape index: {}, may-alias: {0,1,2}]   ;;  %s6586_s2 = inlined_call_operand.vmem [shape: f32[2,200,128], index: 2, kind: input, shape index: {}, may-alias: {0,1,2}]   ;;  %s6587_s3 = inlined_call_operand.vmem [shape: f32[3,384,128], index: 3, kind: input, shape index: {}]   ;;  %s6588_s4 = inlined_call_operand.vmem [shape: f32[3,1,128], index: 4, kind: input, shape index: {}]   ;;  %s6589_s5 = inlined_call_operand.vmem [shape: f32[3,384,128], index: 5, kind: input, shape index: {}]   ;;  %s6590_s6 = inlined_call_operand.vmem [shape: f32[3,1,128], index: 6, kind: input, shape index: {}]   ;;  %s6591_s7 = inlined_call_operand.hbm [shape: f32[2,200,128], index: 7, kind: output, shape index: {}]  }
   0x1   :  { %14 = vsyncpa [#allocation3 + $0x1], 0  ;;  %s4418_s24 = smov 0   ;;  %s4420_s25 = smov 0  }
   0x2   :  { %s4422_s26 = smov 0   ;;  %s4424_s27 = smov 0  }
   0x3   :  { %s4426_s28 = smov 0   ;;  %s4428_s29 = smov 0  }
   0x4   :  { %s4430_s30 = smov 0   ;;  %s4432_s8 = smov 0  }
   0x5 LB: > { %6599 = sst [smem:[#allocation5_spill]] %s4353_s26  ;;  %s3349_s9 = sadd.s32 4294967295, %s4373_s8   ;;  %s4373_s8 = sphi %s4432_s8, %s20_s8   ;;  %s4369_s30 = sphi %s4430_s30, %s6639_s30   ;;  %s4365_s29 = sphi %s4428_s29, %s6638_s29   ;;  %s4361_s28 = sphi %s4426_s28, %s6637_s28   ;;  %s4357_s27 = sphi %s4424_s27, %s6636_s27   ;;  %s4353_s26 = sphi %s4422_s26, %s6635_s26   ;;  %s4349_s25 = sphi %s4420_s25, %s6641_s25   ;;  %s4345_s24 = sphi %s4418_s24, %s6640_s24  }
   0x6   : > { %6600 = sst [smem:[#allocation6_spill]] %s4365_s29  ;;  %s3350_s10 = sadd.s32 4294967294, %s4373_s8  }
   0x7   : > { %6601 = sst [smem:[#allocation7_spill]] %s4369_s30  ;;  %s29_s11 = sadd.s32 1, %s4365_s29 }
   0x8   : > { %p30_p0 = scmp.ge.s32.totalorder %s29_s11, 4  ;;  %s32_s12 = sadd.s32 1, %s4369_s30 }
   0x9   : > { %p235_p1 = scmp.ne.s32.totalorder %s4353_s26, %s4349_s25  ;;  %p236_p2 = scmp.eq.s32.totalorder %s3349_s9, 7 }
   0xa   : > { %s6643_s11 = smov (%p30_p0, %s29_s11), 0  ;;  %s6645_s12 = smov (!%p30_p0, %s32_s12), %s4369_s30 }
   0xb   : > { %6602 = sst [smem:[#allocation8_spill]] %s6643_s11  ;;  %s221_s13 = ssub.s32 %s4365_s29, %s6643_s11 }
   0xc   : > { %p4469_p3 = por %p236_p2, %p235_p1  ;;  %p34_p4 = scmp.ge.s32.totalorder %s6645_s12, 2 }
   0xd   : > { %p241_p5 = scmp.ne.s32.totalorder %s4349_s25, %s4345_s24  ;;  %p242_p6 = scmp.eq.s32.totalorder %s3350_s10, 7 }
   0xe   : > { %p3359_p7 = scmp.ge.s32.totalorder %s4373_s8, 1  ;;  %s6647_s12 = smov (%p34_p4, %s6645_s12), 0 }
   0xf   : > { %6604 = sst [smem:[#allocation9_spill]] %s6647_s12  ;;  %p4478_p8 = por %p242_p6, %p241_p5 }
  0x10   : > { %p351_p9 = scmp.lt.s32.totalorder %s4373_s8, 9  ;;  %s220_s16 = ssub.s32 %s4369_s30, %s6647_s12 }
  0x11   : > { %s6605_s15 = scalar_select %p4478_p8, 1, 0 }
  0x12   : > { %s225_s17 = sadd.s32 1, %s4353_s26  ;;  %s222_s18 = sor.u32 %s221_s13, %s220_s16 }
  0x13   : > { %6606 = sst [smem:[#allocation10_spill]] %s6605_s15  ;;  %p352_p10 = pnand %p3359_p7, %p351_p9 }
  0x14   : > { %p223_p11 = scmp.eq.s32.totalorder %s222_s18, 0  ;;  %s6593_s13 = sshll.u32 (!%p352_p10), %s4357_s27, 2 }
  0x15   : > { %355 = sbr.rel (%p352_p10) target bundleno = 1121 (0x461), region = 48  ;;  %p434_p12 = scmp.lt.s32.totalorder (!%p352_p10), %s4361_s28, 1 }
  0x16   : > { %s4487_s19 = scalar_select %p223_p11, %s4353_s26, %s225_s17  }
  0x17   : > { %s3362_s21 = sadd.s32 (!%p352_p10), 4294967295, %s6593_s13  ;;  %s4509_s22 = sshll.u32 (!%p352_p10), %s4357_s27, 3 }
  0x18   : > { %6607 = sst [smem:[#allocation11_spill]] %s4487_s19  ;;  %p427_p13 = scmp.gt.s32.totalorder (!%p352_p10), %s3362_s21, 0 }
  0x19   : > { %p458_p0 = scmp.lt.s32.totalorder (!%p352_p10), %s4509_s22, 24  ;;  %s4539_s20 = sshll.u32 (!%p352_p10), %s4357_s27, 6 }
  0x1a   : > { %v693_v0 = vld [vmem:[%s6587_s3 + $0x178] sm:$0xff]  ;;  %v692_v2 = vld [vmem:[%s6587_s3 + $0x170] sm:$0xff]  ;;  %v691_v5 = vld [vmem:[%s6587_s3 + $0x168] sm:$0xff]  ;;  %s435_s23 = scalar_select %p434_p12, %s4361_s28, 1  ;;  %v521_v11 = vlaneseq  ;;  %vm816_vm4 = vcmask 1045504   ;;  %vm792_vm5 = vcmask 1046528  }
  0x1b   : > { %v661_v1 = vld [vmem:[%s6587_s3 + $0x78] sm:$0xff]  ;;  %1046 = vmatpush.msra.mxu2 %v693_v0  ;;  %v660_v3 = vld [vmem:[%s6587_s3 + $0x70] sm:$0xff]  ;;  %v659_v6 = vld [vmem:[%s6587_s3 + $0x68] sm:$0xff]  ;;  %s6649_s21 = smov (!%p427_p13, %s3362_s21), 0  ;;  %p501_p1 = scmp.lt.s32.totalorder %s4539_s20, 16  ;;  %vm843_vm12 = vcmask 1043456  }
  0x1c   : > { %946 = vmatpush.msra.mxu0 %v661_v1  ;;  %v677_v4 = vld [vmem:[%s6587_s3 + $0xf8] sm:$0xff]  ;;  %v676_v7 = vld [vmem:[%s6587_s3 + $0xf0] sm:$0xff]  ;;  %v675_v8 = vld [vmem:[%s6587_s3 + $0xe8] sm:$0xff]  ;;  %s4536_s18 = smul.u32 25, %s435_s23  ;;  %s3363_s11 = sshll.u32 %s6649_s21, 1  ;;  %v4561_v18 = vshrl.u32 %v521_v11, 7 }
  0x1d   : > { %996 = vmatpush.msra.mxu1 %v677_v4  ;;  %1047 = vmatpush.msra.mxu2 %v692_v2  ;;  %v690_v9 = vld [vmem:[%s6587_s3 + $0x160] sm:$0xff]  ;;  %v689_v13 = vld [vmem:[%s6587_s3 + $0x158] sm:$0xff]  ;;  %p436_p2 = scmp.lt.s32.totalorder %s3363_s11, 24  ;;  %s502_s17 = sadd.s32 80, %s4539_s20  ;;  %v688_v16 = vld [vmem:[%s6587_s3 + $0x150] sm:$0xff] }
  0x1e   : > { %947 = vmatpush.msra.mxu0 %v660_v3  ;;  %v658_v10 = vld [vmem:[%s6587_s3 + $0x60] sm:$0xff]  ;;  %v657_v14 = vld [vmem:[%s6587_s3 + $0x58] sm:$0xff]  ;;  %v656_v17 = vld [vmem:[%s6587_s3 + $0x50] sm:$0xff]  ;;  %s459_s21 = scalar_select %p458_p0, %s4509_s22, 24  ;;  %v4593_v25 = vadd.s32 8, %v4561_v18  ;;  %v4596_v26 = vadd.s32 16, %v4561_v18 }
  0x1f   : > { %997 = vmatpush.msra.mxu1 %v676_v7  ;;  %1048 = vmatpush.msra.mxu2 %v691_v5  ;;  %v674_v12 = vld [vmem:[%s6587_s3 + $0xe0] sm:$0xff]  ;;  %v673_v15 = vld [vmem:[%s6587_s3 + $0xd8] sm:$0xff]  ;;  %v672_v19 = vld [vmem:[%s6587_s3 + $0xd0] sm:$0xff]  ;;  %s6651_s11 = smov (!%p436_p2, %s3363_s11), 24  ;;  %p4573_p4 = scmp.gt.s32.totalorder %s502_s17, 200  ;;  %v4599_v27 = vadd.s32 24, %v4561_v18 }
  0x20   : > { %948 = vmatpush.msra.mxu0 %v659_v6  ;;  %v687_v20 = vld [vmem:[%s6587_s3 + $0x148] sm:$0xff]  ;;  %s461_s13 = sadd.s32 %s4536_s18, %s459_s21  ;;  %s439_s10 = sadd.s32 %s4536_s18, %s6651_s11  ;;  %v686_v23 = vld [vmem:[%s6587_s3 + $0x140] sm:$0xff]  ;;  %v4618_v29 = vadd.s32 32, %v4561_v18  ;;  %v4621_v30 = vadd.s32 40, %v4561_v18  ;;  %v685_v31 = vld [vmem:[%s6587_s3 + $0x138] sm:$0xff]  ;;  %v4682_v49 = vadd.s32 48, %v4561_v18 }
  0x21   : > { %998 = vmatpush.msra.mxu1 %v675_v8  ;;  %1049 = vmatpush.msra.mxu2 %v690_v9  ;;  %v655_v21 = vld [vmem:[%s6587_s3 + $0x48] sm:$0xff]  ;;  %s3366_s16 = sshll.u32 %s461_s13, 3  ;;  %v654_v24 = vld [vmem:[%s6587_s3 + $0x40] sm:$0xff]  ;;  %s3364_s30 = sshll.u32 %s439_s10, 3  ;;  %v653_v32 = vld [vmem:[%s6587_s3 + $0x38] sm:$0xff] }
  0x22   : > { %949 = vmatpush.msra.mxu0 %v658_v10  ;;  %v671_v22 = vld [vmem:[%s6587_s3 + $0xc8] sm:$0xff]  ;;  %s4590_s19 = scalar_lea.vmem %s6585_s1, %s3366_s16  ;;  %v670_v28 = vld [vmem:[%s6587_s3 + $0xc0] sm:$0xff]  ;;  %s4607_s12 = scalar_lea.vmem %s6584_s0, %s3364_s30  ;;  %v684_v33 = vld [vmem:[%s6587_s3 + $0x130] sm:$0xff] }
  0x23   : > { %999 = vmatpush.msra.mxu1 %v674_v12  ;;  %1050 = vmatpush.msra.mxu2 %v689_v13  ;;  %p4613_p5 = por %p4573_p4, %p501_p1  ;;  %s3371_s9 = sadd.s32 4294967280, %s4539_s20  ;;  %v669_v34 = vld [vmem:[%s6587_s3 + $0xb8] sm:$0xff]  ;;  %v652_v36 = vld [vmem:[%s6587_s3 + $0x30] sm:$0xff]  ;;  %v683_v37 = vld [vmem:[%s6587_s3 + $0x128] sm:$0xff] }
  0x24   : > { %950 = vmatpush.msra.mxu0 %v657_v14  ;;  %s6610_s30 = sshll.u32 %s4357_s27, 2  ;;  %v4640_v35 = vstv %s3371_s9  ;;  %v651_v38 = vld [vmem:[%s6587_s3 + $0x28] sm:$0xff]  ;;  %v668_v43 = vld [vmem:[%s6587_s3 + $0xb0] sm:$0xff]  ;;  %v506_v45 = vld [vmem:[%s4607_s12] sm:$0xff]  ;;  %s2036_s29 = sadd.s32 4294967289, %s4539_s20 }
  0x25   : > { %1000 = vmatpush.msra.mxu1 %v673_v15  ;;  %1051 = vmatpush.msra.mxu2 %v688_v16  ;;  %s4632_s23 = sadd.s32 4, %s6610_s30  ;;  %v535_v39 = vadd.s32 %v4640_v35, %v4561_v18  ;;  %v536_v40 = vadd.s32 %v4640_v35, %v4593_v25  ;;  %v537_v41 = vadd.s32 %v4640_v35, %v4596_v26  ;;  %v667_v44 = vld [vmem:[%s6587_s3 + $0xa8] sm:$0xff]  ;;  %v682_v50 = vld [vmem:[%s6587_s3 + $0x120] sm:$0xff]  ;;  %v681_v56 = vld [vmem:[%s6587_s3 + $0x118] sm:$0xff]  ;;  %s422_s11 = sand.u32 1, %s4349_s25  }
  0x26   : > { %951 = vmatpush.msra.mxu0 %v656_v17  ;;  %s3617_s16 = scalar_select %p4613_p5, 1, 0  ;;  %v538_v42 = vadd.s32 %v4640_v35, %v4599_v27  ;;  %v4675_v47 = vadd.s32 %v4640_v35, %v4618_v29  ;;  %v4679_v48 = vadd.s32 %v4640_v35, %v4621_v30  ;;  %v650_v51 = vld [vmem:[%s6587_s3 + $0x20] sm:$0xff]  ;;  %v507_v52 = vld [vmem:[%s4607_s12 + $0x8] sm:$0xff]  ;;  %v649_v57 = vld [vmem:[%s6587_s3 + $0x18] sm:$0xff]  ;;  %v541_v61 = vadd.s32 %v4640_v35, %v4682_v49 }
  0x27   : > { %1001 = vmatpush.msra.mxu1 %v672_v19  ;;  %1052 = vmatpush.msra.mxu2 %v687_v20  ;;  %p471_p6 = scmp.lt.s32.totalorder %s4632_s23, 12  ;;  %vm547_vm0 = vcmp.ge.s32.totalorder %v535_v39, 0  ;;  %vm548_vm1 = vcmp.ge.s32.totalorder %v536_v40, 0  ;;  %vm549_vm2 = vcmp.ge.s32.totalorder %v537_v41, 0  ;;  %vm559_vm3 = vcmp.lt.s32.totalorder %v535_v39, 200  ;;  %v508_v53 = vld [vmem:[%s4590_s19] sm:$0xff] }
  0x28   : > { %952 = vmatpush.msra.mxu0 %v655_v21  ;;  %v4669_v46 = vstv %s3617_s16  ;;  %s4132_s27 = scalar_select %p4613_p5, 0, 1  ;;  %vm560_vm6 = vcmp.lt.s32.totalorder %v536_v40, 200  ;;  %vm561_vm7 = vcmp.lt.s32.totalorder %v537_v41, 200  ;;  %vm4697_vm8 = vmand %vm547_vm0, %vm559_vm3  ;;  %v666_v58 = vld [vmem:[%s6587_s3 + $0xa0] sm:$0xff]  ;;  %vm550_vm13 = vcmp.ge.s32.totalorder %v538_v42, 0 }
  0x29   : > { %1002 = vmatpush.msra.mxu1 %v671_v22  ;;  %1053 = vmatpush.msra.mxu2 %v686_v23  ;;  %s6653_s23 = smov (!%p471_p6, %s4632_s23), 12  ;;  %vm3619_vm9 = vcmp.ne.s32.totalorder %v4669_v46, 0  ;;  %vm4714_vm10 = vmand %vm548_vm1, %vm560_vm6  ;;  %v607_v60 = vsel %vm4697_vm8, %v506_v45, 0.0  ;;  %vm562_vm14 = vcmp.lt.s32.totalorder %v538_v42, 200  ;;  %v509_v0 = vld [vmem:[%s4590_s19 + $0x8] sm:$0xff]  ;;  %vm551_vm0 = vcmp.ge.s32.totalorder %v4675_v47, 0 }
  0x2a   : > { %953 = vmatpush.msra.mxu0 %v654_v24  ;;  %v4702_v55 = vstv %s4132_s27  ;;  %s3368_s13 = sshll.u32 %s6653_s23, 1  ;;  %vm4724_vm15 = vmand %vm549_vm2, %vm561_vm7  ;;  %v608_v62 = vsel %vm4714_vm10, %v507_v52, 0.0  ;;  %v3620_v63 = vsel %vm3619_vm9, %v607_v60, 0  ;;  %vm563_vm1 = vcmp.lt.s32.totalorder %v4675_v47, 200  ;;  %v680_v1 = vld [vmem:[%s6587_s3 + $0x110] sm:$0xff]  ;;  %v665_v3 = vld [vmem:[%s6587_s3 + $0x98] sm:$0xff] }
  0x2b   : > { %1003 = vmatpush.msra.mxu1 %v670_v28  ;;  %1054 = vmatpush.msra.mxu2 %v685_v31  ;;  %vm3668_vm11 = vcmp.ne.s32.totalorder %v4702_v55, 0  ;;  %p4735_p7 = scmp.lt.s32.totalorder %s3368_s13, 24  ;;  %v648_v2 = vld [vmem:[%s6587_s3 + $0x10] sm:$0xff]  ;;  %v609_v4 = vsel %vm4724_vm15, %v508_v53, 0.0  ;;  %v3624_v5 = vsel %vm3619_vm9, %v608_v62, 0  ;;  %vm4758_vm2 = vmand %vm550_vm13, %vm562_vm14  ;;  %vm552_vm3 = vcmp.ge.s32.totalorder %v4679_v48, 0 }
  0x2c   : > { %954 = vmatpush.msra.mxu0 %v653_v32  ;;  %v4754_v6 = vsel %vm3668_vm11, %v506_v45, %v3620_v63  ;;  %v664_v8 = vld [vmem:[%s6587_s3 + $0x90] sm:$0xff]  ;;  %v3628_v9 = vsel %vm3619_vm9, %v609_v4, 0  ;;  %v4770_v10 = vsel %vm3668_vm11, %v507_v52, %v3624_v5  ;;  %v679_v12 = vld [vmem:[%s6587_s3 + $0x108] sm:$0xff]  ;;  %v610_v15 = vsel %vm4758_vm2, %v509_v0, 0.0  ;;  %vm4831_vm13 = vmand %vm551_vm0, %vm563_vm1  ;;  %s1534_s23 = sadd.s32 4294967286, %s4539_s20  ;;  %s2872_s12 = sadd.s32 4294967295, %s4539_s20 }
  0x2d   : > { %1004 = vmatpush.msra.mxu1 %v669_v34  ;;  %1055 = vmatpush.msra.mxu2 %v684_v33  ;;  %vm744_vm6 = vcmp.ge.f32.partialorder %v4754_v6, 0.0  ;;  %v756_v11 = vmul.f32 0.1, %v4754_v6  ;;  %s6655_s13 = smov (!%p4735_p7, %s3368_s13), 24  ;;  %v4783_v13 = vsel %vm3668_vm11, %v508_v53, %v3628_v9  ;;  %vm745_vm7 = vcmp.ge.f32.partialorder %v4770_v10, 0.0  ;;  %v647_v20 = vld [vmem:[%s6587_s3 + $0x8] sm:$0xff] }
  0x2e   : > { %955 = vmatpush.msra.mxu0 %v652_v36  ;;  %v757_v14 = vmul.f32 0.1, %v4770_v10  ;;  %vm746_vm8 = vcmp.ge.f32.partialorder %v4783_v13, 0.0  ;;  %v758_v16 = vmul.f32 0.1, %v4783_v13  ;;  %v3632_v19 = vsel %vm3619_vm9, %v610_v15, 0  ;;  %s483_s9 = sadd.s32 %s4536_s18, %s6655_s13 }
  0x2f   : > { %1005 = vmatpush.msra.mxu1 %v668_v43  ;;  %1056 = vmatpush.msra.mxu2 %v683_v37  ;;  %v768_v17 = vsel %vm744_vm6, %v4754_v6, %v756_v11  ;;  %v663_v32 = vld [vmem:[%s6587_s3 + $0x88] sm:$0xff]  ;;  %v678_v36 = vld [vmem:[%s6587_s3 + $0x100] sm:$0xff]  ;;  %v4816_v40 = vsel %vm3668_vm11, %v509_v0, %v3632_v19  ;;  %v511_v60 = vld [vmem:[%s4590_s19 + $0x18] sm:$0xff]  ;;  %vm564_vm14 = vcmp.lt.s32.totalorder %v4679_v48, 200  ;;  %vm553_vm1 = vcmp.ge.s32.totalorder %v541_v61, 0  ;;  %s3369_s30 = sshll.u32 %s483_s9, 3 }
  0x30   : > { %956 = vmatpush.msra.mxu0 %v651_v38  ;;  %v769_v21 = vsel %vm745_vm7, %v4770_v10, %v757_v14  ;;  %v817_v22 = vrot.slane %v768_v17, 2  ;;  %v844_v23 = vrot.slane %v768_v17, 4  ;;  %v793_v24 = vrot.slane %v768_v17, 1  ;;  %v646_v38 = vld [vmem:[%s6587_s3] sm:$0xff]  ;;  %vm576_vm15 = vmand %vm552_vm3, %vm564_vm14  ;;  %s4949_s18 = scalar_lea.vmem %s6586_s2, %s3369_s30  ;;  %s2406_s9 = sadd.s32 4294967290, %s4539_s20 }
  0x31   : > { %1006 = vmatpush.msra.mxu1 %v667_v44  ;;  %1057 = vmatpush.msra.mxu2 %v682_v50  ;;  %v4801_v28 = vsel %vm746_vm8, %v4783_v13, %v758_v16  ;;  %v818_v31 = vrot.slane %v769_v21, 2  ;;  %v845_v33 = vrot.slane %v769_v21, 4  ;;  %v794_v34 = vrot.slane %v769_v21, 1  ;;  %v662_v44 = vld [vmem:[%s6587_s3 + $0x80] sm:$0xff]  ;;  %v510_v50 = vld [vmem:[%s4590_s19 + $0x10] sm:$0xff] }
  0x32   : > { %957 = vmatpush.msra.mxu0 %v650_v51  ;;  %v820_v37 = vrot.slane %v4801_v28, 2  ;;  %v796_v39 = vrot.slane %v4801_v28, 1  ;;  %v853_v41 = vrot.slane %v4801_v28, 4  ;;  %vm747_vm10 = vcmp.ge.f32.partialorder %v4816_v40, 0.0 }
  0x33   : > { %1007 = vmatpush.msra.mxu1 %v666_v58  ;;  %1058 = vmatpush.msra.mxu2 %v681_v56  ;;  %v819_v42 = vsel %vm816_vm4, %v817_v22, %v818_v31  ;;  %v846_v43 = vsel %vm843_vm12, %v844_v23, %v845_v33  ;;  %v795_v45 = vsel %vm792_vm5, %v793_v24, %v794_v34  ;;  %v759_v59 = vmul.f32 0.1, %v4816_v40  ;;  %v512_v24 = vld [vmem:[%s4590_s19 + $0x20] sm:$0xff] }
  0x34   : > { %958 = vmatpush.msra.mxu0 %v649_v57  ;;  %v821_v52 = vsel %vm816_vm4, %v818_v31, %v820_v37  ;;  %v850_v53 = vrot.slane %v819_v42, 4  ;;  %v797_v54 = vsel %vm792_vm5, %v794_v34, %v796_v39  ;;  %v847_v56 = vrot.slane %v795_v45, 4 }
  0x35   : > { %1008 = vmatpush.msra.mxu1 %v665_v3  ;;  %1059 = vmatpush.msra.mxu2 %v680_v1  ;;  %v851_v57 = vrot.slane %v821_v52, 4  ;;  %v848_v58 = vrot.slane %v797_v54, 4  ;;  %v611_v47 = vsel %vm4831_vm13, %v510_v50, 0.0  ;;  %v4849_v0 = vsel %vm747_vm10, %v4816_v40, %v759_v59 }
  0x36   : > { %959 = vmatpush.msra.mxu0 %v648_v2  ;;  %v3636_v1 = vsel %vm3619_vm9, %v611_v47, 0  ;;  %v822_v2 = vrot.slane %v4849_v0, 2  ;;  %v854_v3 = vsel %vm843_vm12, %v845_v33, %v853_v41  ;;  %v798_v4 = vrot.slane %v4849_v0, 1 }
  0x37   : > { %1009 = vmatpush.msra.mxu1 %v664_v8  ;;  %1060 = vmatpush.msra.mxu2 %v679_v12  ;;  %v852_v62 = vsel %vm843_vm12, %v850_v53, %v851_v57  ;;  %v849_v63 = vsel %vm843_vm12, %v847_v56, %v848_v58  ;;  %v4862_v5 = vsel %vm3668_vm11, %v510_v50, %v3636_v1  ;;  %v612_v48 = vsel %vm576_vm15, %v511_v60, 0.0  ;;  %v513_v50 = vld [vmem:[%s4590_s19 + $0x28] sm:$0xff] }
  0x38   : > { %960 = vmatpush.msra.mxu0 %v647_v20  ;;  %vm748_vm0 = vcmp.ge.f32.partialorder %v4862_v5, 0.0  ;;  %v760_v7 = vmul.f32 0.1, %v4862_v5  ;;  %v4867_v8 = vadd.s32 56, %v4561_v18  ;;  %v823_v9 = vsel %vm816_vm4, %v820_v37, %v822_v2 }
  0x39   : > { %1010 = vmatpush.msra.mxu1 %v663_v32  ;;  %1061 = vmatpush.msra.mxu2 %v678_v36  ;;  %v799_v11 = vsel %vm792_vm5, %v796_v39, %v798_v4  ;;  %v3640_v12 = vsel %vm3619_vm9, %v612_v48, 0  ;;  %v857_v14 = vrot.slane %v823_v9, 4  ;;  %vm565_vm3 = vcmp.lt.s32.totalorder %v541_v61, 200 }
  0x3a   : > { %961 = vmatpush.msra.mxu0 %v646_v38  ;;  %1062 = vmatmul.f32.vlgmr.msra.gmra.mxu2 %v852_v62  ;;  %v855_v15 = vrot.slane %v799_v11, 4  ;;  %v4874_v16 = vsel %vm748_vm0, %v4862_v5, %v760_v7  ;;  %v4878_v17 = vsel %vm3668_vm11, %v511_v60, %v3640_v12  ;;  %vm577_vm6 = vmand %vm553_vm1, %vm565_vm3  ;;  %v542_v33 = vadd.s32 %v4640_v35, %v4867_v8 }
  0x3b   : > { %962 = vmatmul.f32.vlgmr.msra.gmra.mxu0 %v846_v43  ;;  %1011 = vmatpush.msra.mxu1 %v662_v44  ;;  %v824_v19 = vrot.slane %v4874_v16, 2  ;;  %v800_v20 = vrot.slane %v4874_v16, 1  ;;  %vm749_vm2 = vcmp.ge.f32.partialorder %v4878_v17, 0.0  ;;  %v761_v21 = vmul.f32 0.1, %v4878_v17 }
  0x3c   : > { %1012 = vmatmul.f32.vlgmr.msra.gmra.mxu1 %v849_v63  ;;  %v858_v22 = vsel %vm843_vm12, %v851_v57, %v857_v14  ;;  %v856_v23 = vsel %vm843_vm12, %v848_v58, %v855_v15  ;;  %v859_v34 = vrot.slane %v4849_v0, 4  ;;  %v613_v37 = vsel %vm577_vm6, %v512_v24, 0.0 }
  0x3d   : > { %v825_v31 = vsel %vm816_vm4, %v822_v2, %v824_v19  ;;  %v801_v32 = vsel %vm792_vm5, %v798_v4, %v800_v20  ;;  %v4894_v36 = vsel %vm749_vm2, %v4878_v17, %v761_v21  ;;  %v3644_v42 = vsel %vm3619_vm9, %v613_v37, 0 }
  0x3e   : > { %v863_v38 = vrot.slane %v825_v31, 4  ;;  %v861_v39 = vrot.slane %v801_v32, 4  ;;  %vm554_vm7 = vcmp.ge.s32.totalorder %v542_v33, 0  ;;  %v826_v43 = vrot.slane %v4894_v36, 2  ;;  %v516_v31 = vld [vmem:[%s4949_s18] sm:$0xff] }
  0x3f   : > { %v802_v44 = vrot.slane %v4894_v36, 1  ;;  %v4902_v45 = vsel %vm3668_vm11, %v512_v24, %v3644_v42  ;;  %v860_v51 = vsel %vm843_vm12, %v853_v41, %v859_v34  ;;  %vm566_vm8 = vcmp.lt.s32.totalorder %v542_v33, 200  ;;  %v726_v33 = vld [vmem:[%s6589_s5 + $0xf8] sm:$0xff] }
  0x40   : > { %v762_v52 = vmul.f32 0.1, %v4902_v45  ;;  %vm750_vm10 = vcmp.ge.f32.partialorder %v4902_v45, 0.0  ;;  %vm578_vm13 = vmand %vm554_vm7, %vm566_vm8  ;;  %v4911_v53 = vadd.s32 64, %v4561_v18  ;;  %v4914_v54 = vadd.s32 72, %v4561_v18  ;;  %1376 = vmatpush.msrb.mxu0 %v726_v33  ;;  %v740_v33 = vld [vmem:[%s6589_s5 + $0x168] sm:$0xff] }
  0x41   : > { %v864_v56 = vsel %vm843_vm12, %v857_v14, %v863_v38  ;;  %v862_v57 = vsel %vm843_vm12, %v855_v15, %v861_v39  ;;  %v614_v28 = vsel %vm578_vm13, %v513_v50, 0.0  ;;  %v827_v41 = vsel %vm816_vm4, %v824_v19, %v826_v43 }
  0x42   : > { %1065 = vmatmul.f32.gmra.mxu2 %v858_v22  ;;  %v803_v58 = vsel %vm792_vm5, %v800_v20, %v802_v44  ;;  %v3648_v59 = vsel %vm3619_vm9, %v614_v28, 0  ;;  %v865_v47 = vrot.slane %v4874_v16, 4  ;;  %v4924_v60 = vsel %vm750_vm10, %v4902_v45, %v762_v52 }
  0x43   : > { %965 = vmatmul.f32.gmra.mxu0 %v854_v3  ;;  %v543_v61 = vadd.s32 %v4640_v35, %v4911_v53  ;;  %v4930_v62 = vsel %vm3668_vm11, %v513_v50, %v3648_v59  ;;  %v544_v63 = vadd.s32 %v4640_v35, %v4914_v54  ;;  %v4935_v0 = vadd.s32 80, %v4561_v18  ;;  %v514_v3 = vld [vmem:[%s4590_s19 + $0x30] sm:$0xff] }
  0x44   : > { %1015 = vmatmul.f32.gmra.mxu1 %v856_v23  ;;  %v869_v1 = vrot.slane %v827_v41, 4  ;;  %v867_v2 = vrot.slane %v803_v58, 4  ;;  %v828_v4 = vrot.slane %v4924_v60, 2  ;;  %v804_v7 = vrot.slane %v4924_v60, 1  ;;  %v515_v23 = vld [vmem:[%s4590_s19 + $0x38] sm:$0xff]  ;;  %s1129_s19 = sadd.s32 4294967285, %s4539_s20 }
  0x45   : > { %vm555_vm14 = vcmp.ge.s32.totalorder %v543_v61, 0  ;;  %vm567_vm15 = vcmp.lt.s32.totalorder %v543_v61, 200  ;;  %v866_v48 = vsel %vm843_vm12, %v859_v34, %v865_v47  ;;  %vm751_vm0 = vcmp.ge.f32.partialorder %v4930_v62, 0.0  ;;  %v517_v61 = vld [vmem:[%s4949_s18 + $0x8] sm:$0xff]  ;;  %s3360_s20 = sshll.u32 %s422_s11, 6 }
  0x46   : > { %v763_v9 = vmul.f32 0.1, %v4930_v62  ;;  %vm579_vm1 = vmand %vm555_vm14, %vm567_vm15  ;;  %vm556_vm2 = vcmp.ge.s32.totalorder %v544_v63, 0  ;;  %vm568_vm3 = vcmp.lt.s32.totalorder %v544_v63, 200  ;;  %v545_v12 = vadd.s32 %v4640_v35, %v4935_v0 }
  0x47   : > { %v615_v11 = vsel %vm579_vm1, %v514_v3, 0.0  ;;  %v870_v14 = vsel %vm843_vm12, %v863_v38, %v869_v1  ;;  %v868_v15 = vsel %vm843_vm12, %v861_v39, %v867_v2  ;;  %v829_v19 = vsel %vm816_vm4, %v826_v43, %v828_v4  ;;  %vm4964_vm6 = vmand %vm556_vm2, %vm568_vm3 }
  0x48   : > { %v3652_v16 = vsel %vm3619_vm9, %v615_v11, 0  ;;  %v805_v20 = vsel %vm792_vm5, %v802_v44, %v804_v7  ;;  %v871_v21 = vrot.slane %v4894_v36, 4  ;;  %v4961_v22 = vsel %vm751_vm0, %v4930_v62, %v763_v9 }
  0x49   : > { %vm557_vm7 = vcmp.ge.s32.totalorder %v545_v12, 0  ;;  %v4971_v32 = vsel %vm3668_vm11, %v514_v3, %v3652_v16  ;;  %vm569_vm8 = vcmp.lt.s32.totalorder %v545_v12, 200  ;;  %v875_v34 = vrot.slane %v829_v19, 4 }
  0x4a   : > { %1068 = vmatmul.f32.gmra.mxu2 %v864_v56  ;;  %v873_v36 = vrot.slane %v805_v20, 4  ;;  %vm581_vm10 = vmand %vm557_vm7, %vm569_vm8  ;;  %v533_v37 = vadd.s32 88, %v4561_v18  ;;  %v830_v38 = vrot.slane %v4961_v22, 2  ;;  %v806_v39 = vrot.slane %v4961_v22, 1 }
  0x4b   : > { %968 = vmatmul.f32.gmra.mxu0 %v860_v51  ;;  %v616_v42 = vsel %vm4964_vm6, %v515_v23, 0.0  ;;  %v617_v43 = vsel %vm581_vm10, %v516_v31, 0.0  ;;  %v872_v44 = vsel %vm843_vm12, %v865_v47, %v871_v21  ;;  %v764_v50 = vmul.f32 0.1, %v4971_v32 }
  0x4c   : > { %1018 = vmatmul.f32.gmra.mxu1 %v862_v57  ;;  %v3660_v51 = vsel %vm3619_vm9, %v617_v43, 0  ;;  %v546_v52 = vadd.s32 %v4640_v35, %v533_v37  ;;  %vm752_vm13 = vcmp.ge.f32.partialorder %v4971_v32, 0.0  ;;  %v876_v56 = vsel %vm843_vm12, %v869_v1, %v875_v34  ;;  %v742_v1 = vld [vmem:[%s6589_s5 + $0x178] sm:$0xff] }
  0x4d   : > { %v874_v57 = vsel %vm843_vm12, %v867_v2, %v873_v36  ;;  %v3656_v28 = vsel %vm3619_vm9, %v616_v42, 0  ;;  %v4993_v41 = vsel %vm3668_vm11, %v516_v31, %v3660_v51  ;;  %v831_v58 = vsel %vm816_vm4, %v828_v4, %v830_v38  ;;  %v725_v2 = vld [vmem:[%s6589_s5 + $0xf0] sm:$0xff]  ;;  %1426 = vmatpush.msrb.mxu1 %v742_v1  ;;  %v724_v31 = vld [vmem:[%s6589_s5 + $0xe8] sm:$0xff] }
  0x4e   : > { %v807_v59 = vsel %vm792_vm5, %v804_v7, %v806_v39  ;;  %vm558_vm14 = vcmp.ge.s32.totalorder %v546_v52, 0  ;;  %v877_v35 = vrot.slane %v4924_v60, 4  ;;  %v4999_v47 = vsel %vm752_vm13, %v4971_v32, %v764_v50  ;;  %v741_v60 = vld [vmem:[%s6589_s5 + $0x170] sm:$0xff]  ;;  %1377 = vmatpush.msrb.mxu0 %v725_v2 }
  0x4f   : > { %v5004_v63 = vsel %vm3668_vm11, %v515_v23, %v3656_v28  ;;  %vm570_vm15 = vcmp.lt.s32.totalorder %v546_v52, 200  ;;  %v881_v3 = vrot.slane %v831_v58, 4  ;;  %v879_v4 = vrot.slane %v807_v59, 4  ;;  %1427 = vmatpush.msrb.mxu1 %v741_v60  ;;  %v722_v28 = vld [vmem:[%s6589_s5 + $0xd8] sm:$0xff]  ;;  %v721_v1 = vld [vmem:[%s6589_s5 + $0xd0] sm:$0xff] }
  0x50   : > { %vm582_vm0 = vmand %vm558_vm14, %vm570_vm15  ;;  %v832_v7 = vrot.slane %v4999_v47, 2  ;;  %v878_v11 = vsel %vm843_vm12, %v871_v21, %v877_v35  ;;  %v765_v12 = vmul.f32 0.1, %v5004_v63  ;;  %vm753_vm1 = vcmp.ge.f32.partialorder %v5004_v63, 0.0  ;;  %1378 = vmatpush.msrb.mxu0 %v724_v31  ;;  %v737_v2 = vld [vmem:[%s6589_s5 + $0x150] sm:$0xff]  ;;  %v708_v31 = vld [vmem:[%s6589_s5 + $0x68] sm:$0xff] }
  0x51   : > { %v618_v9 = vsel %vm582_vm0, %v517_v61, 0.0  ;;  %v882_v16 = vsel %vm843_vm12, %v875_v34, %v881_v3  ;;  %v880_v19 = vsel %vm843_vm12, %v873_v36, %v879_v4  ;;  %v883_v23 = vrot.slane %v4961_v22, 4  ;;  %1428 = vmatpush.msrb.mxu1 %v740_v33  ;;  %v718_v33 = vld [vmem:[%s6589_s5 + $0xb8] sm:$0xff] }
  0x52   : > { %1071 = vmatmul.f32.gmra.mxu2 %v870_v14  ;;  %v3664_v14 = vsel %vm3619_vm9, %v618_v9, 0  ;;  %v833_v20 = vsel %vm816_vm4, %v830_v38, %v832_v7  ;;  %v5033_v24 = vsel %vm753_vm1, %v5004_v63, %v765_v12  ;;  %vm754_vm2 = vcmp.ge.f32.partialorder %v4993_v41, 0.0  ;;  %v709_v9 = vld [vmem:[%s6589_s5 + $0x70] sm:$0xff] }
  0x53   : > { %971 = vmatmul.f32.gmra.mxu0 %v866_v48  ;;  %v808_v48 = vrot.slane %v4999_v47, 1  ;;  %v887_v34 = vrot.slane %v833_v20, 4  ;;  %v834_v37 = vrot.slane %v5033_v24, 2  ;;  %v810_v22 = vrot.slane %v5033_v24, 1  ;;  %v735_v20 = vld [vmem:[%s6589_s5 + $0x140] sm:$0xff] }
  0x54   : > { %1021 = vmatmul.f32.gmra.mxu1 %v868_v15  ;;  %v5025_v15 = vsel %vm3668_vm11, %v517_v61, %v3664_v14  ;;  %v884_v38 = vsel %vm843_vm12, %v877_v35, %v883_v23  ;;  %v889_v51 = vrot.slane %v4999_v47, 4  ;;  %v738_v35 = vld [vmem:[%s6589_s5 + $0x158] sm:$0xff] }
  0x55   : > { %v809_v21 = vsel %vm792_vm5, %v806_v39, %v808_v48  ;;  %v766_v39 = vmul.f32 0.1, %v4993_v41  ;;  %v888_v42 = vsel %vm843_vm12, %v881_v3, %v887_v34  ;;  %v5052_v50 = vsel %vm792_vm5, %v808_v48, %v810_v22  ;;  %v736_v48 = vld [vmem:[%s6589_s5 + $0x148] sm:$0xff] }
  0x56   : > { %v885_v36 = vrot.slane %v809_v21, 4  ;;  %v891_v59 = vrot.slane %v5052_v50, 4  ;;  %v890_v60 = vsel %vm843_vm12, %v883_v23, %v889_v51  ;;  %v767_v3 = vmul.f32 0.1, %v5025_v15  ;;  %v716_v50 = vld [vmem:[%s6589_s5 + $0xa8] sm:$0xff] }
  0x57   : > { %v5056_v52 = vsel %vm754_vm2, %v4993_v41, %v766_v39  ;;  %vm755_vm3 = vcmp.ge.f32.partialorder %v5025_v15, 0.0  ;;  %v895_v21 = vrot.slane %v5033_v24, 4  ;;  %v734_v24 = vld [vmem:[%s6589_s5 + $0x138] sm:$0xff]  ;;  %v717_v39 = vld [vmem:[%s6589_s5 + $0xb0] sm:$0xff] }
  0x58   : > { %v886_v43 = vsel %vm843_vm12, %v879_v4, %v885_v36  ;;  %v836_v47 = vrot.slane %v5056_v52, 2  ;;  %v812_v61 = vrot.slane %v5056_v52, 1  ;;  %v710_v4 = vld [vmem:[%s6589_s5 + $0x78] sm:$0xff]  ;;  %v892_v12 = vsel %vm843_vm12, %v885_v36, %v891_v59 }
  0x59   : > { %1326 = vmatpush.msra.mxu3 %v710_v4  ;;  %v5109_v23 = vsel %vm755_vm3, %v5025_v15, %v767_v3  ;;  %v702_v4 = vld [vmem:[%s6589_s5 + $0x38] sm:$0xff] }
  0x5a   : > { %1074 = vmatmul.f32.gmra.mxu2 %v876_v56  ;;  %v723_v56 = vld [vmem:[%s6589_s5 + $0xe0] sm:$0xff]  ;;  %v837_v14 = vsel %vm816_vm4, %v834_v37, %v836_v47 }
  0x5b   : > { %974 = vmatmul.f32.gmra.mxu0 %v872_v44  ;;  %v5049_v44 = vsel %vm816_vm4, %v832_v7, %v834_v37  ;;  %v720_v7 = vld [vmem:[%s6589_s5 + $0xc8] sm:$0xff]  ;;  %1327 = vmatpush.msra.mxu3 %v709_v9  ;;  %v707_v37 = vld [vmem:[%s6589_s5 + $0x60] sm:$0xff]  ;;  %v907_v9 = vrot.slane %v5109_v23, 4 }
  0x5c   : > { %1024 = vmatmul.f32.gmra.mxu1 %v874_v57  ;;  %v739_v57 = vld [vmem:[%s6589_s5 + $0x160] sm:$0xff]  ;;  %v893_v58 = vrot.slane %v5049_v44, 4  ;;  %1379 = vmatpush.msrb.mxu0 %v723_v56  ;;  %v706_v44 = vld [vmem:[%s6589_s5 + $0x58] sm:$0xff]  ;;  %v732_v56 = vld [vmem:[%s6589_s5 + $0x128] sm:$0xff] }
  0x5d   : > { %1429 = vmatpush.msrb.mxu1 %v739_v57  ;;  %1328 = vmatpush.msra.mxu3 %v708_v31  ;;  %v699_v31 = vld [vmem:[%s6589_s5 + $0x20] sm:$0xff] }
  0x5e   : > { %1380 = vmatpush.msrb.mxu0 %v722_v28 }
  0x5f   : > { %1430 = vmatpush.msrb.mxu1 %v738_v35  ;;  %1329 = vmatpush.msra.mxu3 %v707_v37  ;;  %v696_v37 = vld [vmem:[%s6589_s5 + $0x8] sm:$0xff] }
  0x60   : > { %1381 = vmatpush.msrb.mxu0 %v721_v1  ;;  %v705_v1 = vld [vmem:[%s6589_s5 + $0x50] sm:$0xff] }
  0x61   : > { %1431 = vmatpush.msrb.mxu1 %v737_v2  ;;  %1330 = vmatpush.msra.mxu3 %v706_v44  ;;  %v715_v2 = vld [vmem:[%s6589_s5 + $0xa0] sm:$0xff] }
  0x62   : > { %1077 = vmatmul.f32.gmra.mxu2 %v882_v16  ;;  %v813_v16 = vsel %vm792_vm5, %v810_v22, %v812_v61  ;;  %1382 = vmatpush.msrb.mxu0 %v720_v7  ;;  %v838_v22 = vrot.slane %v5109_v23, 2  ;;  %v727_v44 = vld [vmem:[%s6589_s5 + $0x100] sm:$0xff] }
  0x63   : > { %977 = vmatmul.f32.gmra.mxu0 %v878_v11  ;;  %v894_v11 = vsel %vm843_vm12, %v887_v34, %v893_v58  ;;  %1432 = vmatpush.msrb.mxu1 %v736_v48  ;;  %v899_v34 = vrot.slane %v837_v14, 4  ;;  %v897_v36 = vrot.slane %v813_v16, 4 }
  0x64   : > { %1027 = vmatmul.f32.gmra.mxu1 %v880_v19  ;;  %v719_v19 = vld [vmem:[%s6589_s5 + $0xc0] sm:$0xff]  ;;  %1331 = vmatpush.msra.mxu3 %v705_v1 }
  0x65   : > { %1383 = vmatpush.msrb.mxu0 %v719_v19  ;;  %1433 = vmatpush.msrb.mxu1 %v735_v20  ;;  %v900_v57 = vsel %vm843_vm12, %v893_v58, %v899_v34  ;;  %v898_v28 = vsel %vm843_vm12, %v891_v59, %v897_v36  ;;  %v901_v58 = vrot.slane %v5056_v52, 4  ;;  %v731_v59 = vld [vmem:[%s6589_s5 + $0x120] sm:$0xff]  ;;  %v701_v20 = vld [vmem:[%s6589_s5 + $0x30] sm:$0xff] }
  0x66   : > { %v703_v52 = vld [vmem:[%s6589_s5 + $0x40] sm:$0xff] }
  0x67   : > { %1384 = vmatpush.msrb.mxu0 %v718_v33  ;;  %1434 = vmatpush.msrb.mxu1 %v734_v24  ;;  %v902_v3 = vsel %vm843_vm12, %v895_v21, %v901_v58  ;;  %v908_v14 = vsel %vm843_vm12, %v901_v58, %v907_v9  ;;  %v698_v33 = vld [vmem:[%s6589_s5 + $0x18] sm:$0xff] }
  0x68   : > { %v730_v24 = vld [vmem:[%s6589_s5 + $0x118] sm:$0xff] }
  0x69   : > { %1385 = vmatpush.msrb.mxu0 %v717_v39  ;;  %v712_v39 = vld [vmem:[%s6589_s5 + $0x88] sm:$0xff] }
  0x6a   : > { %1080 = vmatmul.f32.gmra.mxu2 %v888_v42  ;;  %v733_v42 = vld [vmem:[%s6589_s5 + $0x130] sm:$0xff] }
  0x6b   : > { %980 = vmatmul.f32.gmra.mxu0 %v884_v38  ;;  %v814_v38 = vrot.slane %v5109_v23, 1  ;;  %1435 = vmatpush.msrb.mxu1 %v733_v42  ;;  %v714_v23 = vld [vmem:[%s6589_s5 + $0x98] sm:$0xff]  ;;  %v728_v42 = vld [vmem:[%s6589_s5 + $0x108] sm:$0xff] }
  0x6c   : > { %1030 = vmatmul.f32.gmra.mxu1 %v886_v43  ;;  %v896_v43 = vsel %vm843_vm12, %v889_v51, %v895_v21  ;;  %v839_v51 = vsel %vm816_vm4, %v836_v47, %v838_v22  ;;  %1386 = vmatpush.msrb.mxu0 %v716_v50  ;;  %v704_v47 = vld [vmem:[%s6589_s5 + $0x48] sm:$0xff]  ;;  %v5219_v50 = vld [vmem:[%s6588_s4] ss:$0 sm:$0xff] }
  0x6d   : > { %v815_v35 = vsel %vm792_vm5, %v812_v61, %v814_v38  ;;  %1436 = vmatpush.msrb.mxu1 %v732_v56  ;;  %v905_v61 = vrot.slane %v839_v51, 4  ;;  %1332 = vmatpush.msra.mxu3 %v704_v47  ;;  %v700_v21 = vld [vmem:[%s6589_s5 + $0x28] sm:$0xff] }
  0x6e   : > { %1387 = vmatpush.msrb.mxu0 %v715_v2 }
  0x6f   : > { %1437 = vmatpush.msrb.mxu1 %v731_v59  ;;  %v906_v7 = vsel %vm843_vm12, %v899_v34, %v905_v61  ;;  %1333 = vmatpush.msra.mxu3 %v703_v52  ;;  %v697_v34 = vld [vmem:[%s6589_s5 + $0x10] sm:$0xff] }
  0x70   : > { %1388 = vmatpush.msrb.mxu0 %v714_v23 }
  0x71   : > { %1334 = vmatpush.msra.mxu3 %v702_v4  ;;  %1438 = vmatpush.msrb.mxu1 %v730_v24 }
  0x72   : > { %1083 = vmatmul.f32.gmra.mxu2 %v894_v11  ;;  %v911_v11 = vrot.slane %v838_v22, 4  ;;  %v729_v22 = vld [vmem:[%s6589_s5 + $0x110] sm:$0xff] }
  0x73   : > { %983 = vmatmul.f32.gmra.mxu0 %v890_v60  ;;  %v903_v60 = vrot.slane %v815_v35, 4  ;;  %1335 = vmatpush.msra.mxu3 %v701_v20 }
  0x74   : > { %1033 = vmatmul.f32.gmra.mxu1 %v892_v12  ;;  %v909_v12 = vrot.slane %v814_v38, 4  ;;  %v912_v16 = vsel %vm843_vm12, %v905_v61, %v911_v11  ;;  %v695_v38 = vld [vmem:[%s6589_s5] sm:$0xff] }
  0x75   : > { %v904_v48 = vsel %vm843_vm12, %v897_v36, %v903_v60  ;;  %1336 = vmatpush.msra.mxu3 %v700_v21  ;;  %v713_v36 = vld [vmem:[%s6589_s5 + $0x90] sm:$0xff]  ;;  %1439 = vmatpush.msrb.mxu1 %v729_v22 }
  0x76   : > { %v910_v19 = vsel %vm843_vm12, %v903_v60, %v909_v12  ;;  %1389 = vmatpush.msrb.mxu0 %v713_v36 }
  0x77   : > { %1337 = vmatpush.msra.mxu3 %v699_v31  ;;  %1440 = vmatpush.msrb.mxu1 %v728_v42 }
  0x78   : > { %1390 = vmatpush.msrb.mxu0 %v712_v39 }
  0x79   : > { %1338 = vmatpush.msra.mxu3 %v698_v33  ;;  %1441 = vmatpush.msrb.mxu1 %v727_v44 }
  0x7a   : > { %1086 = vmatmul.f32.gmra.mxu2 %v900_v57 }
  0x7b   : > { %986 = vmatmul.f32.gmra.mxu0 %v896_v43  ;;  %1339 = vmatpush.msra.mxu3 %v697_v34  ;;  %v711_v43 = vld [vmem:[%s6589_s5 + $0x80] sm:$0xff] }
  0x7c   : > { %1036 = vmatmul.f32.gmra.mxu1 %v898_v28  ;;  %1391 = vmatpush.msrb.mxu0 %v711_v43  ;;  %v5223_v28 = vstv %s1129_s19  ;;  %s6511_s19 = scalar_lea.sflag [#allocation3], %s422_s11 }
  0x7d   : > { %1340 = vmatpush.msra.mxu3 %v696_v37  ;;  %v1146_v35 = vadd.s32 %v5223_v28, %v4561_v18  ;;  %v1147_v52 = vadd.s32 %v5223_v28, %v4593_v25  ;;  %v1148_v21 = vadd.s32 %v5223_v28, %v4596_v26 }
  0x7f   : > { %1341 = vmatpush.msra.mxu3 %v695_v38  ;;  %vm1157_vm6 = vcmp.ge.s32.totalorder %v1146_v35, 0  ;;  %vm1168_vm7 = vcmp.lt.s32.totalorder %v1146_v35, 200  ;;  %vm1158_vm13 = vcmp.ge.s32.totalorder %v1147_v52, 0  ;;  %vm1169_vm14 = vcmp.lt.s32.totalorder %v1147_v52, 200 }
  0x80   : > { %vm1179_vm10 = vmand %vm1157_vm6, %vm1168_vm7  ;;  %vm1159_vm1 = vcmp.ge.s32.totalorder %v1148_v21, 0  ;;  %vm1170_vm2 = vcmp.lt.s32.totalorder %v1148_v21, 200 }
  0x81   : > { %vm1180_vm0 = vmand %vm1158_vm13, %vm1169_vm14 }
  0x82   : > { %1089 = vmatmul.f32.gmra.mxu2 %v906_v7  ;;  %vm1181_vm3 = vmand %vm1159_vm1, %vm1170_vm2 }
  0x83   : > { %989 = vmatmul.f32.gmra.mxu0 %v902_v3 }
  0x84   : > { %1039 = vmatmul.f32.gmra.mxu1 %v904_v48 }
  0x8a   : > { %1092 = vmatmul.f32.gmra.mxu2 %v912_v16 }
  0x8b   : > { %992 = vmatmul.f32.gmra.mxu0 %v908_v14 }
  0x8c   : > { %1042 = vmatmul.f32.gmra.mxu1 %v910_v19 }
  0xb8   : > { %v963_v56 = vpop.f32.mrf.mxu0 }
  0xb9   : > { %v964_v57 = vadd.f32 %v5219_v50, %v963_v56  ;;  %v1013_v51 = vpop.f32.mrf.mxu1 }
  0xbb   : > { %v1014_v1 = vadd.f32 %v1013_v51, %v964_v57 }
  0xbd   : > { %v1063_v2 = vpop.f32.mrf.mxu2 }
  0xbe   : > { %v1064_v59 = vadd.f32 %v1063_v2, %v1014_v1  ;;  %v1149_v1 = vadd.s32 %v5223_v28, %v4599_v27 }
  0xc0   : > { %v966_v58 = vpop.f32.mrf.mxu0  ;;  %v1107_v60 = vmul.f32 0.1, %v1064_v59  ;;  %vm1096_vm8 = vcmp.ge.f32.partialorder %v1064_v59, 0.0  ;;  %vm1160_vm7 = vcmp.ge.s32.totalorder %v1149_v1, 0 }
  0xc1   : > { %v967_v47 = vadd.f32 %v5219_v50, %v966_v58  ;;  %v1016_v61 = vpop.f32.mrf.mxu1 }
  0xc2   : > { %v1118_v4 = vsel %vm1096_vm8, %v1064_v59, %v1107_v60  ;;  %vm1171_vm8 = vcmp.lt.s32.totalorder %v1149_v1, 200 }
  0xc3   : > { %v1017_v3 = vadd.f32 %v1016_v61, %v967_v47  ;;  %v1212_v7 = vsel %vm1179_vm10, %v1118_v4, 0.0  ;;  %vm1182_vm10 = vmand %vm1160_vm7, %vm1171_vm8 }
  0xc4   : > { %v3717_v48 = vsel %vm3619_vm9, %v1212_v7, 0 }
  0xc5   : > { %v1066_v9 = vpop.f32.mrf.mxu2  ;;  %v3762_v11 = vsel %vm3668_vm11, %v1118_v4, %v3717_v48 }
  0xc6   : > { %v1067_v14 = vadd.f32 %v1066_v9, %v1017_v3  ;;  %1342 = vmatmul.f32.vlgmr.msra.gmra.mxu3 %v3762_v11  ;;  %v1259_v34 = vrot.slane %v3762_v11, 1  ;;  %v1291_v36 = vrot.slane %v3762_v11, 2 }
  0xc8   : > { %v969_v12 = vpop.f32.mrf.mxu0  ;;  %v1108_v20 = vmul.f32 0.1, %v1067_v14  ;;  %vm1097_vm15 = vcmp.ge.f32.partialorder %v1067_v14, 0.0 }
  0xc9   : > { %v970_v16 = vadd.f32 %v5219_v50, %v969_v12  ;;  %v1019_v19 = vpop.f32.mrf.mxu1 }
  0xca   : > { %v1119_v31 = vsel %vm1097_vm15, %v1067_v14, %v1108_v20 }
  0xcb   : > { %v1020_v23 = vadd.f32 %v1019_v19, %v970_v16  ;;  %v1213_v33 = vsel %vm1180_vm0, %v1119_v31, 0.0  ;;  %v1150_v16 = vadd.s32 %v5223_v28, %v4618_v29 }
  0xcc   : > { %v3721_v24 = vsel %vm3619_vm9, %v1213_v33, 0 }
  0xcd   : > { %v1069_v37 = vpop.f32.mrf.mxu2  ;;  %v3766_v22 = vsel %vm3668_vm11, %v1119_v31, %v3721_v24  ;;  %vm1161_vm14 = vcmp.ge.s32.totalorder %v1150_v16, 0  ;;  %vm1172_vm15 = vcmp.lt.s32.totalorder %v1150_v16, 200 }
  0xce   : > { %v1070_v39 = vadd.f32 %v1069_v37, %v1020_v23  ;;  %v1260_v42 = vrot.slane %v3766_v22, 1  ;;  %v1292_v43 = vrot.slane %v3766_v22, 2  ;;  %1345 = vmatmul.f32.gmra.mxu3 %v3766_v22  ;;  %vm1183_vm0 = vmand %vm1161_vm14, %vm1172_vm15 }
  0xd0   : > { %v972_v38 = vpop.f32.mrf.mxu0  ;;  %v1109_v57 = vmul.f32 0.1, %v1070_v39  ;;  %v1261_v51 = vsel %vm792_vm5, %v1259_v34, %v1260_v42  ;;  %v1293_v35 = vsel %vm816_vm4, %v1291_v36, %v1292_v43  ;;  %vm1098_vm6 = vcmp.ge.f32.partialorder %v1070_v39, 0.0 }
  0xd1   : > { %v973_v44 = vadd.f32 %v5219_v50, %v972_v38  ;;  %v1022_v56 = vpop.f32.mrf.mxu1  ;;  %1392 = vmatmul.f32.vlgmr.msrb.gmra.mxu0 %v1261_v51  ;;  %1442 = vmatmul.f32.vlgmr.msrb.gmra.mxu1 %v1293_v35 }
  0xd2   : > { %v1120_v58 = vsel %vm1098_vm6, %v1070_v39, %v1109_v57 }
  0xd3   : > { %v1023_v2 = vadd.f32 %v1022_v56, %v973_v44  ;;  %v1214_v59 = vsel %vm1181_vm3, %v1120_v58, 0.0  ;;  %v1151_v44 = vadd.s32 %v5223_v28, %v4621_v30  ;;  %v3387_v56 = vld [vmem:[%s6587_s3 + $0x1f8] sm:$0xff] }
  0xd4   : > { %v3725_v47 = vsel %vm3619_vm9, %v1214_v59, 0  ;;  %1865 = vmatpush.msrb.mxu2 %v3387_v56 }
  0xd5   : > { %v1072_v61 = vpop.f32.mrf.mxu2  ;;  %v3770_v60 = vsel %vm3668_vm11, %v1120_v58, %v3725_v47  ;;  %vm1162_vm2 = vcmp.ge.s32.totalorder %v1151_v44, 0  ;;  %vm1173_vm3 = vcmp.lt.s32.totalorder %v1151_v44, 200 }
  0xd6   : > { %v1073_v3 = vadd.f32 %v1072_v61, %v1023_v2  ;;  %v1262_v4 = vrot.slane %v3770_v60, 1  ;;  %v1294_v7 = vrot.slane %v3770_v60, 2  ;;  %1348 = vmatmul.f32.gmra.mxu3 %v3770_v60  ;;  %vm1184_vm6 = vmand %vm1162_vm2, %vm1173_vm3 }
  0xd8   : > { %v975_v52 = vpop.f32.mrf.mxu0  ;;  %v1110_v11 = vmul.f32 0.1, %v1073_v3  ;;  %v1263_v12 = vsel %vm792_vm5, %v1260_v42, %v1262_v4  ;;  %v1295_v14 = vsel %vm816_vm4, %v1292_v43, %v1294_v7  ;;  %vm1099_vm13 = vcmp.ge.f32.partialorder %v1073_v3, 0.0 }
  0xd9   : > { %v976_v48 = vadd.f32 %v5219_v50, %v975_v52  ;;  %v1025_v9 = vpop.f32.mrf.mxu1  ;;  %1395 = vmatmul.f32.gmra.mxu0 %v1263_v12  ;;  %1445 = vmatmul.f32.gmra.mxu1 %v1295_v14 }
  0xda   : > { %v1121_v20 = vsel %vm1099_vm13, %v1073_v3, %v1110_v11  ;;  %v3386_v11 = vld [vmem:[%s6587_s3 + $0x1f0] sm:$0xff] }
  0xdb   : > { %v1026_v19 = vadd.f32 %v1025_v9, %v976_v48  ;;  %v1215_v21 = vsel %vm1182_vm10, %v1121_v20, 0.0  ;;  %v1152_v9 = vadd.s32 %v5223_v28, %v4682_v49  ;;  %1866 = vmatpush.msrb.mxu2 %v3386_v11 }
  0xdc   : > { %v3729_v23 = vsel %vm3619_vm9, %v1215_v21, 0 }
  0xdd   : > { %v1075_v31 = vpop.f32.mrf.mxu2  ;;  %v3774_v33 = vsel %vm3668_vm11, %v1121_v20, %v3729_v23  ;;  %vm1163_vm8 = vcmp.ge.s32.totalorder %v1152_v9, 0  ;;  %vm1174_vm10 = vcmp.lt.s32.totalorder %v1152_v9, 200  ;;  %v3382_v9 = vld [vmem:[%s6587_s3 + $0x1d0] sm:$0xff] }
  0xde   : > { %v1076_v34 = vadd.f32 %v1075_v31, %v1026_v19  ;;  %v1264_v36 = vrot.slane %v3774_v33, 1  ;;  %v1296_v37 = vrot.slane %v3774_v33, 2  ;;  %1351 = vmatmul.f32.gmra.mxu3 %v3774_v33  ;;  %vm1185_vm13 = vmand %vm1163_vm8, %vm1174_vm10 }
  0xe0   : > { %v978_v24 = vpop.f32.mrf.mxu0  ;;  %v1111_v39 = vmul.f32 0.1, %v1076_v34  ;;  %v1265_v42 = vsel %vm792_vm5, %v1262_v4, %v1264_v36  ;;  %v1297_v43 = vsel %vm816_vm4, %v1294_v7, %v1296_v37  ;;  %vm1100_vm1 = vcmp.ge.f32.partialorder %v1076_v34, 0.0 }
  0xe1   : > { %v979_v22 = vadd.f32 %v5219_v50, %v978_v24  ;;  %v1028_v38 = vpop.f32.mrf.mxu1  ;;  %1398 = vmatmul.f32.gmra.mxu0 %v1265_v42  ;;  %1448 = vmatmul.f32.gmra.mxu1 %v1297_v43  ;;  %v1153_v42 = vadd.s32 %v5223_v28, %v4867_v8  ;;  %v3384_v43 = vld [vmem:[%s6587_s3 + $0x1e0] sm:$0xff] }
  0xe2   : > { %v1122_v51 = vsel %vm1100_vm1, %v1076_v34, %v1111_v39  ;;  %v3385_v39 = vld [vmem:[%s6587_s3 + $0x1e8] sm:$0xff] }
  0xe3   : > { %v1029_v57 = vadd.f32 %v1028_v38, %v979_v22  ;;  %v1216_v35 = vsel %vm1183_vm0, %v1122_v51, 0.0  ;;  %1867 = vmatpush.msrb.mxu2 %v3385_v39  ;;  %vm1164_vm15 = vcmp.ge.s32.totalorder %v1153_v42, 0  ;;  %vm1175_vm0 = vcmp.lt.s32.totalorder %v1153_v42, 200  ;;  %v3381_v39 = vld [vmem:[%s6587_s3 + $0x1c8] sm:$0xff]  ;;  %v3380_v42 = vld [vmem:[%s6587_s3 + $0x1c0] sm:$0xff] }
  0xe4   : > { %v3733_v1 = vsel %vm3619_vm9, %v1216_v35, 0  ;;  %vm1186_vm1 = vmand %vm1164_vm15, %vm1175_vm0 }
  0xe5   : > { %v1078_v2 = vpop.f32.mrf.mxu2  ;;  %v3778_v58 = vsel %vm3668_vm11, %v1122_v51, %v3733_v1  ;;  %1868 = vmatpush.msrb.mxu2 %v3384_v43 }
  0xe6   : > { %v1079_v47 = vadd.f32 %v1078_v2, %v1029_v57  ;;  %v1266_v61 = vrot.slane %v3778_v58, 1  ;;  %v1298_v60 = vrot.slane %v3778_v58, 2  ;;  %1354 = vmatmul.f32.gmra.mxu3 %v3778_v58 }
  0xe8   : > { %v981_v59 = vpop.f32.mrf.mxu0  ;;  %v1112_v4 = vmul.f32 0.1, %v1079_v47  ;;  %v1267_v7 = vsel %vm792_vm5, %v1264_v36, %v1266_v61  ;;  %v1299_v48 = vsel %vm816_vm4, %v1296_v37, %v1298_v60  ;;  %vm1101_vm7 = vcmp.ge.f32.partialorder %v1079_v47, 0.0 }
  0xe9   : > { %v982_v52 = vadd.f32 %v5219_v50, %v981_v59  ;;  %v1031_v3 = vpop.f32.mrf.mxu1  ;;  %1401 = vmatmul.f32.gmra.mxu0 %v1267_v7  ;;  %1451 = vmatmul.f32.gmra.mxu1 %v1299_v48  ;;  %v1154_v7 = vadd.s32 %v5223_v28, %v4911_v53  ;;  %v3383_v48 = vld [vmem:[%s6587_s3 + $0x1d8] sm:$0xff] }
  0xea   : > { %v1123_v14 = vsel %vm1101_vm7, %v1079_v47, %v1112_v4  ;;  %1869 = vmatpush.msrb.mxu2 %v3383_v48 }
  0xeb   : > { %v1032_v12 = vadd.f32 %v1031_v3, %v982_v52  ;;  %v1217_v16 = vsel %vm1184_vm6, %v1123_v14, 0.0  ;;  %vm1165_vm3 = vcmp.ge.s32.totalorder %v1154_v7, 0  ;;  %vm1176_vm6 = vcmp.lt.s32.totalorder %v1154_v7, 200 }
  0xec   : > { %v3737_v19 = vsel %vm3619_vm9, %v1217_v16, 0  ;;  %1870 = vmatpush.msrb.mxu2 %v3382_v9  ;;  %vm1187_vm7 = vmand %vm1165_vm3, %vm1176_vm6  ;;  %vm1488_vm6 = vcmask 1041408  }
  0xed   : > { %v1081_v20 = vpop.f32.mrf.mxu2  ;;  %v3782_v21 = vsel %vm3668_vm11, %v1123_v14, %v3737_v19 }
  0xee   : > { %v1082_v31 = vadd.f32 %v1081_v20, %v1032_v12  ;;  %v1268_v33 = vrot.slane %v3782_v21, 1  ;;  %v1300_v24 = vrot.slane %v3782_v21, 2  ;;  %1357 = vmatmul.f32.gmra.mxu3 %v3782_v21  ;;  %1871 = vmatpush.msrb.mxu2 %v3381_v39 }
  0xf0   : > { %v984_v23 = vpop.f32.mrf.mxu0  ;;  %v1113_v37 = vmul.f32 0.1, %v1082_v31  ;;  %v1269_v22 = vsel %vm792_vm5, %v1266_v61, %v1268_v33  ;;  %v1301_v38 = vsel %vm816_vm4, %v1298_v60, %v1300_v24  ;;  %vm1102_vm14 = vcmp.ge.f32.partialorder %v1082_v31, 0.0  ;;  %1872 = vmatpush.msrb.mxu2 %v3380_v42 }
  0xf1   : > { %v985_v34 = vadd.f32 %v5219_v50, %v984_v23  ;;  %v1034_v36 = vpop.f32.mrf.mxu1  ;;  %1404 = vmatmul.f32.gmra.mxu0 %v1269_v22  ;;  %1454 = vmatmul.f32.gmra.mxu1 %v1301_v38  ;;  %v1155_v38 = vadd.s32 %v5223_v28, %v4914_v54 }
  0xf2   : > { %v1124_v56 = vsel %vm1102_vm14, %v1082_v31, %v1113_v37 }
  0xf3   : > { %v1035_v44 = vadd.f32 %v1034_v36, %v985_v34  ;;  %v1218_v57 = vsel %vm1185_vm13, %v1124_v56, 0.0  ;;  %vm1166_vm10 = vcmp.ge.s32.totalorder %v1155_v38, 0  ;;  %vm1177_vm13 = vcmp.lt.s32.totalorder %v1155_v38, 200 }
  0xf4   : > { %v3741_v51 = vsel %vm3619_vm9, %v1218_v57, 0  ;;  %v3379_v57 = vld [vmem:[%s6587_s3 + $0x1b8] sm:$0xff]  ;;  %vm1188_vm14 = vmand %vm1166_vm10, %vm1177_vm13 }
  0xf5   : > { %v1084_v35 = vpop.f32.mrf.mxu2  ;;  %v3786_v1 = vsel %vm3668_vm11, %v1124_v56, %v3741_v51  ;;  %v3403_v51 = vld [vmem:[%s6587_s3 + $0x278] sm:$0xff]  ;;  %1873 = vmatpush.msrb.mxu2 %v3379_v57  ;;  %v3402_v57 = vld [vmem:[%s6587_s3 + $0x270] sm:$0xff] }
  0xf6   : > { %v1085_v58 = vadd.f32 %v1084_v35, %v1035_v44  ;;  %v1270_v59 = vrot.slane %v3786_v1, 1  ;;  %v1302_v47 = vrot.slane %v3786_v1, 2  ;;  %1360 = vmatmul.f32.gmra.mxu3 %v3786_v1 }
  0xf7   : > { %1912 = vmatpush.msrb.mxu3 %v3403_v51  ;;  %v3374_v51 = vld [vmem:[%s6587_s3 + $0x190] sm:$0xff] }
  0xf8   : > { %v987_v2 = vpop.f32.mrf.mxu0  ;;  %v1114_v52 = vmul.f32 0.1, %v1085_v58  ;;  %v1271_v3 = vsel %vm792_vm5, %v1268_v33, %v1270_v59  ;;  %v1303_v4 = vsel %vm816_vm4, %v1300_v24, %v1302_v47  ;;  %vm1103_vm2 = vcmp.ge.f32.partialorder %v1085_v58, 0.0 }
  0xf9   : > { %v988_v61 = vadd.f32 %v5219_v50, %v987_v2  ;;  %v1037_v60 = vpop.f32.mrf.mxu1  ;;  %1407 = vmatmul.f32.gmra.mxu0 %v1271_v3  ;;  %1457 = vmatmul.f32.gmra.mxu1 %v1303_v4  ;;  %v3377_v4 = vld [vmem:[%s6587_s3 + $0x1a8] sm:$0xff] }
  0xfa   : > { %v1125_v12 = vsel %vm1103_vm2, %v1085_v58, %v1114_v52  ;;  %1913 = vmatpush.msrb.mxu3 %v3402_v57 }
  0xfb   : > { %v1038_v11 = vadd.f32 %v1037_v60, %v988_v61  ;;  %v1219_v14 = vsel %vm1186_vm1, %v1125_v12, 0.0 }
  0xfc   : > { %v3745_v16 = vsel %vm3619_vm9, %v1219_v14, 0 }
  0xfd   : > { %v1087_v19 = vpop.f32.mrf.mxu2  ;;  %v3790_v20 = vsel %vm3668_vm11, %v1125_v12, %v3745_v16 }
  0xfe   : > { %v1088_v23 = vadd.f32 %v1087_v19, %v1038_v11  ;;  %v1272_v31 = vrot.slane %v3790_v20, 1  ;;  %v1304_v33 = vrot.slane %v3790_v20, 2  ;;  %1363 = vmatmul.f32.gmra.mxu3 %v3790_v20  ;;  %v1156_v11 = vadd.s32 %v5223_v28, %v4935_v0  ;;  %v3375_v19 = vld [vmem:[%s6587_s3 + $0x198] sm:$0xff] }
 0x100   : > { %v990_v21 = vpop.f32.mrf.mxu0  ;;  %v1115_v36 = vmul.f32 0.1, %v1088_v23  ;;  %v1273_v37 = vsel %vm792_vm5, %v1270_v59, %v1272_v31  ;;  %v1305_v22 = vsel %vm816_vm4, %v1302_v47, %v1304_v33  ;;  %vm1104_vm8 = vcmp.ge.f32.partialorder %v1088_v23, 0.0  ;;  %v3378_v59 = vld [vmem:[%s6587_s3 + $0x1b0] sm:$0xff] }
 0x101   : > { %v991_v24 = vadd.f32 %v5219_v50, %v990_v21  ;;  %v1040_v34 = vpop.f32.mrf.mxu1  ;;  %1410 = vmatmul.f32.gmra.mxu0 %v1273_v37  ;;  %1460 = vmatmul.f32.gmra.mxu1 %v1305_v22  ;;  %vm1167_vm0 = vcmp.ge.s32.totalorder %v1156_v11, 0  ;;  %vm1178_vm1 = vcmp.lt.s32.totalorder %v1156_v11, 200  ;;  %v3390_v11 = vld [vmem:[%s6587_s3 + $0x210] sm:$0xff] }
 0x102   : > { %v1126_v44 = vsel %vm1104_vm8, %v1088_v23, %v1115_v36  ;;  %1874 = vmatpush.msrb.mxu2 %v3378_v59  ;;  %vm1189_vm3 = vmand %vm1167_vm0, %vm1178_vm1  ;;  %v3397_v59 = vld [vmem:[%s6587_s3 + $0x248] sm:$0xff] }
 0x103   : > { %v1041_v43 = vadd.f32 %v1040_v34, %v991_v24  ;;  %v1220_v56 = vsel %vm1187_vm7, %v1126_v44, 0.0 }
 0x104   : > { %v3749_v35 = vsel %vm3619_vm9, %v1220_v56, 0  ;;  %1875 = vmatpush.msrb.mxu2 %v3377_v4  ;;  %v3393_v4 = vld [vmem:[%s6587_s3 + $0x228] sm:$0xff] }
 0x105   : > { %v1090_v1 = vpop.f32.mrf.mxu2  ;;  %v3794_v2 = vsel %vm3668_vm11, %v1126_v44, %v3749_v35  ;;  %v3401_v35 = vld [vmem:[%s6587_s3 + $0x268] sm:$0xff] }
 0x106   : > { %v1091_v47 = vadd.f32 %v1090_v1, %v1041_v43  ;;  %v1274_v61 = vrot.slane %v3794_v2, 1  ;;  %v1306_v60 = vrot.slane %v3794_v2, 2  ;;  %1366 = vmatmul.f32.gmra.mxu3 %v3794_v2  ;;  %v3400_v1 = vld [vmem:[%s6587_s3 + $0x260] sm:$0xff]  ;;  %v3399_v2 = vld [vmem:[%s6587_s3 + $0x258] sm:$0xff] }
 0x107   : > { %1914 = vmatpush.msrb.mxu3 %v3401_v35  ;;  %v3415_v35 = vld [vmem:[%s6587_s3 + $0x2d8] sm:$0xff] }
 0x108   : > { %v993_v58 = vpop.f32.mrf.mxu0  ;;  %v1116_v7 = vmul.f32 0.1, %v1091_v47  ;;  %v1275_v48 = vsel %vm792_vm5, %v1272_v31, %v1274_v61  ;;  %v1307_v9 = vsel %vm816_vm4, %v1304_v33, %v1306_v60  ;;  %vm1105_vm15 = vcmp.ge.f32.partialorder %v1091_v47, 0.0 }
 0x109   : > { %v994_v52 = vadd.f32 %v5219_v50, %v993_v58  ;;  %v1043_v3 = vpop.f32.mrf.mxu1  ;;  %1413 = vmatmul.f32.gmra.mxu0 %v1275_v48  ;;  %1463 = vmatmul.f32.gmra.mxu1 %v1307_v9  ;;  %v3376_v50 = vld [vmem:[%s6587_s3 + $0x1a0] sm:$0xff]  ;;  %v3398_v58 = vld [vmem:[%s6587_s3 + $0x250] sm:$0xff]  ;;  %v3419_v48 = vld [vmem:[%s6587_s3 + $0x2f8] sm:$0xff] }
 0x10a   : > { %v1127_v14 = vsel %vm1105_vm15, %v1091_v47, %v1116_v7  ;;  %1876 = vmatpush.msrb.mxu2 %v3376_v50  ;;  %1915 = vmatpush.msrb.mxu3 %v3400_v1  ;;  %v3396_v47 = vld [vmem:[%s6587_s3 + $0x240] sm:$0xff]  ;;  %v3391_v9 = vld [vmem:[%s6587_s3 + $0x218] sm:$0xff]  ;;  %v3389_v50 = vld [vmem:[%s6587_s3 + $0x208] sm:$0xff] }
 0x10b   : > { %v1044_v12 = vadd.f32 %v1043_v3, %v994_v52  ;;  %v1221_v16 = vsel %vm1188_vm14, %v1127_v14, 0.0  ;;  %v3394_v52 = vld [vmem:[%s6587_s3 + $0x230] sm:$0xff]  ;;  %v3372_v3 = vld [vmem:[%s6587_s3 + $0x180] sm:$0xff] }
 0x10c   : > { %v3753_v20 = vsel %vm3619_vm9, %v1221_v16, 0  ;;  %1877 = vmatpush.msrb.mxu2 %v3375_v19  ;;  %1916 = vmatpush.msrb.mxu3 %v3399_v2  ;;  %v3392_v7 = vld [vmem:[%s6587_s3 + $0x220] sm:$0xff]  ;;  %v3417_v16 = vld [vmem:[%s6587_s3 + $0x2e8] sm:$0xff]  ;;  %v5428_v19 = vstv %s1534_s23  ;;  %v3414_v1 = vld [vmem:[%s6587_s3 + $0x2d0] sm:$0xff]  ;;  %s3215_s23 = ssub.s32 (%p4469_p3), 25, %s4509_s22 }
 0x10d   : > { %v1093_v21 = vpop.f32.mrf.mxu2  ;;  %v3798_v28 = vsel %vm3668_vm11, %v1127_v14, %v3753_v20  ;;  %v3418_v14 = vld [vmem:[%s6587_s3 + $0x2f0] sm:$0xff]  ;;  %v5433_v20 = vld [vmem:[%s6590_s6] ss:$0 sm:$0xff]  ;;  %p3216_p9 = scmp.lt.s32.totalorder (%p4469_p3), %s3215_s23, 8 }
 0x10e   : > { %v1094_v23 = vadd.f32 %v1093_v21, %v1044_v12  ;;  %v1276_v31 = vrot.slane %v3798_v28, 1  ;;  %v1308_v33 = vrot.slane %v3798_v28, 2  ;;  %1369 = vmatmul.f32.gmra.mxu3 %v3798_v28  ;;  %1878 = vmatpush.msrb.mxu2 %v3374_v51  ;;  %v3388_v12 = vld [vmem:[%s6587_s3 + $0x200] sm:$0xff]  ;;  %v1551_v28 = vadd.s32 %v5428_v19, %v4561_v18 }
 0x10f   : > { %1917 = vmatpush.msrb.mxu3 %v3398_v58 }
 0x110   : > { %v1117_v24 = vmul.f32 0.1, %v1094_v23  ;;  %v1277_v34 = vsel %vm792_vm5, %v1274_v61, %v1276_v31  ;;  %v1309_v36 = vsel %vm816_vm4, %v1306_v60, %v1308_v33  ;;  %vm1106_vm2 = vcmp.ge.f32.partialorder %v1094_v23, 0.0  ;;  %v3373_v61 = vld [vmem:[%s6587_s3 + $0x188] sm:$0xff]  ;;  %v3395_v60 = vld [vmem:[%s6587_s3 + $0x238] sm:$0xff] }
 0x111   : > { %1416 = vmatmul.f32.gmra.mxu0 %v1277_v34  ;;  %1466 = vmatmul.f32.gmra.mxu1 %v1309_v36  ;;  %v3416_v36 = vld [vmem:[%s6587_s3 + $0x2e0] sm:$0xff]  ;;  %vm1562_vm7 = vcmp.ge.s32.totalorder %v1551_v28, 0  ;;  %vm1573_vm8 = vcmp.lt.s32.totalorder %v1551_v28, 200 }
 0x112   : > { %v1128_v37 = vsel %vm1106_vm2, %v1094_v23, %v1117_v24  ;;  %1918 = vmatpush.msrb.mxu3 %v3397_v59  ;;  %1879 = vmatpush.msrb.mxu2 %v3373_v61  ;;  %v1489_v23 = vrot.slane %v4754_v6, 6  ;;  %vm1584_vm10 = vmand %vm1562_vm7, %vm1573_vm8  ;;  %vm1799_vm7 = vcmask 1044480  }
 0x113   : > { %v1222_v22 = vsel %vm1189_vm3, %v1128_v37, 0.0 }
 0x114   : > { %v3757_v38 = vsel %vm3619_vm9, %v1222_v22, 0  ;;  %1919 = vmatpush.msrb.mxu3 %v3396_v47  ;;  %1880 = vmatpush.msrb.mxu2 %v3372_v3 }
 0x115   : > { %v3802_v39 = vsel %vm3668_vm11, %v1128_v37, %v3757_v38 }
 0x116   : > { %v1278_v42 = vrot.slane %v3802_v39, 1  ;;  %v1310_v43 = vrot.slane %v3802_v39, 2  ;;  %1372 = vmatmul.f32.gmra.mxu3 %v3802_v39  ;;  %1959 = vmatpush.msra.mxu2 %v3419_v48 }
 0x117   : > { %1920 = vmatpush.msrb.mxu3 %v3395_v60 }
 0x118   : > { %v1279_v44 = vsel %vm792_vm5, %v1276_v31, %v1278_v42  ;;  %v1311_v56 = vsel %vm816_vm4, %v1308_v33, %v1310_v43  ;;  %1960 = vmatpush.msra.mxu2 %v3418_v14  ;;  %v1490_v31 = vrot.slane %v4770_v10, 6  ;;  %v1552_v10 = vadd.s32 %v5428_v19, %v4593_v25  ;;  %v3413_v14 = vld [vmem:[%s6587_s3 + $0x2c8] sm:$0xff] }
 0x119   : > { %1419 = vmatmul.f32.gmra.mxu0 %v1279_v44  ;;  %1469 = vmatmul.f32.gmra.mxu1 %v1311_v56 }
 0x11a   : > { %1921 = vmatpush.msrb.mxu3 %v3394_v52  ;;  %1961 = vmatpush.msra.mxu2 %v3417_v16  ;;  %v1491_v22 = vsel %vm1488_vm6, %v1489_v23, %v1490_v31  ;;  %vm1563_vm13 = vcmp.ge.s32.totalorder %v1552_v10, 0  ;;  %vm1574_vm14 = vcmp.lt.s32.totalorder %v1552_v10, 200  ;;  %v1494_v52 = vrot.slane %v4816_v40, 6 }
 0x11b   : > { %vm1585_vm0 = vmand %vm1563_vm13, %vm1574_vm14  ;;  %v1496_v10 = vrot.slane %v4862_v5, 6  ;;  %v3411_v5 = vld [vmem:[%s6587_s3 + $0x2b8] sm:$0xff] }
 0x11c   : > { %1922 = vmatpush.msrb.mxu3 %v3393_v4  ;;  %1962 = vmatpush.msra.mxu2 %v3416_v36  ;;  %v1553_v4 = vadd.s32 %v5428_v19, %v4596_v26  ;;  %v1554_v36 = vadd.s32 %v5428_v19, %v4599_v27 }
 0x11e   : > { %1923 = vmatpush.msrb.mxu3 %v3392_v7  ;;  %1963 = vmatpush.msra.mxu2 %v3415_v35  ;;  %vm1564_vm1 = vcmp.ge.s32.totalorder %v1553_v4, 0  ;;  %vm1575_vm2 = vcmp.lt.s32.totalorder %v1553_v4, 200  ;;  %vm1576_vm13 = vcmp.lt.s32.totalorder %v1554_v36, 200 }
 0x11f   : > { %vm1586_vm8 = vmand %vm1564_vm1, %vm1575_vm2 }
 0x120   : > { %1924 = vmatpush.msrb.mxu3 %v3391_v9  ;;  %1964 = vmatpush.msra.mxu2 %v3414_v1  ;;  %v3412_v1 = vld [vmem:[%s6587_s3 + $0x2c0] sm:$0xff] }
 0x121   : > { %1422 = vmatmul.f32.gmra.mxu0 %v1278_v42  ;;  %1472 = vmatmul.f32.gmra.mxu1 %v1310_v43  ;;  %v1492_v42 = vrot.slane %v4783_v13, 6 }
 0x122   : > { %1925 = vmatpush.msrb.mxu3 %v3390_v11  ;;  %1965 = vmatpush.msra.mxu2 %v3413_v14 }
 0x123   : > { %v1493_v58 = vsel %vm1488_vm6, %v1490_v31, %v1492_v42 }
 0x124   : > { %1926 = vmatpush.msrb.mxu3 %v3389_v50  ;;  %1966 = vmatpush.msra.mxu2 %v3412_v1 }
 0x126   : > { %1927 = vmatpush.msrb.mxu3 %v3388_v12  ;;  %v1495_v12 = vsel %vm1488_vm6, %v1492_v42, %v1494_v52  ;;  %1967 = vmatpush.msra.mxu2 %v3411_v5 }
 0x149   : > { %v1343_v21 = vpop.f32.mrf.mxu3 }
 0x14a   : > { %v1344_v33 = vadd.f32 %v5433_v20, %v1343_v21 }
 0x14e   : > { %v1393_v24 = vpop.f32.mrf.mxu0  ;;  %v1443_v34 = vpop.f32.mrf.mxu1 }
 0x14f   : > { %v1394_v37 = vadd.f32 %v1393_v24, %v1344_v33 }
 0x151   : > { %v1444_v38 = vadd.f32 %v1443_v34, %v1394_v37  ;;  %v1346_v39 = vpop.f32.mrf.mxu3 }
 0x152   : > { %v1347_v44 = vadd.f32 %v5433_v20, %v1346_v39 }
 0x153   : > { %v1523_v6 = vadd.f32 %v1491_v22, %v1444_v38 }
 0x155   : > { %v1617_v43 = vsel %vm1584_vm10, %v1523_v6, 0.0  ;;  %vm1565_vm10 = vcmp.ge.s32.totalorder %v1554_v36, 0 }
 0x156   : > { %v3806_v56 = vsel %vm3619_vm9, %v1617_v43, 0  ;;  %v1396_v57 = vpop.f32.mrf.mxu0  ;;  %v1446_v51 = vpop.f32.mrf.mxu1 }
 0x157   : > { %v1397_v2 = vadd.f32 %v1396_v57, %v1347_v44  ;;  %v3851_v13 = vsel %vm3668_vm11, %v1523_v6, %v3806_v56 }
 0x158   : > { %vm1755_vm15 = vcmp.ge.f32.partialorder %v3851_v13, 0.0  ;;  %v1766_v59 = vmul.f32 0.1, %v3851_v13  ;;  %v2367_v28 = vrot.slane %v3851_v13, 4 }
 0x159   : > { %v1447_v47 = vadd.f32 %v1446_v51, %v1397_v2  ;;  %v1349_v61 = vpop.f32.mrf.mxu3 }
 0x15a   : > { %v1777_v60 = vsel %vm1755_vm15, %v3851_v13, %v1766_v59  ;;  %v1350_v48 = vadd.f32 %v5433_v20, %v1349_v61  ;;  %vm1587_vm15 = vmand %vm1565_vm10, %vm1576_vm13 }
 0x15b   : > { %v1524_v3 = vadd.f32 %v1493_v58, %v1447_v47  ;;  %1881 = vmatmul.f32.vlgmr.msrb.gmra.mxu2 %v1777_v60  ;;  %v1800_v24 = vrot.slane %v1777_v60, 3  ;;  %v1831_v22 = vrot.slane %v1777_v60, 6  ;;  %v1497_v58 = vsel %vm1488_vm6, %v1494_v52, %v1496_v10 }
 0x15c   : > { %v1498_v52 = vrot.slane %v4878_v17, 6  ;;  %v3409_v17 = vld [vmem:[%s6587_s3 + $0x2a8] sm:$0xff] }
 0x15d   : > { %v1618_v7 = vsel %vm1585_vm0, %v1524_v3, 0.0 }
 0x15e   : > { %v3810_v9 = vsel %vm3619_vm9, %v1618_v7, 0  ;;  %v1399_v11 = vpop.f32.mrf.mxu0  ;;  %v1449_v50 = vpop.f32.mrf.mxu1 }
 0x15f   : > { %v1400_v40 = vadd.f32 %v1399_v11, %v1350_v48  ;;  %v3855_v16 = vsel %vm3668_vm11, %v1524_v3, %v3810_v9  ;;  %v1555_v11 = vadd.s32 %v5428_v19, %v4618_v29 }
 0x160   : > { %vm1756_vm3 = vcmp.ge.f32.partialorder %v3855_v16, 0.0  ;;  %v1767_v21 = vmul.f32 0.1, %v3855_v16  ;;  %v2368_v23 = vrot.slane %v3855_v16, 4 }
 0x161   : > { %v1450_v31 = vadd.f32 %v1449_v50, %v1400_v40  ;;  %v1352_v33 = vpop.f32.mrf.mxu3  ;;  %vm1566_vm0 = vcmp.ge.s32.totalorder %v1555_v11, 0  ;;  %vm1577_vm1 = vcmp.lt.s32.totalorder %v1555_v11, 200 }
 0x162   : > { %v1778_v34 = vsel %vm1756_vm3, %v3855_v16, %v1767_v21  ;;  %v5474_v37 = vsel %vm843_vm12, %v2367_v28, %v2368_v23  ;;  %v1353_v43 = vadd.f32 %v5433_v20, %v1352_v33  ;;  %vm1588_vm3 = vmand %vm1566_vm0, %vm1577_vm1 }
 0x163   : > { %v1525_v38 = vadd.f32 %v1495_v12, %v1450_v31  ;;  %v1801_v39 = vrot.slane %v1778_v34, 3  ;;  %v1832_v6 = vrot.slane %v1778_v34, 6  ;;  %1884 = vmatmul.f32.gmra.mxu2 %v1778_v34 }
 0x165   : > { %v1619_v42 = vsel %vm1586_vm8, %v1525_v38, 0.0  ;;  %v1802_v44 = vsel %vm1799_vm7, %v1800_v24, %v1801_v39  ;;  %v5480_v56 = vsel %vm1488_vm6, %v1831_v22, %v1832_v6  ;;  %v1499_v24 = vsel %vm1488_vm6, %v1496_v10, %v1498_v52 }
 0x166   : > { %v3814_v57 = vsel %vm3619_vm9, %v1619_v42, 0  ;;  %v1402_v51 = vpop.f32.mrf.mxu0  ;;  %v1452_v35 = vpop.f32.mrf.mxu1  ;;  %1928 = vmatmul.f32.vlgmr.msrb.gmra.mxu3 %v1802_v44  ;;  %v1500_v10 = vrot.slane %v4902_v45, 6 }
 0x167   : > { %v1403_v2 = vadd.f32 %v1402_v51, %v1353_v43  ;;  %v3859_v13 = vsel %vm3668_vm11, %v1525_v38, %v3814_v57  ;;  %v1556_v57 = vadd.s32 %v5428_v19, %v4621_v30 }
 0x168   : > { %vm1757_vm14 = vcmp.ge.f32.partialorder %v3859_v13, 0.0  ;;  %v1768_v59 = vmul.f32 0.1, %v3859_v13  ;;  %v2370_v47 = vrot.slane %v3859_v13, 4 }
 0x169   : > { %v1453_v61 = vadd.f32 %v1452_v35, %v1403_v2  ;;  %v1355_v60 = vpop.f32.mrf.mxu3  ;;  %vm1567_vm8 = vcmp.ge.s32.totalorder %v1556_v57, 0  ;;  %vm1578_vm10 = vcmp.lt.s32.totalorder %v1556_v57, 200 }
 0x16a   : > { %v1779_v3 = vsel %vm1757_vm14, %v3859_v13, %v1768_v59  ;;  %v5494_v4 = vsel %vm843_vm12, %v2368_v23, %v2370_v47  ;;  %v1356_v12 = vadd.f32 %v5433_v20, %v1355_v60  ;;  %v3410_v23 = vld [vmem:[%s6587_s3 + $0x2b0] sm:$0xff]  ;;  %v3408_v59 = vld [vmem:[%s6587_s3 + $0x2a0] sm:$0xff]  ;;  %vm1589_vm14 = vmand %vm1567_vm8, %vm1578_vm10 }
 0x16b   : > { %v1526_v7 = vadd.f32 %v1497_v58, %v1453_v61  ;;  %v1803_v48 = vrot.slane %v1779_v3, 3  ;;  %v1834_v9 = vrot.slane %v1779_v3, 6  ;;  %1887 = vmatmul.f32.gmra.mxu2 %v1779_v3  ;;  %v1501_v61 = vsel %vm1488_vm6, %v1498_v52, %v1500_v10 }
 0x16c   : > { %1968 = vmatpush.msra.mxu2 %v3410_v23 }
 0x16d   : > { %v1620_v50 = vsel %vm1587_vm15, %v1526_v7, 0.0  ;;  %v1804_v14 = vsel %vm1799_vm7, %v1801_v39, %v1803_v48  ;;  %v5502_v40 = vsel %vm1488_vm6, %v1832_v6, %v1834_v9 }
 0x16e   : > { %v3818_v16 = vsel %vm3619_vm9, %v1620_v50, 0  ;;  %v1405_v21 = vpop.f32.mrf.mxu0  ;;  %v1455_v28 = vpop.f32.mrf.mxu1  ;;  %1931 = vmatmul.f32.gmra.mxu3 %v1804_v14  ;;  %1969 = vmatpush.msra.mxu2 %v3409_v17 }
 0x16f   : > { %v1406_v31 = vadd.f32 %v1405_v21, %v1356_v12  ;;  %v3863_v33 = vsel %vm3668_vm11, %v1526_v7, %v3818_v16  ;;  %v1557_v16 = vadd.s32 %v5428_v19, %v4682_v49  ;;  %v1502_v21 = vrot.slane %v4930_v62, 6  ;;  %v3406_v62 = vld [vmem:[%s6587_s3 + $0x290] sm:$0xff] }
 0x170   : > { %vm1758_vm2 = vcmp.ge.f32.partialorder %v3863_v33, 0.0  ;;  %v1769_v34 = vmul.f32 0.1, %v3863_v33  ;;  %v2372_v36 = vrot.slane %v3863_v33, 4  ;;  %1970 = vmatpush.msra.mxu2 %v3408_v59 }
 0x171   : > { %v1456_v22 = vadd.f32 %v1455_v28, %v1406_v31  ;;  %v1358_v38 = vpop.f32.mrf.mxu3  ;;  %vm1568_vm15 = vcmp.ge.s32.totalorder %v1557_v16, 0  ;;  %vm1579_vm0 = vcmp.lt.s32.totalorder %v1557_v16, 200 }
 0x172   : > { %v1780_v39 = vsel %vm1758_vm2, %v3863_v33, %v1769_v34  ;;  %v5516_v6 = vsel %vm843_vm12, %v2370_v47, %v2372_v36  ;;  %v1359_v35 = vadd.f32 %v5433_v20, %v1358_v38  ;;  %v3407_v34 = vld [vmem:[%s6587_s3 + $0x298] sm:$0xff]  ;;  %v1503_v38 = vsel %vm1488_vm6, %v1500_v10, %v1502_v21  ;;  %vm1590_vm2 = vmand %vm1568_vm15, %vm1579_vm0 }
 0x173   : > { %v1527_v42 = vadd.f32 %v1499_v24, %v1456_v22  ;;  %v1805_v43 = vrot.slane %v1780_v39, 3  ;;  %v1836_v44 = vrot.slane %v1780_v39, 6  ;;  %1890 = vmatmul.f32.gmra.mxu2 %v1780_v39  ;;  %v1504_v10 = vrot.slane %v4971_v32, 6 }
 0x174   : > { %1971 = vmatpush.msra.mxu2 %v3407_v34  ;;  %v1506_v34 = vrot.slane %v5004_v63, 6 }
 0x175   : > { %v1621_v51 = vsel %vm1588_vm3, %v1527_v42, 0.0  ;;  %v1806_v1 = vsel %vm1799_vm7, %v1803_v48, %v1805_v43  ;;  %v5524_v5 = vsel %vm1488_vm6, %v1834_v9, %v1836_v44 }
 0x176   : > { %v3822_v2 = vsel %vm3619_vm9, %v1621_v51, 0  ;;  %v1408_v13 = vpop.f32.mrf.mxu0  ;;  %v1458_v58 = vpop.f32.mrf.mxu1  ;;  %1934 = vmatmul.f32.gmra.mxu3 %v1806_v1  ;;  %1972 = vmatpush.msra.mxu2 %v3406_v62 }
 0x177   : > { %v1409_v47 = vadd.f32 %v1408_v13, %v1359_v35  ;;  %v3867_v45 = vsel %vm3668_vm11, %v1527_v42, %v3822_v2  ;;  %v1558_v13 = vadd.s32 %v5428_v19, %v4867_v8 }
 0x178   : > { %vm1759_vm13 = vcmp.ge.f32.partialorder %v3867_v45, 0.0  ;;  %v1770_v60 = vmul.f32 0.1, %v3867_v45  ;;  %v2374_v3 = vrot.slane %v3867_v45, 4 }
 0x179   : > { %v1459_v7 = vadd.f32 %v1458_v58, %v1409_v47  ;;  %v1361_v48 = vpop.f32.mrf.mxu3  ;;  %vm1569_vm3 = vcmp.ge.s32.totalorder %v1558_v13, 0  ;;  %vm1580_vm8 = vcmp.lt.s32.totalorder %v1558_v13, 200 }
 0x17a   : > { %v1781_v9 = vsel %vm1759_vm13, %v3867_v45, %v1770_v60  ;;  %v5535_v11 = vsel %vm843_vm12, %v2372_v36, %v2374_v3  ;;  %v1362_v28 = vadd.f32 %v5433_v20, %v1361_v48  ;;  %v1505_v48 = vsel %vm1488_vm6, %v1502_v21, %v1504_v10  ;;  %vm1591_vm13 = vmand %vm1569_vm3, %vm1580_vm8 }
 0x17b   : > { %v1528_v50 = vadd.f32 %v1501_v61, %v1459_v7  ;;  %v1807_v12 = vrot.slane %v1781_v9, 3  ;;  %v1838_v14 = vrot.slane %v1781_v9, 6  ;;  %1893 = vmatmul.f32.gmra.mxu2 %v1781_v9 }
 0x17d   : > { %v1622_v52 = vsel %vm1589_vm14, %v1528_v50, 0.0  ;;  %v1808_v23 = vsel %vm1799_vm7, %v1805_v43, %v1807_v12  ;;  %v5543_v17 = vsel %vm1488_vm6, %v1836_v44, %v1838_v14 }
 0x17e   : > { %v3826_v31 = vsel %vm3619_vm9, %v1622_v52, 0  ;;  %v1411_v33 = vpop.f32.mrf.mxu0  ;;  %v1461_v24 = vpop.f32.mrf.mxu1  ;;  %1937 = vmatmul.f32.gmra.mxu3 %v1808_v23  ;;  %v3404_v52 = vld [vmem:[%s6587_s3 + $0x280] sm:$0xff] }
 0x17f   : > { %v1412_v36 = vadd.f32 %v1411_v33, %v1362_v28  ;;  %v3871_v22 = vsel %vm3668_vm11, %v1528_v50, %v3826_v31  ;;  %v3405_v50 = vld [vmem:[%s6587_s3 + $0x288] sm:$0xff] }
 0x180   : > { %vm1760_vm1 = vcmp.ge.f32.partialorder %v3871_v22, 0.0  ;;  %v1771_v39 = vmul.f32 0.1, %v3871_v22  ;;  %v2376_v42 = vrot.slane %v3871_v22, 4  ;;  %1973 = vmatpush.msra.mxu2 %v3405_v50 }
 0x181   : > { %v1462_v43 = vadd.f32 %v1461_v24, %v1412_v36  ;;  %v1364_v44 = vpop.f32.mrf.mxu3  ;;  %v1559_v24 = vadd.s32 %v5428_v19, %v4911_v53 }
 0x182   : > { %v1782_v57 = vsel %vm1760_vm1, %v3871_v22, %v1771_v39  ;;  %v5557_v51 = vsel %vm843_vm12, %v2374_v3, %v2376_v42  ;;  %v1365_v59 = vadd.f32 %v5433_v20, %v1364_v44  ;;  %1974 = vmatpush.msra.mxu2 %v3404_v52 }
 0x183   : > { %v1529_v35 = vadd.f32 %v1503_v38, %v1462_v43  ;;  %v1809_v1 = vrot.slane %v1782_v57, 3  ;;  %v1840_v2 = vrot.slane %v1782_v57, 6  ;;  %1896 = vmatmul.f32.gmra.mxu2 %v1782_v57  ;;  %vm1570_vm14 = vcmp.ge.s32.totalorder %v1559_v24, 0 }
 0x184   : > { %vm1581_vm15 = vcmp.lt.s32.totalorder %v1559_v24, 200  ;;  %v1507_v57 = vsel %vm1488_vm6, %v1504_v10, %v1506_v34 }
 0x185   : > { %v1623_v58 = vsel %vm1590_vm2, %v1529_v35, 0.0  ;;  %v1810_v47 = vsel %vm1799_vm7, %v1807_v12, %v1809_v1  ;;  %v5565_v45 = vsel %vm1488_vm6, %v1838_v14, %v1840_v2  ;;  %vm1592_vm1 = vmand %vm1570_vm14, %vm1581_vm15 }
 0x186   : > { %v3830_v61 = vsel %vm3619_vm9, %v1623_v58, 0  ;;  %v1414_v60 = vpop.f32.mrf.mxu0  ;;  %v1464_v3 = vpop.f32.mrf.mxu1  ;;  %1940 = vmatmul.f32.gmra.mxu3 %v1810_v47 }
 0x187   : > { %v1415_v7 = vadd.f32 %v1414_v60, %v1365_v59  ;;  %v3875_v32 = vsel %vm3668_vm11, %v1529_v35, %v3830_v61 }
 0x188   : > { %vm1761_vm10 = vcmp.ge.f32.partialorder %v3875_v32, 0.0  ;;  %v1772_v9 = vmul.f32 0.1, %v3875_v32  ;;  %v2378_v12 = vrot.slane %v3875_v32, 4 }
 0x189   : > { %v1465_v14 = vadd.f32 %v1464_v3, %v1415_v7  ;;  %v1367_v16 = vpop.f32.mrf.mxu3  ;;  %v1560_v3 = vadd.s32 %v5428_v19, %v4914_v54  ;;  %v1508_v7 = vrot.slane %v4993_v41, 6 }
 0x18a   : > { %v1783_v28 = vsel %vm1761_vm10, %v3875_v32, %v1772_v9  ;;  %v5579_v23 = vsel %vm843_vm12, %v2376_v42, %v2378_v12  ;;  %v1368_v36 = vadd.f32 %v5433_v20, %v1367_v16 }
 0x18b   : > { %v1530_v21 = vadd.f32 %v1505_v48, %v1465_v14  ;;  %v1811_v31 = vrot.slane %v1783_v28, 3  ;;  %v1842_v33 = vrot.slane %v1783_v28, 6  ;;  %1899 = vmatmul.f32.gmra.mxu2 %v1783_v28  ;;  %vm1571_vm2 = vcmp.ge.s32.totalorder %v1560_v3, 0 }
 0x18c   : > { %vm1582_vm3 = vcmp.lt.s32.totalorder %v1560_v3, 200  ;;  %v1509_v52 = vsel %vm1488_vm6, %v1506_v34, %v1508_v7 }
 0x18d   : > { %v1624_v62 = vsel %vm1591_vm13, %v1530_v21, 0.0  ;;  %v1812_v22 = vsel %vm1799_vm7, %v1809_v1, %v1811_v31  ;;  %v5587_v38 = vsel %vm1488_vm6, %v1840_v2, %v1842_v33  ;;  %vm1593_vm10 = vmand %vm1571_vm2, %vm1582_vm3 }
 0x18e   : > { %v3834_v39 = vsel %vm3619_vm9, %v1624_v62, 0  ;;  %v1417_v42 = vpop.f32.mrf.mxu0  ;;  %v1467_v43 = vpop.f32.mrf.mxu1  ;;  %1943 = vmatmul.f32.gmra.mxu3 %v1812_v22 }
 0x18f   : > { %v1418_v44 = vadd.f32 %v1417_v42, %v1368_v36  ;;  %v3879_v63 = vsel %vm3668_vm11, %v1530_v21, %v3834_v39  ;;  %v1561_v42 = vadd.s32 %v5428_v19, %v4935_v0 }
 0x190   : > { %vm1762_vm0 = vcmp.ge.f32.partialorder %v3879_v63, 0.0  ;;  %v1773_v35 = vmul.f32 0.1, %v3879_v63  ;;  %v2380_v1 = vrot.slane %v3879_v63, 4 }
 0x191   : > { %v1468_v13 = vadd.f32 %v1467_v43, %v1418_v44  ;;  %v1370_v2 = vpop.f32.mrf.mxu3  ;;  %v1510_v43 = vrot.slane %v5025_v15, 6  ;;  %vm1572_vm13 = vcmp.ge.s32.totalorder %v1561_v42, 0  ;;  %vm1583_vm14 = vcmp.lt.s32.totalorder %v1561_v42, 200 }
 0x192   : > { %v1784_v58 = vsel %vm1762_vm0, %v3879_v63, %v1773_v35  ;;  %v5595_v59 = vsel %vm843_vm12, %v2378_v12, %v2380_v1  ;;  %v1371_v32 = vadd.f32 %v5433_v20, %v1370_v2  ;;  %vm1594_vm0 = vmand %vm1572_vm13, %vm1583_vm14 }
 0x193   : > { %v1531_v47 = vadd.f32 %v1507_v57, %v1468_v13  ;;  %v1813_v61 = vrot.slane %v1784_v58, 3  ;;  %v1844_v60 = vrot.slane %v1784_v58, 6  ;;  %1902 = vmatmul.f32.gmra.mxu2 %v1784_v58  ;;  %v1511_v19 = vsel %vm1488_vm6, %v1508_v7, %v1510_v43  ;;  %v3432_v43 = vld [vmem:[%s6589_s5 + $0x1d8] sm:$0xff] }
 0x195   : > { %v1625_v10 = vsel %vm1592_vm1, %v1531_v47, 0.0  ;;  %v1814_v48 = vsel %vm1799_vm7, %v1811_v31, %v1813_v61  ;;  %v5603_v9 = vsel %vm1488_vm6, %v1842_v33, %v1844_v60 }
 0x196   : > { %v3838_v50 = vsel %vm3619_vm9, %v1625_v10, 0  ;;  %v1420_v12 = vpop.f32.mrf.mxu0  ;;  %v1470_v14 = vpop.f32.mrf.mxu1  ;;  %1946 = vmatmul.f32.gmra.mxu3 %v1814_v48 }
 0x197   : > { %v1421_v16 = vadd.f32 %v1420_v12, %v1371_v32  ;;  %v3883_v41 = vsel %vm3668_vm11, %v1531_v47, %v3838_v50 }
 0x198   : > { %vm1763_vm8 = vcmp.ge.f32.partialorder %v3883_v41, 0.0  ;;  %v1774_v28 = vmul.f32 0.1, %v3883_v41  ;;  %v2382_v21 = vrot.slane %v3883_v41, 4 }
 0x199   : > { %v1471_v31 = vadd.f32 %v1470_v14, %v1421_v16  ;;  %v1373_v33 = vpop.f32.mrf.mxu3 }
 0x19a   : > { %v1785_v24 = vsel %vm1763_vm8, %v3883_v41, %v1774_v28  ;;  %v5611_v62 = vsel %vm843_vm12, %v2380_v1, %v2382_v21  ;;  %v1374_v44 = vadd.f32 %v5433_v20, %v1373_v33  ;;  %v3468_v33 = vld [vmem:[%s6589_s5 + $0x2f8] sm:$0xff] }
 0x19b   : > { %v1532_v36 = vadd.f32 %v1509_v52, %v1471_v31  ;;  %v1815_v22 = vrot.slane %v1785_v24, 3  ;;  %v1846_v39 = vrot.slane %v1785_v24, 6  ;;  %1905 = vmatmul.f32.gmra.mxu2 %v1785_v24  ;;  %v3436_v31 = vld [vmem:[%s6589_s5 + $0x1f8] sm:$0xff]  ;;  %2310 = vmatpush.msra.mxu1 %v3468_v33  ;;  %v3450_v24 = vld [vmem:[%s6589_s5 + $0x268] sm:$0xff]  ;;  %v3423_v33 = vld [vmem:[%s6589_s5 + $0x190] sm:$0xff] }
 0x19c   : > { %2216 = vmatpush.msra.mxu3 %v3436_v31  ;;  %v3441_v31 = vld [vmem:[%s6589_s5 + $0x220] sm:$0xff] }
 0x19d   : > { %v1626_v34 = vsel %vm1593_vm10, %v1532_v36, 0.0  ;;  %v1816_v63 = vsel %vm1799_vm7, %v1813_v61, %v1815_v22  ;;  %v5619_v57 = vsel %vm1488_vm6, %v1844_v60, %v1846_v39 }
 0x19e   : > { %v3842_v35 = vsel %vm3619_vm9, %v1626_v34, 0  ;;  %v1423_v1 = vpop.f32.mrf.mxu0  ;;  %1949 = vmatmul.f32.gmra.mxu3 %v1816_v63  ;;  %v1473_v15 = vpop.f32.mrf.mxu1  ;;  %v3448_v34 = vld [vmem:[%s6589_s5 + $0x258] sm:$0xff] }
 0x19f   : > { %v1424_v13 = vadd.f32 %v1423_v1, %v1374_v44  ;;  %v5625_v0 = vsel %vm3668_vm11, %v1532_v36, %v3842_v35  ;;  %v3466_v36 = vld [vmem:[%s6589_s5 + $0x2e8] sm:$0xff]  ;;  %v3464_v44 = vld [vmem:[%s6589_s5 + $0x2d8] sm:$0xff]  ;;  %v3447_v35 = vld [vmem:[%s6589_s5 + $0x250] sm:$0xff] }
 0x1a0   : > { %vm1764_vm15 = vcmp.ge.f32.partialorder %v5625_v0, 0.0  ;;  %v1775_v20 = vmul.f32 0.1, %v5625_v0  ;;  %v2384_v2 = vrot.slane %v5625_v0, 4  ;;  %v3430_v1 = vld [vmem:[%s6589_s5 + $0x1c8] sm:$0xff] }
 0x1a1   : > { %v1474_v58 = vadd.f32 %v1473_v15, %v1424_v13  ;;  %v3463_v13 = vld [vmem:[%s6589_s5 + $0x2d0] sm:$0xff]  ;;  %v3429_v15 = vld [vmem:[%s6589_s5 + $0x1c0] sm:$0xff] }
 0x1a2   : > { %v1786_v47 = vsel %vm1764_vm15, %v5625_v0, %v1775_v20  ;;  %v5635_v61 = vsel %vm843_vm12, %v2382_v21, %v2384_v2 }
 0x1a3   : > { %v1533_v60 = vadd.f32 %v1511_v19, %v1474_v58  ;;  %v1817_v3 = vrot.slane %v1786_v47, 3  ;;  %v1848_v10 = vrot.slane %v1786_v47, 6  ;;  %1908 = vmatmul.f32.gmra.mxu2 %v1786_v47  ;;  %v3462_v19 = vld [vmem:[%s6589_s5 + $0x2c8] sm:$0xff]  ;;  %v3445_v58 = vld [vmem:[%s6589_s5 + $0x240] sm:$0xff]  ;;  %v3428_v47 = vld [vmem:[%s6589_s5 + $0x1b8] sm:$0xff] }
 0x1a5   : > { %v1627_v7 = vsel %vm1594_vm0, %v1533_v60, 0.0  ;;  %v1818_v32 = vsel %vm1799_vm7, %v1815_v22, %v1817_v3  ;;  %v1849_v48 = vsel %vm1488_vm6, %v1846_v39, %v1848_v10  ;;  %v3449_v22 = vld [vmem:[%s6589_s5 + $0x260] sm:$0xff] }
 0x1a6   : > { %v3846_v50 = vsel %vm3619_vm9, %v1627_v7, 0  ;;  %1952 = vmatmul.f32.gmra.mxu3 %v1818_v32  ;;  %v3465_v39 = vld [vmem:[%s6589_s5 + $0x2e0] sm:$0xff]  ;;  %v3427_v7 = vld [vmem:[%s6589_s5 + $0x1b0] sm:$0xff]  ;;  %v3460_v32 = vld [vmem:[%s6589_s5 + $0x2b8] sm:$0xff] }
 0x1a7   : > { %v3891_v12 = vsel %vm3668_vm11, %v1533_v60, %v3846_v50  ;;  %v3461_v60 = vld [vmem:[%s6589_s5 + $0x2c0] sm:$0xff]  ;;  %v3443_v50 = vld [vmem:[%s6589_s5 + $0x230] sm:$0xff] }
 0x1a8   : > { %v1776_v14 = vmul.f32 0.1, %v3891_v12  ;;  %vm1765_vm1 = vcmp.ge.f32.partialorder %v3891_v12, 0.0 }
 0x1aa   : > { %v1787_v16 = vsel %vm1765_vm1, %v3891_v12, %v1776_v14  ;;  %v3459_v14 = vld [vmem:[%s6589_s5 + $0x2b0] sm:$0xff] }
 0x1ab   : > { %1975 = vmatmul.f32.vlgmr.msra.gmra.mxu2 %v5480_v56  ;;  %v1819_v41 = vrot.slane %v1787_v16, 3  ;;  %v1850_v52 = vrot.slane %v1787_v16, 6  ;;  %v3452_v56 = vld [vmem:[%s6589_s5 + $0x278] sm:$0xff]  ;;  %v3425_v16 = vld [vmem:[%s6589_s5 + $0x1a0] sm:$0xff] }
 0x1ac   : > { %2263 = vmatpush.msra.mxu0 %v3452_v56  ;;  %v3457_v56 = vld [vmem:[%s6589_s5 + $0x2a0] sm:$0xff] }
 0x1ad   : > { %v1820_v28 = vsel %vm1799_vm7, %v1817_v3, %v1819_v41  ;;  %v1851_v21 = vsel %vm1488_vm6, %v1848_v10, %v1850_v52  ;;  %v3444_v10 = vld [vmem:[%s6589_s5 + $0x238] sm:$0xff]  ;;  %v3442_v41 = vld [vmem:[%s6589_s5 + $0x228] sm:$0xff] }
 0x1ae   : > { %1955 = vmatmul.f32.gmra.mxu3 %v1820_v28  ;;  %v3458_v52 = vld [vmem:[%s6589_s5 + $0x2a8] sm:$0xff] }
 0x1b3   : > { %1978 = vmatmul.f32.gmra.mxu2 %v5502_v40  ;;  %v3435_v40 = vld [vmem:[%s6589_s5 + $0x1f0] sm:$0xff] }
 0x1b4   : > { %2217 = vmatpush.msra.mxu3 %v3435_v40  ;;  %v3440_v40 = vld [vmem:[%s6589_s5 + $0x218] sm:$0xff] }
 0x1bb   : > { %1981 = vmatmul.f32.gmra.mxu2 %v5524_v5  ;;  %v3451_v5 = vld [vmem:[%s6589_s5 + $0x270] sm:$0xff] }
 0x1bc   : > { %2264 = vmatpush.msra.mxu0 %v3451_v5 }
 0x1be   : > { %2265 = vmatpush.msra.mxu0 %v3450_v24  ;;  %v3439_v24 = vld [vmem:[%s6589_s5 + $0x210] sm:$0xff] }
 0x1c0   : > { %2266 = vmatpush.msra.mxu0 %v3449_v22 }
 0x1c2   : > { %2267 = vmatpush.msra.mxu0 %v3448_v34  ;;  %v3454_v34 = vld [vmem:[%s6589_s5 + $0x288] sm:$0xff] }
 0x1c3   : > { %1984 = vmatmul.f32.gmra.mxu2 %v5543_v17  ;;  %v3467_v17 = vld [vmem:[%s6589_s5 + $0x2f0] sm:$0xff] }
 0x1c4   : > { %2311 = vmatpush.msra.mxu1 %v3467_v17  ;;  %2268 = vmatpush.msra.mxu0 %v3447_v35  ;;  %v3456_v17 = vld [vmem:[%s6589_s5 + $0x298] sm:$0xff]  ;;  %v3453_v35 = vld [vmem:[%s6589_s5 + $0x280] sm:$0xff] }
 0x1c6   : > { %2312 = vmatpush.msra.mxu1 %v3466_v36  ;;  %v3455_v36 = vld [vmem:[%s6589_s5 + $0x290] sm:$0xff] }
 0x1c8   : > { %2313 = vmatpush.msra.mxu1 %v3465_v39 }
 0x1ca   : > { %2314 = vmatpush.msra.mxu1 %v3464_v44  ;;  %v3437_v44 = vld [vmem:[%s6589_s5 + $0x200] sm:$0xff] }
 0x1cb   : > { %1987 = vmatmul.f32.gmra.mxu2 %v5565_v45  ;;  %v3434_v45 = vld [vmem:[%s6589_s5 + $0x1e8] sm:$0xff] }
 0x1cc   : > { %2218 = vmatpush.msra.mxu3 %v3434_v45  ;;  %2315 = vmatpush.msra.mxu1 %v3463_v13  ;;  %v3422_v45 = vld [vmem:[%s6589_s5 + $0x188] sm:$0xff] }
 0x1ce   : > { %2316 = vmatpush.msra.mxu1 %v3462_v19 }
 0x1d0   : > { %2317 = vmatpush.msra.mxu1 %v3461_v60 }
 0x1d2   : > { %2318 = vmatpush.msra.mxu1 %v3460_v32 }
 0x1d3   : > { %1990 = vmatmul.f32.gmra.mxu2 %v5587_v38  ;;  %v3433_v38 = vld [vmem:[%s6589_s5 + $0x1e0] sm:$0xff] }
 0x1d4   : > { %2219 = vmatpush.msra.mxu3 %v3433_v38  ;;  %2319 = vmatpush.msra.mxu1 %v3459_v14  ;;  %v3421_v38 = vld [vmem:[%s6589_s5 + $0x180] sm:$0xff] }
 0x1d6   : > { %2220 = vmatpush.msra.mxu3 %v3432_v43  ;;  %2320 = vmatpush.msra.mxu1 %v3458_v52  ;;  %v3438_v43 = vld [vmem:[%s6589_s5 + $0x208] sm:$0xff] }
 0x1d8   : > { %2321 = vmatpush.msra.mxu1 %v3457_v56 }
 0x1da   : > { %2322 = vmatpush.msra.mxu1 %v3456_v17 }
 0x1db   : > { %1993 = vmatmul.f32.gmra.mxu2 %v5603_v9  ;;  %v3431_v9 = vld [vmem:[%s6589_s5 + $0x1d0] sm:$0xff] }
 0x1dc   : > { %2221 = vmatpush.msra.mxu3 %v3431_v9  ;;  %2323 = vmatpush.msra.mxu1 %v3455_v36 }
 0x1de   : > { %v5688_v42 = vpop.f32.mrf.mxu2  ;;  %2222 = vmatpush.msra.mxu3 %v3430_v1  ;;  %2324 = vmatpush.msra.mxu1 %v3454_v34 }
 0x1e0   : > { %2223 = vmatpush.msra.mxu3 %v3429_v15  ;;  %2325 = vmatpush.msra.mxu1 %v3453_v35  ;;  %v5823_v15 = vstv %s2036_s29 }
 0x1e1   : > { %v2052_v19 = vadd.s32 %v5823_v15, %v4561_v18 }
 0x1e2   : > { %2224 = vmatpush.msra.mxu3 %v3428_v47 }
 0x1e3   : > { %1996 = vmatmul.f32.gmra.mxu2 %v5619_v57  ;;  %v3446_v57 = vld [vmem:[%s6589_s5 + $0x248] sm:$0xff]  ;;  %vm2062_vm12 = vcmp.ge.s32.totalorder %v2052_v19, 0  ;;  %vm2072_vm7 = vcmp.lt.s32.totalorder %v2052_v19, 200 }
 0x1e4   : > { %2269 = vmatpush.msra.mxu0 %v3446_v57  ;;  %2225 = vmatpush.msra.mxu3 %v3427_v7  ;;  %v5821_v57 = vld [vmem:[%s6588_s4 + $0x1] ss:$0 sm:$0xff]  ;;  %vm2082_vm3 = vmand %vm2062_vm12, %vm2072_vm7 }
 0x1e6   : > { %v5703_v63 = vpop.f32.mrf.mxu2  ;;  %2270 = vmatpush.msra.mxu0 %v3445_v58  ;;  %v1883_v58 = vadd.f32 %v5821_v57, %v5688_v42 }
 0x1e8   : > { %2271 = vmatpush.msra.mxu0 %v3444_v10 }
 0x1e9   : > { %v1929_v39 = vpop.f32.mrf.mxu3 }
 0x1ea   : > { %2272 = vmatpush.msra.mxu0 %v3443_v50  ;;  %v1930_v60 = vadd.f32 %v1929_v39, %v1883_v58  ;;  %v1886_v50 = vadd.f32 %v5821_v57, %v5703_v63  ;;  %v2054_v63 = vadd.s32 %v5823_v15, %v4596_v26 }
 0x1eb   : > { %1999 = vmatmul.f32.gmra.mxu2 %v1849_v48  ;;  %v3426_v48 = vld [vmem:[%s6589_s5 + $0x1a8] sm:$0xff] }
 0x1ec   : > { %2226 = vmatpush.msra.mxu3 %v3426_v48  ;;  %2273 = vmatpush.msra.mxu0 %v3442_v41  ;;  %v2053_v48 = vadd.s32 %v5823_v15, %v4593_v25  ;;  %vm2064_vm15 = vcmp.ge.s32.totalorder %v2054_v63, 0  ;;  %vm2074_vm0 = vcmp.lt.s32.totalorder %v2054_v63, 200 }
 0x1ed   : > { %vm2084_vm12 = vmand %vm2064_vm15, %vm2074_vm0 }
 0x1ee   : > { %v5723_v20 = vpop.f32.mrf.mxu2  ;;  %2227 = vmatpush.msra.mxu3 %v3425_v16  ;;  %2274 = vmatpush.msra.mxu0 %v3441_v31  ;;  %vm2063_vm8 = vcmp.ge.s32.totalorder %v2053_v48, 0  ;;  %vm2073_vm10 = vcmp.lt.s32.totalorder %v2053_v48, 200 }
 0x1ef   : > { %vm2083_vm14 = vmand %vm2063_vm8, %vm2073_vm10 }
 0x1f0   : > { %2275 = vmatpush.msra.mxu0 %v3440_v40  ;;  %v1889_v40 = vadd.f32 %v5821_v57, %v5723_v20 }
 0x1f1   : > { %v1932_v1 = vpop.f32.mrf.mxu3 }
 0x1f2   : > { %2276 = vmatpush.msra.mxu0 %v3439_v24  ;;  %v1933_v41 = vadd.f32 %v1932_v1, %v1886_v50 }
 0x1f3   : > { %2002 = vmatmul.f32.gmra.mxu2 %v1851_v21  ;;  %v3424_v21 = vld [vmem:[%s6589_s5 + $0x198] sm:$0xff] }
 0x1f4   : > { %2228 = vmatpush.msra.mxu3 %v3424_v21  ;;  %2277 = vmatpush.msra.mxu0 %v3438_v43 }
 0x1f6   : > { %v5734_v3 = vpop.f32.mrf.mxu2  ;;  %2229 = vmatpush.msra.mxu3 %v3423_v33  ;;  %2278 = vmatpush.msra.mxu0 %v3437_v44 }
 0x1f8   : > { %2230 = vmatpush.msra.mxu3 %v3422_v45 }
 0x1f9   : > { %v1935_v47 = vpop.f32.mrf.mxu3 }
 0x1fa   : > { %2231 = vmatpush.msra.mxu3 %v3421_v38  ;;  %v1936_v24 = vadd.f32 %v1935_v47, %v1889_v40 }
 0x1fe   : > { %v5751_v12 = vpop.f32.mrf.mxu2 }
 0x1ff   : > { %v1895_v63 = vadd.f32 %v5821_v57, %v5751_v12 }
 0x201   : > { %v1938_v52 = vpop.f32.mrf.mxu3 }
 0x206   : > { %v5765_v28 = vpop.f32.mrf.mxu2 }
 0x209   : > { %v1941_v19 = vpop.f32.mrf.mxu3 }
 0x20e   : > { %v5782_v5 = vpop.f32.mrf.mxu2 }
 0x216   : > { %v5799_v22 = vpop.f32.mrf.mxu2 }
 0x21e   : > { %v5810_v9 = vpop.f32.mrf.mxu2 }
 0x226   : > { %v5816_v13 = vpop.f32.mrf.mxu2 }
 0x22e   : > { %v1976_v10 = vpop.f32.mrf.mxu2 }
 0x22f   : > { %v1977_v7 = vadd.f32 %v1976_v10, %v1930_v60  ;;  %v2055_v60 = vadd.s32 %v5823_v15, %v4599_v27  ;;  %v1892_v10 = vadd.f32 %v5821_v57, %v5734_v3 }
 0x231   : > { %vm2006_vm2 = vcmp.ge.f32.partialorder %v1977_v7, 0.0  ;;  %v2016_v32 = vmul.f32 0.1, %v1977_v7  ;;  %v1939_v48 = vadd.f32 %v1938_v52, %v1892_v10  ;;  %vm2065_vm7 = vcmp.ge.s32.totalorder %v2055_v60, 0  ;;  %v1944_v52 = vpop.f32.mrf.mxu3 }
 0x233   : > { %v2026_v14 = vsel %vm2006_vm2, %v1977_v7, %v2016_v32  ;;  %vm2075_vm2 = vcmp.lt.s32.totalorder %v2055_v60, 200 }
 0x234   : > { %v2112_v16 = vsel %vm2082_vm3, %v2026_v14, 0.0  ;;  %vm2085_vm8 = vmand %vm2065_vm7, %vm2075_vm2 }
 0x235   : > { %v3895_v42 = vsel %vm3619_vm9, %v2112_v16, 0 }
 0x236   : > { %v1979_v21 = vpop.f32.mrf.mxu2  ;;  %v3936_v31 = vsel %vm3668_vm11, %v2026_v14, %v3895_v42 }
 0x237   : > { %v1980_v56 = vadd.f32 %v1979_v21, %v1933_v41  ;;  %2232 = vmatmul.f32.vlgmr.msra.gmra.mxu3 %v3936_v31  ;;  %v2155_v38 = vrot.slane %v3936_v31, 1  ;;  %v2184_v34 = vrot.slane %v3936_v31, 2 }
 0x239   : > { %vm2007_vm13 = vcmp.ge.f32.partialorder %v1980_v56, 0.0  ;;  %v2017_v33 = vmul.f32 0.1, %v1980_v56 }
 0x23b   : > { %v2027_v17 = vsel %vm2007_vm13, %v1980_v56, %v2017_v33  ;;  %v2056_v33 = vadd.s32 %v5823_v15, %v4618_v29 }
 0x23c   : > { %v2113_v45 = vsel %vm2083_vm14, %v2027_v17, 0.0 }
 0x23d   : > { %v3899_v36 = vsel %vm3619_vm9, %v2113_v45, 0  ;;  %v1942_v45 = vadd.f32 %v1941_v19, %v1895_v63  ;;  %vm2066_vm10 = vcmp.ge.s32.totalorder %v2056_v33, 0  ;;  %vm2076_vm13 = vcmp.lt.s32.totalorder %v2056_v33, 200 }
 0x23e   : > { %v1982_v39 = vpop.f32.mrf.mxu2  ;;  %v3940_v43 = vsel %vm3668_vm11, %v2027_v17, %v3899_v36  ;;  %vm2086_vm15 = vmand %vm2066_vm10, %vm2076_vm13  ;;  %v1898_v19 = vadd.f32 %v5821_v57, %v5765_v28 }
 0x23f   : > { %v1983_v44 = vadd.f32 %v1982_v39, %v1936_v24  ;;  %v2156_v35 = vrot.slane %v3940_v43, 1  ;;  %v2185_v1 = vrot.slane %v3940_v43, 2  ;;  %2235 = vmatmul.f32.gmra.mxu3 %v3940_v43 }
 0x240   : > { %v1945_v60 = vadd.f32 %v1944_v52, %v1898_v19 }
 0x241   : > { %vm2008_vm1 = vcmp.ge.f32.partialorder %v1983_v44, 0.0  ;;  %v2018_v20 = vmul.f32 0.1, %v1983_v44  ;;  %v2157_v58 = vsel %vm792_vm5, %v2155_v38, %v2156_v35  ;;  %v2186_v47 = vsel %vm816_vm4, %v2184_v34, %v2185_v1 }
 0x242   : > { %2279 = vmatmul.f32.vlgmr.msra.gmra.mxu0 %v2157_v58  ;;  %2326 = vmatmul.f32.vlgmr.msra.gmra.mxu1 %v2186_v47  ;;  %v1947_v58 = vpop.f32.mrf.mxu3 }
 0x243   : > { %v2028_v7 = vsel %vm2008_vm1, %v1983_v44, %v2018_v20 }
 0x244   : > { %v2114_v32 = vsel %vm2084_vm12, %v2028_v7, 0.0 }
 0x245   : > { %v3903_v50 = vsel %vm3619_vm9, %v2114_v32, 0 }
 0x246   : > { %v1985_v14 = vpop.f32.mrf.mxu2  ;;  %v3944_v16 = vsel %vm3668_vm11, %v2028_v7, %v3903_v50 }
 0x247   : > { %v1986_v41 = vadd.f32 %v1985_v14, %v1939_v48  ;;  %v2158_v42 = vrot.slane %v3944_v16, 1  ;;  %v2187_v21 = vrot.slane %v3944_v16, 2  ;;  %2238 = vmatmul.f32.gmra.mxu3 %v3944_v16 }
 0x249   : > { %vm2009_vm3 = vcmp.ge.f32.partialorder %v1986_v41, 0.0  ;;  %v2019_v31 = vmul.f32 0.1, %v1986_v41  ;;  %v2159_v3 = vsel %vm792_vm5, %v2156_v35, %v2158_v42  ;;  %v2188_v56 = vsel %vm816_vm4, %v2185_v1, %v2187_v21 }
 0x24a   : > { %2282 = vmatmul.f32.gmra.mxu0 %v2159_v3  ;;  %2329 = vmatmul.f32.gmra.mxu1 %v2188_v56  ;;  %v2057_v1 = vadd.s32 %v5823_v15, %v4621_v30  ;;  %v1950_v33 = vpop.f32.mrf.mxu3 }
 0x24b   : > { %v2029_v40 = vsel %vm2009_vm3, %v1986_v41, %v2019_v31 }
 0x24c   : > { %v2115_v17 = vsel %vm2085_vm8, %v2029_v40, 0.0  ;;  %vm2067_vm0 = vcmp.ge.s32.totalorder %v2057_v1, 0  ;;  %vm2077_vm1 = vcmp.lt.s32.totalorder %v2057_v1, 200 }
 0x24d   : > { %v3907_v24 = vsel %vm3619_vm9, %v2115_v17, 0  ;;  %vm2087_vm7 = vmand %vm2067_vm0, %vm2077_vm1 }
 0x24e   : > { %v1988_v36 = vpop.f32.mrf.mxu2  ;;  %v3948_v38 = vsel %vm3668_vm11, %v2029_v40, %v3907_v24 }
 0x24f   : > { %v1989_v39 = vadd.f32 %v1988_v36, %v1942_v45  ;;  %v2160_v43 = vrot.slane %v3948_v38, 1  ;;  %v2189_v34 = vrot.slane %v3948_v38, 2  ;;  %2241 = vmatmul.f32.gmra.mxu3 %v3948_v38 }
 0x251   : > { %vm2010_vm14 = vcmp.ge.f32.partialorder %v1989_v39, 0.0  ;;  %v2020_v44 = vmul.f32 0.1, %v1989_v39  ;;  %v2161_v12 = vsel %vm792_vm5, %v2158_v42, %v2160_v43  ;;  %v2190_v35 = vsel %vm816_vm4, %v2187_v21, %v2189_v34 }
 0x252   : > { %2285 = vmatmul.f32.gmra.mxu0 %v2161_v12  ;;  %2332 = vmatmul.f32.gmra.mxu1 %v2190_v35  ;;  %v2058_v42 = vadd.s32 %v5823_v15, %v4682_v49  ;;  %v1901_v21 = vadd.f32 %v5821_v57, %v5782_v5 }
 0x253   : > { %v2030_v20 = vsel %vm2010_vm14, %v1989_v39, %v2020_v44  ;;  %v2059_v39 = vadd.s32 %v5823_v15, %v4867_v8  ;;  %v1904_v44 = vadd.f32 %v5821_v57, %v5799_v22 }
 0x254   : > { %v2116_v47 = vsel %vm2086_vm15, %v2030_v20, 0.0  ;;  %v1948_v56 = vadd.f32 %v1947_v58, %v1901_v21  ;;  %vm2068_vm2 = vcmp.ge.s32.totalorder %v2058_v42, 0  ;;  %vm2078_vm3 = vcmp.lt.s32.totalorder %v2058_v42, 200 }
 0x255   : > { %v3911_v10 = vsel %vm3619_vm9, %v2116_v47, 0  ;;  %vm2088_vm10 = vmand %vm2068_vm2, %vm2078_vm3  ;;  %v1951_v1 = vadd.f32 %v1950_v33, %v1904_v44  ;;  %vm2069_vm13 = vcmp.ge.s32.totalorder %v2059_v39, 0  ;;  %vm2079_vm14 = vcmp.lt.s32.totalorder %v2059_v39, 200 }
 0x256   : > { %v1991_v7 = vpop.f32.mrf.mxu2  ;;  %v3952_v32 = vsel %vm3668_vm11, %v2030_v20, %v3911_v10  ;;  %vm5903_vm0 = vmand %vm2069_vm13, %vm2079_vm14  ;;  %v1907_v42 = vadd.f32 %v5821_v57, %v5810_v9  ;;  %v3516_v9 = vld [vmem:[%s6587_s3 + $0x470] sm:$0xff] }
 0x257   : > { %v1992_v48 = vadd.f32 %v1991_v7, %v1945_v60  ;;  %v2162_v50 = vrot.slane %v3952_v32, 1  ;;  %v2191_v14 = vrot.slane %v3952_v32, 2  ;;  %2244 = vmatmul.f32.gmra.mxu3 %v3952_v32  ;;  %v1953_v7 = vpop.f32.mrf.mxu3 }
 0x258   : > { %v1954_v33 = vadd.f32 %v1953_v7, %v1907_v42 }
 0x259   : > { %vm2011_vm12 = vcmp.ge.f32.partialorder %v1992_v48, 0.0  ;;  %v2021_v16 = vmul.f32 0.1, %v1992_v48  ;;  %v2163_v28 = vsel %vm792_vm5, %v2160_v43, %v2162_v50  ;;  %v2192_v41 = vsel %vm816_vm4, %v2189_v34, %v2191_v14  ;;  %v3485_v43 = vld [vmem:[%s6587_s3 + $0x378] sm:$0xff] }
 0x25a   : > { %2288 = vmatmul.f32.gmra.mxu0 %v2163_v28  ;;  %2335 = vmatmul.f32.gmra.mxu1 %v2192_v41  ;;  %v3501_v34 = vld [vmem:[%s6587_s3 + $0x3f8] sm:$0xff]  ;;  %v3500_v28 = vld [vmem:[%s6587_s3 + $0x3f0] sm:$0xff]  ;;  %v3483_v41 = vld [vmem:[%s6587_s3 + $0x368] sm:$0xff] }
 0x25b   : > { %v2031_v31 = vsel %vm2011_vm12, %v1992_v48, %v2021_v16  ;;  %2713 = vmatpush.msrb.mxu2 %v3485_v43  ;;  %2757 = vmatpush.msrb.mxu3 %v3501_v34  ;;  %v3484_v16 = vld [vmem:[%s6587_s3 + $0x370] sm:$0xff]  ;;  %v3497_v43 = vld [vmem:[%s6587_s3 + $0x3d8] sm:$0xff] }
 0x25c   : > { %v2117_v3 = vsel %vm2087_vm7, %v2031_v31, 0.0  ;;  %v3480_v34 = vld [vmem:[%s6587_s3 + $0x350] sm:$0xff] }
 0x25d   : > { %v3915_v52 = vsel %vm3619_vm9, %v2117_v3, 0  ;;  %2714 = vmatpush.msrb.mxu2 %v3484_v16  ;;  %2758 = vmatpush.msrb.mxu3 %v3500_v28  ;;  %v3499_v3 = vld [vmem:[%s6587_s3 + $0x3e8] sm:$0xff]  ;;  %v3477_v28 = vld [vmem:[%s6587_s3 + $0x338] sm:$0xff] }
 0x25e   : > { %v1994_v63 = vpop.f32.mrf.mxu2  ;;  %v3956_v40 = vsel %vm3668_vm11, %v2031_v31, %v3915_v52  ;;  %v3517_v31 = vld [vmem:[%s6587_s3 + $0x478] sm:$0xff]  ;;  %v3482_v52 = vld [vmem:[%s6587_s3 + $0x360] sm:$0xff] }
 0x25f   : > { %v1995_v17 = vadd.f32 %v1994_v63, %v1948_v56  ;;  %v2164_v45 = vrot.slane %v3956_v40, 1  ;;  %v2193_v24 = vrot.slane %v3956_v40, 2  ;;  %2247 = vmatmul.f32.gmra.mxu3 %v3956_v40  ;;  %2801 = vmatpush.msrb.mxu0 %v3517_v31  ;;  %v3498_v40 = vld [vmem:[%s6587_s3 + $0x3e0] sm:$0xff] }
 0x260   : > { %2715 = vmatpush.msrb.mxu2 %v3483_v41  ;;  %2759 = vmatpush.msrb.mxu3 %v3499_v3  ;;  %v3494_v31 = vld [vmem:[%s6587_s3 + $0x3c0] sm:$0xff]  ;;  %v3511_v3 = vld [vmem:[%s6587_s3 + $0x448] sm:$0xff] }
 0x261   : > { %vm2012_vm8 = vcmp.ge.f32.partialorder %v1995_v17, 0.0  ;;  %v2022_v36 = vmul.f32 0.1, %v1995_v17  ;;  %v2165_v5 = vsel %vm792_vm5, %v2162_v50, %v2164_v45  ;;  %v2194_v38 = vsel %vm816_vm4, %v2191_v14, %v2193_v24  ;;  %2802 = vmatpush.msrb.mxu0 %v3516_v9 }
 0x262   : > { %2291 = vmatmul.f32.gmra.mxu0 %v2165_v5  ;;  %2338 = vmatmul.f32.gmra.mxu1 %v2194_v38  ;;  %v2060_v14 = vadd.s32 %v5823_v15, %v4911_v53 }
 0x263   : > { %v2032_v12 = vsel %vm2012_vm8, %v1995_v17, %v2022_v36  ;;  %v3515_v17 = vld [vmem:[%s6587_s3 + $0x468] sm:$0xff]  ;;  %v3481_v36 = vld [vmem:[%s6587_s3 + $0x358] sm:$0xff]  ;;  %2716 = vmatpush.msrb.mxu2 %v3482_v52  ;;  %2760 = vmatpush.msrb.mxu3 %v3498_v40  ;;  %v3510_v40 = vld [vmem:[%s6587_s3 + $0x440] sm:$0xff] }
 0x264   : > { %v2118_v35 = vsel %vm2088_vm10, %v2032_v12, 0.0  ;;  %vm2070_vm1 = vcmp.ge.s32.totalorder %v2060_v14, 0  ;;  %vm2080_vm12 = vcmp.lt.s32.totalorder %v2060_v14, 200  ;;  %2803 = vmatpush.msrb.mxu0 %v3515_v17 }
 0x265   : > { %v3919_v19 = vsel %vm3619_vm9, %v2118_v35, 0  ;;  %vm5957_vm2 = vmand %vm2070_vm1, %vm2080_vm12  ;;  %2717 = vmatpush.msrb.mxu2 %v3481_v36  ;;  %2761 = vmatpush.msrb.mxu3 %v3497_v43  ;;  %v3509_v36 = vld [vmem:[%s6587_s3 + $0x438] sm:$0xff] }
 0x266   : > { %v1997_v20 = vpop.f32.mrf.mxu2  ;;  %v3960_v58 = vsel %vm3668_vm11, %v2032_v12, %v3919_v19  ;;  %v3514_v19 = vld [vmem:[%s6587_s3 + $0x460] sm:$0xff] }
 0x267   : > { %v1998_v47 = vadd.f32 %v1997_v20, %v1951_v1  ;;  %v2166_v60 = vrot.slane %v3960_v58, 1  ;;  %v2195_v10 = vrot.slane %v3960_v58, 2  ;;  %2250 = vmatmul.f32.gmra.mxu3 %v3960_v58  ;;  %v1956_v20 = vpop.f32.mrf.mxu3  ;;  %v2061_v58 = vadd.s32 %v5823_v15, %v4914_v54  ;;  %2718 = vmatpush.msrb.mxu2 %v3480_v34  ;;  %v3474_v1 = vld [vmem:[%s6587_s3 + $0x320] sm:$0xff] }
 0x268   : > { %2804 = vmatpush.msrb.mxu0 %v3514_v19  ;;  %v3508_v19 = vld [vmem:[%s6587_s3 + $0x430] sm:$0xff] }
 0x269   : > { %vm2013_vm15 = vcmp.ge.f32.partialorder %v1998_v47, 0.0  ;;  %v2023_v22 = vmul.f32 0.1, %v1998_v47  ;;  %v2167_v32 = vsel %vm792_vm5, %v2164_v45, %v2166_v60  ;;  %v2196_v48 = vsel %vm816_vm4, %v2193_v24, %v2195_v10 }
 0x26a   : > { %2294 = vmatmul.f32.gmra.mxu0 %v2167_v32  ;;  %2341 = vmatmul.f32.gmra.mxu1 %v2196_v48  ;;  %v3478_v32 = vld [vmem:[%s6587_s3 + $0x340] sm:$0xff]  ;;  %vm2071_vm3 = vcmp.ge.s32.totalorder %v2061_v58, 0  ;;  %vm2081_vm8 = vcmp.lt.s32.totalorder %v2061_v58, 200  ;;  %v3473_v58 = vld [vmem:[%s6587_s3 + $0x318] sm:$0xff] }
 0x26b   : > { %v2033_v21 = vsel %vm2013_vm15, %v1998_v47, %v2023_v22  ;;  %v3496_v47 = vld [vmem:[%s6587_s3 + $0x3d0] sm:$0xff]  ;;  %v3513_v22 = vld [vmem:[%s6587_s3 + $0x458] sm:$0xff]  ;;  %vm2091_vm13 = vmand %vm2071_vm3, %vm2081_vm8 }
 0x26c   : > { %v2119_v56 = vsel %vm5903_vm0, %v2033_v21, 0.0  ;;  %2762 = vmatpush.msrb.mxu3 %v3496_v47  ;;  %2805 = vmatpush.msrb.mxu0 %v3513_v22  ;;  %v3472_v47 = vld [vmem:[%s6587_s3 + $0x310] sm:$0xff]  ;;  %v3471_v22 = vld [vmem:[%s6587_s3 + $0x308] sm:$0xff] }
 0x26d   : > { %v3923_v63 = vsel %vm3619_vm9, %v2119_v56, 0 }
 0x26e   : > { %v2000_v45 = vpop.f32.mrf.mxu2  ;;  %v3964_v24 = vsel %vm3668_vm11, %v2033_v21, %v3923_v63  ;;  %v3493_v63 = vld [vmem:[%s6587_s3 + $0x3b8] sm:$0xff] }
 0x26f   : > { %v2001_v5 = vadd.f32 %v2000_v45, %v1954_v33  ;;  %v2168_v38 = vrot.slane %v3964_v24, 1  ;;  %v2197_v39 = vrot.slane %v3964_v24, 2  ;;  %2253 = vmatmul.f32.gmra.mxu3 %v3964_v24  ;;  %v3476_v33 = vld [vmem:[%s6587_s3 + $0x330] sm:$0xff]  ;;  %v3475_v45 = vld [vmem:[%s6587_s3 + $0x328] sm:$0xff] }
 0x271   : > { %vm2014_vm7 = vcmp.ge.f32.partialorder %v2001_v5, 0.0  ;;  %v2024_v44 = vmul.f32 0.1, %v2001_v5  ;;  %v2169_v12 = vsel %vm792_vm5, %v2166_v60, %v2168_v38  ;;  %v2198_v35 = vsel %vm816_vm4, %v2195_v10, %v2197_v39  ;;  %v3479_v60 = vld [vmem:[%s6587_s3 + $0x348] sm:$0xff] }
 0x272   : > { %2297 = vmatmul.f32.gmra.mxu0 %v2169_v12  ;;  %2344 = vmatmul.f32.gmra.mxu1 %v2198_v35  ;;  %v1910_v10 = vadd.f32 %v5821_v57, %v5816_v13  ;;  %v3495_v13 = vld [vmem:[%s6587_s3 + $0x3c8] sm:$0xff]  ;;  %v3512_v57 = vld [vmem:[%s6587_s3 + $0x450] sm:$0xff] }
 0x273   : > { %v2034_v7 = vsel %vm2014_vm7, %v2001_v5, %v2024_v44  ;;  %2719 = vmatpush.msrb.mxu2 %v3479_v60  ;;  %2763 = vmatpush.msrb.mxu3 %v3495_v13  ;;  %v3491_v44 = vld [vmem:[%s6587_s3 + $0x3a8] sm:$0xff]  ;;  %v3486_v13 = vld [vmem:[%s6587_s3 + $0x380] sm:$0xff] }
 0x274   : > { %v2120_v15 = vsel %vm5957_vm2, %v2034_v7, 0.0  ;;  %v1957_v48 = vadd.f32 %v1956_v20, %v1910_v10  ;;  %2806 = vmatpush.msrb.mxu0 %v3512_v57  ;;  %v3490_v20 = vld [vmem:[%s6587_s3 + $0x3a0] sm:$0xff]  ;;  %v3507_v60 = vld [vmem:[%s6587_s3 + $0x428] sm:$0xff]  ;;  %v3489_v10 = vld [vmem:[%s6587_s3 + $0x398] sm:$0xff] }
 0x275   : > { %v3927_v50 = vsel %vm3619_vm9, %v2120_v15, 0  ;;  %2720 = vmatpush.msrb.mxu2 %v3478_v32  ;;  %2764 = vmatpush.msrb.mxu3 %v3494_v31  ;;  %v3470_v15 = vld [vmem:[%s6587_s3 + $0x300] sm:$0xff]  ;;  %v3488_v32 = vld [vmem:[%s6587_s3 + $0x390] sm:$0xff] }
 0x276   : > { %v2003_v14 = vpop.f32.mrf.mxu2  ;;  %v3968_v16 = vsel %vm3668_vm11, %v2034_v7, %v3927_v50  ;;  %2807 = vmatpush.msrb.mxu0 %v3511_v3  ;;  %v3506_v7 = vld [vmem:[%s6587_s3 + $0x420] sm:$0xff]  ;;  %v3487_v50 = vld [vmem:[%s6587_s3 + $0x388] sm:$0xff]  ;;  %v3504_v57 = vld [vmem:[%s6587_s3 + $0x410] sm:$0xff] }
 0x277   : > { %v2004_v41 = vadd.f32 %v2003_v14, %v1957_v48  ;;  %v2170_v42 = vrot.slane %v3968_v16, 1  ;;  %v2199_v21 = vrot.slane %v3968_v16, 2  ;;  %2256 = vmatmul.f32.gmra.mxu3 %v3968_v16  ;;  %2721 = vmatpush.msrb.mxu2 %v3477_v28  ;;  %v3505_v48 = vld [vmem:[%s6587_s3 + $0x418] sm:$0xff]  ;;  %v3503_v14 = vld [vmem:[%s6587_s3 + $0x408] sm:$0xff]  ;;  %v6081_v16 = vstv %s2406_s9  ;;  %v6086_v28 = vld [vmem:[%s6590_s6 + $0x1] ss:$0 sm:$0xff] }
 0x278   : > { %2765 = vmatpush.msrb.mxu3 %v3493_v63  ;;  %2808 = vmatpush.msrb.mxu0 %v3510_v40  ;;  %v3502_v31 = vld [vmem:[%s6587_s3 + $0x400] sm:$0xff]  ;;  %v2423_v40 = vadd.s32 %v6081_v16, %v4593_v25  ;;  %s6492_s9 = scalar_lea.vmem [#allocation2], %s3360_s20 }
 0x279   : > { %vm2015_vm10 = vcmp.ge.f32.partialorder %v2004_v41, 0.0  ;;  %v2025_v56 = vmul.f32 0.1, %v2004_v41  ;;  %v2171_v52 = vsel %vm792_vm5, %v2168_v38, %v2170_v42  ;;  %v2200_v9 = vsel %vm816_vm4, %v2197_v39, %v2199_v21  ;;  %2722 = vmatpush.msrb.mxu2 %v3476_v33  ;;  %v3492_v38 = vld [vmem:[%s6587_s3 + $0x3b0] sm:$0xff] }
 0x27a   : > { %2300 = vmatmul.f32.gmra.mxu0 %v2171_v52  ;;  %2347 = vmatmul.f32.gmra.mxu1 %v2200_v9  ;;  %vm2433_vm1 = vcmp.ge.s32.totalorder %v2423_v40, 0  ;;  %vm2443_vm12 = vcmp.lt.s32.totalorder %v2423_v40, 200 }
 0x27b   : > { %v2035_v17 = vsel %vm2015_vm10, %v2004_v41, %v2025_v56  ;;  %2723 = vmatpush.msrb.mxu2 %v3475_v45  ;;  %2809 = vmatpush.msrb.mxu0 %v3509_v36  ;;  %vm2453_vm2 = vmand %vm2433_vm1, %vm2443_vm12 }
 0x27c   : > { %v2121_v24 = vsel %vm2091_vm13, %v2035_v17, 0.0  ;;  %2766 = vmatpush.msrb.mxu3 %v3492_v38 }
 0x27d   : > { %v3931_v5 = vsel %vm3619_vm9, %v2121_v24, 0  ;;  %2724 = vmatpush.msrb.mxu2 %v3474_v1  ;;  %2810 = vmatpush.msrb.mxu0 %v3508_v19 }
 0x27e   : > { %v3972_v39 = vsel %vm3668_vm11, %v2035_v17, %v3931_v5  ;;  %2767 = vmatpush.msrb.mxu3 %v3491_v44 }
 0x27f   : > { %v2172_v43 = vrot.slane %v3972_v39, 1  ;;  %v2201_v34 = vrot.slane %v3972_v39, 2  ;;  %2259 = vmatmul.f32.gmra.mxu3 %v3972_v39  ;;  %2725 = vmatpush.msrb.mxu2 %v3473_v58 }
 0x280   : > { %2768 = vmatpush.msrb.mxu3 %v3490_v20  ;;  %2811 = vmatpush.msrb.mxu0 %v3507_v60 }
 0x281   : > { %v2173_v12 = vsel %vm792_vm5, %v2170_v42, %v2172_v43  ;;  %v2202_v35 = vsel %vm816_vm4, %v2199_v21, %v2201_v34  ;;  %2726 = vmatpush.msrb.mxu2 %v3472_v47  ;;  %v2422_v42 = vadd.s32 %v6081_v16, %v4561_v18 }
 0x282   : > { %2303 = vmatmul.f32.gmra.mxu0 %v2173_v12  ;;  %2350 = vmatmul.f32.gmra.mxu1 %v2202_v35  ;;  %v2424_v35 = vadd.s32 %v6081_v16, %v4596_v26 }
 0x283   : > { %2769 = vmatpush.msrb.mxu3 %v3489_v10  ;;  %2727 = vmatpush.msrb.mxu2 %v3471_v22  ;;  %vm2432_vm14 = vcmp.ge.s32.totalorder %v2422_v42, 0  ;;  %vm2442_vm15 = vcmp.lt.s32.totalorder %v2422_v42, 200 }
 0x284   : > { %2812 = vmatpush.msrb.mxu0 %v3506_v7  ;;  %vm2452_vm0 = vmand %vm2432_vm14, %vm2442_vm15  ;;  %vm2434_vm3 = vcmp.ge.s32.totalorder %v2424_v35, 0  ;;  %vm2444_vm8 = vcmp.lt.s32.totalorder %v2424_v35, 200  ;;  %vm2656_vm14 = vcmask 1042432  }
 0x285   : > { %2728 = vmatpush.msrb.mxu2 %v3470_v15  ;;  %2770 = vmatpush.msrb.mxu3 %v3488_v32  ;;  %vm2454_vm13 = vmand %vm2434_vm3, %vm2444_vm8 }
 0x286   : > { %2813 = vmatpush.msrb.mxu0 %v3505_v48 }
 0x287   : > { %2771 = vmatpush.msrb.mxu3 %v3487_v50 }
 0x288   : > { %2814 = vmatpush.msrb.mxu0 %v3504_v57 }
 0x289   : > { %2772 = vmatpush.msrb.mxu3 %v3486_v13 }
 0x28a   : > { %2306 = vmatmul.f32.gmra.mxu0 %v2172_v43  ;;  %2353 = vmatmul.f32.gmra.mxu1 %v2201_v34 }
 0x28b   : > { %2815 = vmatpush.msrb.mxu0 %v3503_v14 }
 0x28d   : > { %2816 = vmatpush.msrb.mxu0 %v3502_v31 }
 0x2ba   : > { %v2233_v41 = vpop.f32.mrf.mxu3 }
 0x2bb   : > { %v2234_v21 = vadd.f32 %v6086_v28, %v2233_v41  ;;  %v2425_v41 = vadd.s32 %v6081_v16, %v4599_v27 }
 0x2bd   : > { %vm2435_vm15 = vcmp.ge.s32.totalorder %v2425_v41, 0 }
 0x2bf   : > { %v2280_v3 = vpop.f32.mrf.mxu0  ;;  %v2327_v56 = vpop.f32.mrf.mxu1 }
 0x2c0   : > { %v2281_v52 = vadd.f32 %v2280_v3, %v2234_v21 }
 0x2c2   : > { %v2328_v9 = vadd.f32 %v2327_v56, %v2281_v52  ;;  %v2236_v33 = vpop.f32.mrf.mxu3 }
 0x2c3   : > { %v2237_v45 = vadd.f32 %v6086_v28, %v2236_v33 }
 0x2c4   : > { %v2396_v63 = vadd.f32 %v5474_v37, %v2328_v9 }
 0x2c6   : > { %v2482_v17 = vsel %vm2452_vm0, %v2396_v63, 0.0  ;;  %vm2445_vm0 = vcmp.lt.s32.totalorder %v2425_v41, 200 }
 0x2c7   : > { %v3976_v24 = vsel %vm3619_vm9, %v2482_v17, 0  ;;  %v2283_v36 = vpop.f32.mrf.mxu0  ;;  %v2330_v5 = vpop.f32.mrf.mxu1  ;;  %vm2455_vm12 = vmand %vm2435_vm15, %vm2445_vm0 }
 0x2c8   : > { %v4017_v38 = vsel %vm3668_vm11, %v2396_v63, %v3976_v24  ;;  %v2284_v39 = vadd.f32 %v2283_v36, %v2237_v45  ;;  %v2426_v24 = vadd.s32 %v6081_v16, %v4618_v29 }
 0x2c9   : > { %vm2617_vm7 = vcmp.ge.f32.partialorder %v4017_v38, 0.0  ;;  %v2627_v43 = vmul.f32 0.1, %v4017_v38  ;;  %v3165_v22 = vrot.slane %v4017_v38, 6 }
 0x2ca   : > { %v2331_v37 = vadd.f32 %v2330_v5, %v2284_v39  ;;  %v2239_v34 = vpop.f32.mrf.mxu3 }
 0x2cb   : > { %v2637_v44 = vsel %vm2617_vm7, %v4017_v38, %v2627_v43  ;;  %v2240_v19 = vadd.f32 %v6086_v28, %v2239_v34  ;;  %vm2436_vm7 = vcmp.ge.s32.totalorder %v2426_v24, 0 }
 0x2cc   : > { %v2397_v12 = vadd.f32 %v5494_v4, %v2331_v37  ;;  %2729 = vmatmul.f32.vlgmr.msrb.gmra.mxu2 %v2637_v44  ;;  %v2657_v13 = vrot.slane %v2637_v44, 5 }
 0x2ce   : > { %v2483_v1 = vsel %vm2453_vm2, %v2397_v12, 0.0  ;;  %vm2446_vm2 = vcmp.lt.s32.totalorder %v2426_v24, 200  ;;  %v2428_v24 = vadd.s32 %v6081_v16, %v4682_v49 }
 0x2cf   : > { %v3980_v20 = vsel %vm3619_vm9, %v2483_v1, 0  ;;  %v2286_v58 = vpop.f32.mrf.mxu0  ;;  %v2333_v47 = vpop.f32.mrf.mxu1  ;;  %vm2456_vm8 = vmand %vm2436_vm7, %vm2446_vm2 }
 0x2d0   : > { %v2287_v60 = vadd.f32 %v2286_v58, %v2240_v19  ;;  %v4021_v10 = vsel %vm3668_vm11, %v2397_v12, %v3980_v20 }
 0x2d1   : > { %vm2618_vm10 = vcmp.ge.f32.partialorder %v4021_v10, 0.0  ;;  %v2628_v4 = vmul.f32 0.1, %v4021_v10  ;;  %v3166_v7 = vrot.slane %v4021_v10, 6 }
 0x2d2   : > { %v2334_v15 = vadd.f32 %v2333_v47, %v2287_v60  ;;  %v2242_v32 = vpop.f32.mrf.mxu3 }
 0x2d3   : > { %v2638_v48 = vsel %vm2618_vm10, %v4021_v10, %v2628_v4  ;;  %v6111_v50 = vsel %vm1488_vm6, %v3165_v22, %v3166_v7  ;;  %v2243_v21 = vadd.f32 %v6086_v28, %v2242_v32 }
 0x2d4   : > { %v2398_v57 = vadd.f32 %v5516_v6, %v2334_v15  ;;  %v2658_v14 = vrot.slane %v2638_v48, 5  ;;  %2732 = vmatmul.f32.gmra.mxu2 %v2638_v48  ;;  %v2684_v5 = vrot.slane %v2638_v48, 2  ;;  %v2427_v48 = vadd.s32 %v6081_v16, %v4621_v30 }
 0x2d6   : > { %v2484_v42 = vsel %vm2454_vm13, %v2398_v57, 0.0  ;;  %v2659_v31 = vsel %vm2656_vm14, %v2657_v13, %v2658_v14  ;;  %vm2437_vm10 = vcmp.ge.s32.totalorder %v2427_v48, 0  ;;  %vm2447_vm13 = vcmp.lt.s32.totalorder %v2427_v48, 200 }
 0x2d7   : > { %v3984_v3 = vsel %vm3619_vm9, %v2484_v42, 0  ;;  %v2289_v56 = vpop.f32.mrf.mxu0  ;;  %v2336_v52 = vpop.f32.mrf.mxu1  ;;  %2773 = vmatmul.f32.vlgmr.msrb.gmra.mxu3 %v2659_v31  ;;  %vm2457_vm0 = vmand %vm2437_vm10, %vm2447_vm13 }
 0x2d8   : > { %v2290_v9 = vadd.f32 %v2289_v56, %v2243_v21  ;;  %v4025_v6 = vsel %vm3668_vm11, %v2398_v57, %v3984_v3 }
 0x2d9   : > { %vm2619_vm1 = vcmp.ge.f32.partialorder %v4025_v6, 0.0  ;;  %v2629_v33 = vmul.f32 0.1, %v4025_v6  ;;  %v3168_v63 = vrot.slane %v4025_v6, 6 }
 0x2da   : > { %v2337_v40 = vadd.f32 %v2336_v52, %v2290_v9  ;;  %v2245_v17 = vpop.f32.mrf.mxu3 }
 0x2db   : > { %v2639_v45 = vsel %vm2619_vm1, %v4025_v6, %v2629_v33  ;;  %v6125_v36 = vsel %vm1488_vm6, %v3166_v7, %v3168_v63  ;;  %v2246_v34 = vadd.f32 %v6086_v28, %v2245_v17  ;;  %vm2438_vm1 = vcmp.ge.s32.totalorder %v2428_v24, 0 }
 0x2dc   : > { %v2399_v38 = vadd.f32 %v5535_v11, %v2337_v40  ;;  %v2660_v39 = vrot.slane %v2639_v45, 5  ;;  %v2685_v43 = vrot.slane %v2639_v45, 2  ;;  %2735 = vmatmul.f32.gmra.mxu2 %v2639_v45 }
 0x2de   : > { %v2485_v37 = vsel %vm2455_vm12, %v2399_v38, 0.0  ;;  %v2661_v44 = vsel %vm2656_vm14, %v2658_v14, %v2660_v39  ;;  %v2686_v12 = vsel %vm816_vm4, %v2684_v5, %v2685_v43  ;;  %vm2448_vm12 = vcmp.lt.s32.totalorder %v2428_v24, 200 }
 0x2df   : > { %v3988_v35 = vsel %vm3619_vm9, %v2485_v37, 0  ;;  %v2292_v1 = vpop.f32.mrf.mxu0  ;;  %v2339_v19 = vpop.f32.mrf.mxu1  ;;  %2776 = vmatmul.f32.gmra.mxu3 %v2661_v44  ;;  %2817 = vmatmul.f32.vlgmr.msrb.gmra.mxu0 %v2686_v12  ;;  %vm2458_vm2 = vmand %vm2438_vm1, %vm2448_vm12 }
 0x2e0   : > { %v2293_v20 = vadd.f32 %v2292_v1, %v2246_v34  ;;  %v4029_v11 = vsel %vm3668_vm11, %v2399_v38, %v3988_v35 }
 0x2e1   : > { %vm2620_vm3 = vcmp.ge.f32.partialorder %v4029_v11, 0.0  ;;  %v2630_v58 = vmul.f32 0.1, %v4029_v11  ;;  %v3170_v47 = vrot.slane %v4029_v11, 6 }
 0x2e2   : > { %v2340_v60 = vadd.f32 %v2339_v19, %v2293_v20  ;;  %v2248_v10 = vpop.f32.mrf.mxu3  ;;  %v3534_v19 = vld [vmem:[%s6589_s5 + $0x378] sm:$0xff] }
 0x2e3   : > { %v2640_v4 = vsel %vm2620_vm3, %v4029_v11, %v2630_v58  ;;  %v6136_v7 = vsel %vm1488_vm6, %v3168_v63, %v3170_v47  ;;  %v2249_v57 = vadd.f32 %v6086_v28, %v2248_v10  ;;  %3033 = vmatpush.msrb.mxu1 %v3534_v19  ;;  %3583 = vmatpush.msra.mxu3 %v3534_v19 }
 0x2e4   : > { %v2400_v22 = vadd.f32 %v5557_v51, %v2340_v60  ;;  %v2662_v15 = vrot.slane %v2640_v4, 5  ;;  %v2687_v32 = vrot.slane %v2640_v4, 2  ;;  %2738 = vmatmul.f32.gmra.mxu2 %v2640_v4 }
 0x2e6   : > { %v2486_v13 = vsel %vm2456_vm8, %v2400_v22, 0.0  ;;  %v2663_v14 = vsel %vm2656_vm14, %v2660_v39, %v2662_v15  ;;  %v2688_v41 = vsel %vm816_vm4, %v2685_v43, %v2687_v32 }
 0x2e7   : > { %v3992_v42 = vsel %vm3619_vm9, %v2486_v13, 0  ;;  %v2295_v21 = vpop.f32.mrf.mxu0  ;;  %v2342_v31 = vpop.f32.mrf.mxu1  ;;  %2779 = vmatmul.f32.gmra.mxu3 %v2663_v14  ;;  %2820 = vmatmul.f32.gmra.mxu0 %v2688_v41 }
 0x2e8   : > { %v2296_v51 = vadd.f32 %v2295_v21, %v2249_v57  ;;  %v4033_v3 = vsel %vm3668_vm11, %v2400_v22, %v3992_v42  ;;  %v2429_v22 = vadd.s32 %v6081_v16, %v4867_v8 }
 0x2e9   : > { %vm2621_vm15 = vcmp.ge.f32.partialorder %v4033_v3, 0.0  ;;  %v2631_v56 = vmul.f32 0.1, %v4033_v3  ;;  %v3172_v52 = vrot.slane %v4033_v3, 6 }
 0x2ea   : > { %v2343_v9 = vadd.f32 %v2342_v31, %v2296_v51  ;;  %v2251_v6 = vpop.f32.mrf.mxu3  ;;  %vm2439_vm3 = vcmp.ge.s32.totalorder %v2429_v22, 0  ;;  %vm2449_vm8 = vcmp.lt.s32.totalorder %v2429_v22, 200 }
 0x2eb   : > { %v2641_v33 = vsel %vm2621_vm15, %v4033_v3, %v2631_v56  ;;  %v6149_v63 = vsel %vm1488_vm6, %v3170_v47, %v3172_v52  ;;  %v2252_v38 = vadd.f32 %v6086_v28, %v2251_v6  ;;  %vm2459_vm13 = vmand %vm2439_vm3, %vm2449_vm8 }
 0x2ec   : > { %v2401_v40 = vadd.f32 %v5579_v23, %v2343_v9  ;;  %v2664_v17 = vrot.slane %v2641_v33, 5  ;;  %v2689_v45 = vrot.slane %v2641_v33, 2  ;;  %2741 = vmatmul.f32.gmra.mxu2 %v2641_v33 }
 0x2ee   : > { %v2487_v5 = vsel %vm2457_vm0, %v2401_v40, 0.0  ;;  %v2665_v39 = vsel %vm2656_vm14, %v2662_v15, %v2664_v17  ;;  %v2690_v43 = vsel %vm816_vm4, %v2687_v32, %v2689_v45 }
 0x2ef   : > { %v3996_v37 = vsel %vm3619_vm9, %v2487_v5, 0  ;;  %v2298_v34 = vpop.f32.mrf.mxu0  ;;  %v2345_v44 = vpop.f32.mrf.mxu1  ;;  %2782 = vmatmul.f32.gmra.mxu3 %v2665_v39  ;;  %2823 = vmatmul.f32.gmra.mxu0 %v2690_v43 }
 0x2f0   : > { %v2299_v23 = vadd.f32 %v2298_v34, %v2252_v38  ;;  %v4037_v12 = vsel %vm3668_vm11, %v2401_v40, %v3996_v37  ;;  %v3531_v34 = vld [vmem:[%s6589_s5 + $0x360] sm:$0xff] }
 0x2f1   : > { %vm2622_vm7 = vcmp.ge.f32.partialorder %v4037_v12, 0.0  ;;  %v2632_v35 = vmul.f32 0.1, %v4037_v12  ;;  %v3174_v1 = vrot.slane %v4037_v12, 6 }
 0x2f2   : > { %v2346_v20 = vadd.f32 %v2345_v44, %v2299_v23  ;;  %v2254_v11 = vpop.f32.mrf.mxu3 }
 0x2f3   : > { %v2642_v58 = vsel %vm2622_vm7, %v4037_v12, %v2632_v35  ;;  %v6165_v47 = vsel %vm1488_vm6, %v3172_v52, %v3174_v1  ;;  %v2255_v32 = vadd.f32 %v6086_v28, %v2254_v11 }
 0x2f4   : > { %v2402_v60 = vadd.f32 %v5595_v59, %v2346_v20  ;;  %v2666_v10 = vrot.slane %v2642_v58, 5  ;;  %v2691_v4 = vrot.slane %v2642_v58, 2  ;;  %2744 = vmatmul.f32.gmra.mxu2 %v2642_v58  ;;  %v3533_v59 = vld [vmem:[%s6589_s5 + $0x370] sm:$0xff]  ;;  %v3563_v20 = vld [vmem:[%s6589_s5 + $0x460] sm:$0xff] }
 0x2f5   : > { %3034 = vmatpush.msrb.mxu1 %v3533_v59  ;;  %3584 = vmatpush.msra.mxu3 %v3533_v59 }
 0x2f6   : > { %v2488_v15 = vsel %vm2458_vm2, %v2402_v60, 0.0  ;;  %v2667_v48 = vsel %vm2656_vm14, %v2664_v17, %v2666_v10  ;;  %v2692_v13 = vsel %vm816_vm4, %v2689_v45, %v2691_v4  ;;  %v2430_v17 = vadd.s32 %v6081_v16, %v4911_v53 }
 0x2f7   : > { %v4000_v57 = vsel %vm3619_vm9, %v2488_v15, 0  ;;  %v2301_v14 = vpop.f32.mrf.mxu0  ;;  %v2348_v41 = vpop.f32.mrf.mxu1  ;;  %2785 = vmatmul.f32.gmra.mxu3 %v2667_v48  ;;  %2826 = vmatmul.f32.gmra.mxu0 %v2692_v13  ;;  %v3528_v48 = vld [vmem:[%s6589_s5 + $0x348] sm:$0xff] }
 0x2f8   : > { %v2302_v42 = vadd.f32 %v2301_v14, %v2255_v32  ;;  %v4041_v21 = vsel %vm3668_vm11, %v2402_v60, %v4000_v57  ;;  %vm2440_vm15 = vcmp.ge.s32.totalorder %v2430_v17, 0  ;;  %vm2450_vm0 = vcmp.lt.s32.totalorder %v2430_v17, 200  ;;  %v3529_v60 = vld [vmem:[%s6589_s5 + $0x350] sm:$0xff] }
 0x2f9   : > { %vm2623_vm10 = vcmp.ge.f32.partialorder %v4041_v21, 0.0  ;;  %v2633_v31 = vmul.f32 0.1, %v4041_v21  ;;  %v3176_v51 = vrot.slane %v4041_v21, 6  ;;  %vm6202_vm12 = vmand %vm2440_vm15, %vm2450_vm0  ;;  %v2431_v32 = vadd.s32 %v6081_v16, %v4914_v54  ;;  %v3527_v16 = vld [vmem:[%s6589_s5 + $0x340] sm:$0xff] }
 0x2fa   : > { %v2349_v3 = vadd.f32 %v2348_v41, %v2302_v42  ;;  %v2257_v56 = vpop.f32.mrf.mxu3 }
 0x2fb   : > { %v2643_v52 = vsel %vm2623_vm10, %v4041_v21, %v2633_v31  ;;  %v6181_v9 = vsel %vm1488_vm6, %v3174_v1, %v3176_v51  ;;  %v2258_v24 = vadd.f32 %v6086_v28, %v2257_v56  ;;  %v3530_v1 = vld [vmem:[%s6589_s5 + $0x358] sm:$0xff]  ;;  %vm2441_vm7 = vcmp.ge.s32.totalorder %v2431_v32, 0  ;;  %v3543_v56 = vld [vmem:[%s6589_s5 + $0x3c0] sm:$0xff] }
 0x2fc   : > { %v2403_v6 = vadd.f32 %v5611_v62, %v2349_v3  ;;  %v2668_v33 = vrot.slane %v2643_v52, 5  ;;  %v2693_v40 = vrot.slane %v2643_v52, 2  ;;  %2747 = vmatmul.f32.gmra.mxu2 %v2643_v52  ;;  %v3532_v62 = vld [vmem:[%s6589_s5 + $0x368] sm:$0xff]  ;;  %vm2451_vm2 = vcmp.lt.s32.totalorder %v2431_v32, 200  ;;  %v3519_v32 = vld [vmem:[%s6589_s5 + $0x300] sm:$0xff] }
 0x2fd   : > { %3035 = vmatpush.msrb.mxu1 %v3532_v62  ;;  %3585 = vmatpush.msra.mxu3 %v3532_v62  ;;  %vm6233_vm8 = vmand %vm2441_vm7, %vm2451_vm2 }
 0x2fe   : > { %v2489_v45 = vsel %vm2459_vm13, %v2403_v6, 0.0  ;;  %v2669_v5 = vsel %vm2656_vm14, %v2666_v10, %v2668_v33  ;;  %v2694_v38 = vsel %vm816_vm4, %v2691_v4, %v2693_v40 }
 0x2ff   : > { %v4004_v39 = vsel %vm3619_vm9, %v2489_v45, 0  ;;  %v2304_v43 = vpop.f32.mrf.mxu0  ;;  %v2351_v37 = vpop.f32.mrf.mxu1  ;;  %2788 = vmatmul.f32.gmra.mxu3 %v2669_v5  ;;  %2829 = vmatmul.f32.gmra.mxu0 %v2694_v38 }
 0x300   : > { %v2305_v44 = vadd.f32 %v2304_v43, %v2258_v24  ;;  %v4045_v23 = vsel %vm3668_vm11, %v2403_v6, %v4004_v39  ;;  %3036 = vmatpush.msrb.mxu1 %v3531_v34  ;;  %3586 = vmatpush.msra.mxu3 %v3531_v34  ;;  %v3525_v6 = vld [vmem:[%s6589_s5 + $0x330] sm:$0xff]  ;;  %v3524_v24 = vld [vmem:[%s6589_s5 + $0x328] sm:$0xff] }
 0x301   : > { %vm2624_vm1 = vcmp.ge.f32.partialorder %v4045_v23, 0.0  ;;  %v2634_v12 = vmul.f32 0.1, %v4045_v23  ;;  %v3178_v35 = vrot.slane %v4045_v23, 6 }
 0x302   : > { %v2352_v19 = vadd.f32 %v2351_v37, %v2305_v44  ;;  %v2260_v11 = vpop.f32.mrf.mxu3  ;;  %3037 = vmatpush.msrb.mxu1 %v3530_v1  ;;  %3587 = vmatpush.msra.mxu3 %v3530_v1  ;;  %v3521_v1 = vld [vmem:[%s6589_s5 + $0x310] sm:$0xff] }
 0x303   : > { %v2644_v58 = vsel %vm2624_vm1, %v4045_v23, %v2634_v12  ;;  %v6210_v10 = vsel %vm1488_vm6, %v3176_v51, %v3178_v35  ;;  %v2261_v57 = vadd.f32 %v6086_v28, %v2260_v11  ;;  %v3526_v51 = vld [vmem:[%s6589_s5 + $0x338] sm:$0xff] }
 0x304   : > { %v2404_v4 = vadd.f32 %v5635_v61, %v2352_v19  ;;  %v2670_v22 = vrot.slane %v2644_v58, 5  ;;  %v2695_v15 = vrot.slane %v2644_v58, 2  ;;  %2750 = vmatmul.f32.gmra.mxu2 %v2644_v58  ;;  %3038 = vmatpush.msrb.mxu1 %v3529_v60  ;;  %v3522_v23 = vld [vmem:[%s6589_s5 + $0x318] sm:$0xff]  ;;  %v3564_v19 = vld [vmem:[%s6589_s5 + $0x468] sm:$0xff] }
 0x305   : > { %3588 = vmatpush.msra.mxu3 %v3529_v60  ;;  %v3566_v12 = vld [vmem:[%s6589_s5 + $0x478] sm:$0xff]  ;;  %v3520_v58 = vld [vmem:[%s6589_s5 + $0x308] sm:$0xff]  ;;  %v3561_v60 = vld [vmem:[%s6589_s5 + $0x450] sm:$0xff] }
 0x306   : > { %v2490_v13 = vsel %vm6202_vm12, %v2404_v4, 0.0  ;;  %v2671_v14 = vsel %vm2656_vm14, %v2668_v33, %v2670_v22  ;;  %v2696_v61 = vsel %vm816_vm4, %v2693_v40, %v2695_v15  ;;  %3039 = vmatpush.msrb.mxu1 %v3528_v48  ;;  %3115 = vmatpush.msra.mxu0 %v3566_v12  ;;  %v3562_v11 = vld [vmem:[%s6589_s5 + $0x458] sm:$0xff] }
 0x307   : > { %v4008_v41 = vsel %vm3619_vm9, %v2490_v13, 0  ;;  %v2307_v54 = vpop.f32.mrf.mxu0  ;;  %2791 = vmatmul.f32.gmra.mxu3 %v2671_v14  ;;  %2832 = vmatmul.f32.gmra.mxu0 %v2696_v61  ;;  %v2354_v42 = vpop.f32.mrf.mxu1  ;;  %v3556_v13 = vld [vmem:[%s6589_s5 + $0x428] sm:$0xff]  ;;  %v3555_v14 = vld [vmem:[%s6589_s5 + $0x420] sm:$0xff]  ;;  %v3549_v61 = vld [vmem:[%s6589_s5 + $0x3f0] sm:$0xff] }
 0x308   : > { %v2308_v59 = vadd.f32 %v2307_v54, %v2261_v57  ;;  %v4049_v28 = vsel %vm3668_vm11, %v2404_v4, %v4008_v41  ;;  %3040 = vmatpush.msrb.mxu1 %v3527_v16  ;;  %3589 = vmatpush.msra.mxu3 %v3528_v48  ;;  %v3560_v4 = vld [vmem:[%s6589_s5 + $0x448] sm:$0xff]  ;;  %v3557_v48 = vld [vmem:[%s6589_s5 + $0x430] sm:$0xff]  ;;  %v3550_v57 = vld [vmem:[%s6589_s5 + $0x3f8] sm:$0xff] }
 0x309   : > { %vm2625_vm3 = vcmp.ge.f32.partialorder %v4049_v28, 0.0  ;;  %v2635_v21 = vmul.f32 0.1, %v4049_v28  ;;  %v3180_v31 = vrot.slane %v4049_v28, 6  ;;  %3599 = vmatpush.msra.mxu2 %v3566_v12  ;;  %v3548_v41 = vld [vmem:[%s6589_s5 + $0x3e8] sm:$0xff]  ;;  %v3554_v54 = vld [vmem:[%s6589_s5 + $0x418] sm:$0xff] }
 0x30a   : > { %v2355_v3 = vadd.f32 %v2354_v42, %v2308_v59  ;;  %3041 = vmatpush.msrb.mxu1 %v3526_v51  ;;  %3590 = vmatpush.msra.mxu3 %v3527_v16  ;;  %v3547_v16 = vld [vmem:[%s6589_s5 + $0x3e0] sm:$0xff]  ;;  %v3553_v59 = vld [vmem:[%s6589_s5 + $0x410] sm:$0xff]  ;;  %v3546_v42 = vld [vmem:[%s6589_s5 + $0x3d8] sm:$0xff] }
 0x30b   : > { %v2645_v52 = vsel %vm2625_vm3, %v4049_v28, %v2635_v21  ;;  %v6241_v33 = vsel %vm1488_vm6, %v3178_v35, %v3180_v31  ;;  %v3565_v35 = vld [vmem:[%s6589_s5 + $0x470] sm:$0xff]  ;;  %v3552_v28 = vld [vmem:[%s6589_s5 + $0x408] sm:$0xff]  ;;  %v3551_v31 = vld [vmem:[%s6589_s5 + $0x400] sm:$0xff] }
 0x30c   : > { %v2405_v40 = vadd.f32 %v2384_v2, %v2355_v3  ;;  %v2672_v17 = vrot.slane %v2645_v52, 5  ;;  %v2697_v45 = vrot.slane %v2645_v52, 2  ;;  %2753 = vmatmul.f32.gmra.mxu2 %v2645_v52  ;;  %3042 = vmatpush.msrb.mxu1 %v3525_v6  ;;  %v3523_v2 = vld [vmem:[%s6589_s5 + $0x320] sm:$0xff]  ;;  %v3544_v3 = vld [vmem:[%s6589_s5 + $0x3c8] sm:$0xff] }
 0x30d   : > { %3591 = vmatpush.msra.mxu3 %v3526_v51  ;;  %3116 = vmatpush.msra.mxu0 %v3565_v35  ;;  %v3545_v51 = vld [vmem:[%s6589_s5 + $0x3d0] sm:$0xff]  ;;  %v6348_v52 = vld [vmem:[%s6588_s4 + $0x2] ss:$0 sm:$0xff] }
 0x30e   : > { %v2491_v5 = vsel %vm6233_vm8, %v2405_v40, 0.0  ;;  %v2673_v38 = vsel %vm2656_vm14, %v2670_v22, %v2672_v17  ;;  %v2698_v39 = vsel %vm816_vm4, %v2695_v15, %v2697_v45  ;;  %3043 = vmatpush.msrb.mxu1 %v3524_v24  ;;  %3600 = vmatpush.msra.mxu2 %v3565_v35  ;;  %v3559_v22 = vld [vmem:[%s6589_s5 + $0x440] sm:$0xff]  ;;  %v3558_v15 = vld [vmem:[%s6589_s5 + $0x438] sm:$0xff] }
 0x30f   : > { %v4012_v0 = vsel %vm3619_vm9, %v2491_v5, 0  ;;  %2794 = vmatmul.f32.gmra.mxu3 %v2673_v38  ;;  %2835 = vmatmul.f32.gmra.mxu0 %v2698_v39  ;;  %v3540_v5 = vld [vmem:[%s6589_s5 + $0x3a8] sm:$0xff] }
 0x310   : > { %v4053_v43 = vsel %vm3668_vm11, %v2405_v40, %v4012_v0  ;;  %3044 = vmatpush.msrb.mxu1 %v3523_v2  ;;  %3592 = vmatpush.msra.mxu3 %v3525_v6  ;;  %v6350_v6 = vstv %s2872_s12  ;;  %v3542_v40 = vld [vmem:[%s6589_s5 + $0x3b8] sm:$0xff] }
 0x311   : > { %v2636_v37 = vmul.f32 0.1, %v4053_v43  ;;  %vm2626_vm6 = vcmp.ge.f32.partialorder %v4053_v43, 0.0  ;;  %3117 = vmatpush.msra.mxu0 %v3564_v19  ;;  %3601 = vmatpush.msra.mxu2 %v3564_v19 }
 0x312   : > { %3593 = vmatpush.msra.mxu3 %v3524_v24  ;;  %3045 = vmatpush.msrb.mxu1 %v3522_v23  ;;  %v3541_v24 = vld [vmem:[%s6589_s5 + $0x3b0] sm:$0xff] }
 0x313   : > { %v2646_v62 = vsel %vm2626_vm6, %v4053_v43, %v2636_v37  ;;  %3118 = vmatpush.msra.mxu0 %v3563_v20  ;;  %3602 = vmatpush.msra.mxu2 %v3563_v20  ;;  %v3538_v37 = vld [vmem:[%s6589_s5 + $0x398] sm:$0xff]  ;;  %v3536_v20 = vld [vmem:[%s6589_s5 + $0x388] sm:$0xff] }
 0x314   : > { %v2699_v34 = vrot.slane %v2646_v62, 2  ;;  %3594 = vmatpush.msra.mxu3 %v3523_v2  ;;  %3046 = vmatpush.msrb.mxu1 %v3521_v1  ;;  %v3539_v2 = vld [vmem:[%s6589_s5 + $0x3a0] sm:$0xff] }
 0x315   : > { %3119 = vmatpush.msra.mxu0 %v3562_v11  ;;  %3603 = vmatpush.msra.mxu2 %v3562_v11 }
 0x316   : > { %v2700_v44 = vsel %vm816_vm4, %v2697_v45, %v2699_v34  ;;  %3595 = vmatpush.msra.mxu3 %v3522_v23  ;;  %3047 = vmatpush.msrb.mxu1 %v3520_v58  ;;  %v2887_v45 = vadd.s32 %v6350_v6, %v4561_v18  ;;  %v3537_v23 = vld [vmem:[%s6589_s5 + $0x390] sm:$0xff] }
 0x317   : > { %2797 = vmatmul.f32.gmra.mxu3 %v2672_v17  ;;  %2838 = vmatmul.f32.gmra.mxu0 %v2700_v44  ;;  %v2888_v44 = vadd.s32 %v6350_v6, %v4593_v25  ;;  %v3535_v25 = vld [vmem:[%s6589_s5 + $0x380] sm:$0xff] }
 0x318   : > { %3596 = vmatpush.msra.mxu3 %v3521_v1  ;;  %3120 = vmatpush.msra.mxu0 %v3561_v60  ;;  %vm2896_vm14 = vcmp.ge.s32.totalorder %v2887_v45, 0  ;;  %vm2905_vm10 = vcmp.lt.s32.totalorder %v2887_v45, 200 }
 0x319   : > { %3604 = vmatpush.msra.mxu2 %v3561_v60  ;;  %3048 = vmatpush.msrb.mxu1 %v3519_v32  ;;  %vm2914_vm15 = vmand %vm2896_vm14, %vm2905_vm10  ;;  %vm2897_vm0 = vcmp.ge.s32.totalorder %v2888_v44, 0  ;;  %vm2906_vm1 = vcmp.lt.s32.totalorder %v2888_v44, 200 }
 0x31a   : > { %3597 = vmatpush.msra.mxu3 %v3520_v58  ;;  %3121 = vmatpush.msra.mxu0 %v3560_v4  ;;  %vm2915_vm7 = vmand %vm2897_vm0, %vm2906_vm1 }
 0x31b   : > { %3605 = vmatpush.msra.mxu2 %v3560_v4  ;;  %3074 = vmatpush.msra.mxu1 %v3550_v57 }
 0x31c   : > { %3122 = vmatpush.msra.mxu0 %v3559_v22  ;;  %3598 = vmatpush.msra.mxu3 %v3519_v32 }
 0x31d   : > { %3606 = vmatpush.msra.mxu2 %v3559_v22  ;;  %3075 = vmatpush.msra.mxu1 %v3549_v61 }
 0x31e   : > { %3123 = vmatpush.msra.mxu0 %v3558_v15 }
 0x31f   : > { %2841 = vmatmul.f32.gmra.mxu0 %v2699_v34  ;;  %3607 = vmatpush.msra.mxu2 %v3558_v15 }
 0x320   : > { %3124 = vmatpush.msra.mxu0 %v3557_v48  ;;  %3076 = vmatpush.msra.mxu1 %v3548_v41 }
 0x321   : > { %3608 = vmatpush.msra.mxu2 %v3557_v48  ;;  %v2889_v48 = vadd.s32 %v6350_v6, %v4596_v26 }
 0x322   : > { %3125 = vmatpush.msra.mxu0 %v3556_v13  ;;  %3077 = vmatpush.msra.mxu1 %v3547_v16 }
 0x323   : > { %3609 = vmatpush.msra.mxu2 %v3556_v13  ;;  %vm2898_vm2 = vcmp.ge.s32.totalorder %v2889_v48, 0  ;;  %vm2907_vm3 = vcmp.lt.s32.totalorder %v2889_v48, 200 }
 0x324   : > { %3126 = vmatpush.msra.mxu0 %v3555_v14  ;;  %3078 = vmatpush.msra.mxu1 %v3546_v42  ;;  %vm2916_vm6 = vmand %vm2898_vm2, %vm2907_vm3 }
 0x325   : > { %3610 = vmatpush.msra.mxu2 %v3555_v14 }
 0x326   : > { %3127 = vmatpush.msra.mxu0 %v3554_v54  ;;  %3079 = vmatpush.msra.mxu1 %v3545_v51 }
 0x327   : > { %3611 = vmatpush.msra.mxu2 %v3554_v54 }
 0x328   : > { %3128 = vmatpush.msra.mxu0 %v3553_v59  ;;  %3080 = vmatpush.msra.mxu1 %v3544_v3  ;;  %v2890_v3 = vadd.s32 %v6350_v6, %v4599_v27 }
 0x329   : > { %3612 = vmatpush.msra.mxu2 %v3553_v59 }
 0x32a   : > { %3129 = vmatpush.msra.mxu0 %v3552_v28  ;;  %3081 = vmatpush.msra.mxu1 %v3543_v56  ;;  %vm2899_vm14 = vcmp.ge.s32.totalorder %v2890_v3, 0  ;;  %vm2908_vm10 = vcmp.lt.s32.totalorder %v2890_v3, 200 }
 0x32b   : > { %3613 = vmatpush.msra.mxu2 %v3552_v28 }
 0x32c   : > { %3130 = vmatpush.msra.mxu0 %v3551_v31  ;;  %3082 = vmatpush.msra.mxu1 %v3542_v40 }
 0x32d   : > { %3614 = vmatpush.msra.mxu2 %v3551_v31 }
 0x32e   : > { %3083 = vmatpush.msra.mxu1 %v3541_v24 }
 0x330   : > { %3084 = vmatpush.msra.mxu1 %v3540_v5 }
 0x332   : > { %3085 = vmatpush.msra.mxu1 %v3539_v2 }
 0x334   : > { %3086 = vmatpush.msra.mxu1 %v3538_v37  ;;  %v2891_v37 = vadd.s32 %v6350_v6, %v4618_v29 }
 0x336   : > { %3087 = vmatpush.msra.mxu1 %v3537_v23  ;;  %vm2900_vm0 = vcmp.ge.s32.totalorder %v2891_v37, 0  ;;  %vm2909_vm1 = vcmp.lt.s32.totalorder %v2891_v37, 200 }
 0x338   : > { %3088 = vmatpush.msra.mxu1 %v3536_v20 }
 0x33a   : > { %3089 = vmatpush.msra.mxu1 %v3535_v25 }
 0x34f   : > { %v2730_v21 = vpop.f32.mrf.mxu2 }
 0x350   : > { %v2731_v38 = vadd.f32 %v6348_v52, %v2730_v21 }
 0x357   : > { %v2733_v17 = vpop.f32.mrf.mxu2 }
 0x358   : > { %v2734_v12 = vadd.f32 %v6348_v52, %v2733_v17 }
 0x35a   : > { %v2774_v39 = vpop.f32.mrf.mxu3 }
 0x35b   : > { %v2775_v0 = vadd.f32 %v2774_v39, %v2731_v38 }
 0x35c   : > { %v2818_v43 = vpop.f32.mrf.mxu0 }
 0x35d   : > { %v2819_v18 = vadd.f32 %v2818_v43, %v2775_v0 }
 0x35f   : > { %vm2845_vm13 = vcmp.ge.f32.partialorder %v2819_v18, 0.0  ;;  %v2854_v62 = vmul.f32 0.1, %v2819_v18  ;;  %v2736_v34 = vpop.f32.mrf.mxu2 }
 0x360   : > { %v2737_v13 = vadd.f32 %v6348_v52, %v2736_v34 }
 0x361   : > { %v2863_v35 = vsel %vm2845_vm13, %v2819_v18, %v2854_v62 }
 0x362   : > { %v2941_v1 = vsel %vm2914_vm15, %v2863_v35, 0.0  ;;  %v2777_v19 = vpop.f32.mrf.mxu3  ;;  %vm2917_vm15 = vmand %vm2899_vm14, %vm2908_vm10 }
 0x363   : > { %v4057_v11 = vsel %vm3619_vm9, %v2941_v1, 0  ;;  %v2778_v58 = vadd.f32 %v2777_v19, %v2734_v12 }
 0x364   : > { %v2821_v60 = vpop.f32.mrf.mxu0  ;;  %v6386_v4 = vsel %vm3668_vm11, %v2863_v35, %v4057_v11 }
 0x365   : > { %v2822_v22 = vadd.f32 %v2821_v60, %v2778_v58  ;;  %3049 = vmatmul.f32.vlgmr.msrb.gmra.mxu1 %v6386_v4  ;;  %v3005_v28 = vrot.slane %v6386_v4, 2  ;;  %v2892_v60 = vadd.s32 %v6350_v6, %v4621_v30 }
 0x367   : > { %vm2846_vm12 = vcmp.ge.f32.partialorder %v2822_v22, 0.0  ;;  %v2855_v15 = vmul.f32 0.1, %v2822_v22  ;;  %v2739_v32 = vpop.f32.mrf.mxu2  ;;  %vm2901_vm2 = vcmp.ge.s32.totalorder %v2892_v60, 0  ;;  %vm2910_vm3 = vcmp.lt.s32.totalorder %v2892_v60, 200 }
 0x368   : > { %v2740_v56 = vadd.f32 %v6348_v52, %v2739_v32  ;;  %v2980_v32 = vrot.slane %v6386_v4, 1 }
 0x369   : > { %v2864_v57 = vsel %vm2846_vm12, %v2822_v22, %v2855_v15 }
 0x36a   : > { %v2780_v14 = vpop.f32.mrf.mxu3  ;;  %v2942_v61 = vsel %vm2915_vm7, %v2864_v57, 0.0  ;;  %vm2918_vm7 = vmand %vm2900_vm0, %vm2909_vm1 }
 0x36b   : > { %v2781_v41 = vadd.f32 %v2780_v14, %v2737_v13  ;;  %v4061_v54 = vsel %vm3619_vm9, %v2942_v61, 0 }
 0x36c   : > { %v2824_v16 = vpop.f32.mrf.mxu0  ;;  %v6396_v59 = vsel %vm3668_vm11, %v2864_v57, %v4061_v54 }
 0x36d   : > { %v2825_v42 = vadd.f32 %v2824_v16, %v2781_v41  ;;  %v3006_v26 = vrot.slane %v6396_v59, 2  ;;  %3052 = vmatmul.f32.gmra.mxu1 %v6396_v59  ;;  %v2981_v25 = vrot.slane %v6396_v59, 1 }
 0x36f   : > { %vm2847_vm8 = vcmp.ge.f32.partialorder %v2825_v42, 0.0  ;;  %v2856_v21 = vmul.f32 0.1, %v2825_v42  ;;  %v2742_v31 = vpop.f32.mrf.mxu2  ;;  %v3007_v51 = vsel %vm816_vm4, %v3005_v28, %v3006_v26  ;;  %v2982_v30 = vsel %vm792_vm5, %v2980_v32, %v2981_v25 }
 0x370   : > { %3131 = vmatmul.f32.vlgmr.msra.gmra.mxu0 %v3007_v51  ;;  %v2743_v62 = vadd.f32 %v6348_v52, %v2742_v31 }
 0x371   : > { %v2865_v40 = vsel %vm2847_vm8, %v2825_v42, %v2856_v21 }
 0x372   : > { %v2783_v17 = vpop.f32.mrf.mxu3  ;;  %v2943_v45 = vsel %vm2916_vm6, %v2865_v40, 0.0  ;;  %vm2919_vm6 = vmand %vm2901_vm2, %vm2910_vm3 }
 0x373   : > { %v2784_v24 = vadd.f32 %v2783_v17, %v2740_v56  ;;  %v4065_v5 = vsel %vm3619_vm9, %v2943_v45, 0 }
 0x374   : > { %v2827_v38 = vpop.f32.mrf.mxu0  ;;  %v6409_v39 = vsel %vm3668_vm11, %v2865_v40, %v4065_v5 }
 0x375   : > { %v2828_v0 = vadd.f32 %v2827_v38, %v2784_v24  ;;  %v3008_v2 = vrot.slane %v6409_v39, 2  ;;  %3055 = vmatmul.f32.gmra.mxu1 %v6409_v39  ;;  %v2983_v42 = vrot.slane %v6409_v39, 1 }
 0x377   : > { %vm2848_vm13 = vcmp.ge.f32.partialorder %v2828_v0, 0.0  ;;  %v2857_v27 = vmul.f32 0.1, %v2828_v0  ;;  %v3009_v43 = vsel %vm816_vm4, %v3006_v26, %v3008_v2  ;;  %v2745_v18 = vpop.f32.mrf.mxu2  ;;  %v2893_v26 = vadd.s32 %v6350_v6, %v4682_v49 }
 0x378   : > { %3134 = vmatmul.f32.gmra.mxu0 %v3009_v43  ;;  %v2746_v22 = vadd.f32 %v6348_v52, %v2745_v18  ;;  %v2984_v5 = vsel %vm792_vm5, %v2981_v25, %v2983_v42 }
 0x379   : > { %v2866_v34 = vsel %vm2848_vm13, %v2828_v0, %v2857_v27  ;;  %vm2902_vm14 = vcmp.ge.s32.totalorder %v2893_v26, 0  ;;  %vm2911_vm10 = vcmp.lt.s32.totalorder %v2893_v26, 200  ;;  %v2894_v27 = vadd.s32 %v6350_v6, %v4867_v8 }
 0x37a   : > { %v2786_v44 = vpop.f32.mrf.mxu3  ;;  %v2944_v23 = vsel %vm2917_vm15, %v2866_v34, 0.0  ;;  %vm2920_vm15 = vmand %vm2902_vm14, %vm2911_vm10 }
 0x37b   : > { %v2787_v12 = vadd.f32 %v2786_v44, %v2743_v62  ;;  %v4069_v35 = vsel %vm3619_vm9, %v2944_v23, 0  ;;  %vm2903_vm0 = vcmp.ge.s32.totalorder %v2894_v27, 0  ;;  %vm2912_vm1 = vcmp.lt.s32.totalorder %v2894_v27, 200 }
 0x37c   : > { %v2830_v1 = vpop.f32.mrf.mxu0  ;;  %v6421_v19 = vsel %vm3668_vm11, %v2866_v34, %v4069_v35 }
 0x37d   : > { %v2831_v20 = vadd.f32 %v2830_v1, %v2787_v12  ;;  %v3010_v11 = vrot.slane %v6421_v19, 2  ;;  %3058 = vmatmul.f32.gmra.mxu1 %v6421_v19 }
 0x37f   : > { %vm2849_vm12 = vcmp.ge.f32.partialorder %v2831_v20, 0.0  ;;  %v2858_v29 = vmul.f32 0.1, %v2831_v20  ;;  %v3011_v58 = vsel %vm816_vm4, %v3008_v2, %v3010_v11  ;;  %v2748_v13 = vpop.f32.mrf.mxu2  ;;  %v2985_v2 = vrot.slane %v6421_v19, 1 }
 0x380   : > { %3137 = vmatmul.f32.gmra.mxu0 %v3011_v58  ;;  %v2749_v21 = vadd.f32 %v6348_v52, %v2748_v13 }
 0x381   : > { %v2867_v15 = vsel %vm2849_vm12, %v2831_v20, %v2858_v29  ;;  %v2986_v35 = vsel %vm792_vm5, %v2983_v42, %v2985_v2  ;;  %v2895_v29 = vadd.s32 %v6350_v6, %v4911_v53 }
 0x382   : > { %v2945_v48 = vsel %vm2918_vm7, %v2867_v15, 0.0  ;;  %v2789_v57 = vpop.f32.mrf.mxu3  ;;  %vm2921_vm7 = vmand %vm2903_vm0, %vm2912_vm1 }
 0x383   : > { %v4073_v14 = vsel %vm3619_vm9, %v2945_v48, 0  ;;  %v2790_v61 = vadd.f32 %v2789_v57, %v2746_v22  ;;  %vm2904_vm2 = vcmp.ge.s32.totalorder %v2895_v29, 0  ;;  %vm2913_vm3 = vcmp.lt.s32.totalorder %v2895_v29, 200 }
 0x384   : > { %v2833_v41 = vpop.f32.mrf.mxu0  ;;  %v6435_v54 = vsel %vm3668_vm11, %v2867_v15, %v4073_v14 }
 0x385   : > { %v2834_v16 = vadd.f32 %v2833_v41, %v2790_v61  ;;  %v3012_v4 = vrot.slane %v6435_v54, 2  ;;  %3061 = vmatmul.f32.vlgmr.msra.gmra.mxu3 %v6435_v54  ;;  %3090 = vmatmul.f32.vlgmr.msra.gmra.mxu1 %v2982_v30  ;;  %v2987_v58 = vrot.slane %v6435_v54, 1 }
 0x387   : > { %vm2850_vm8 = vcmp.ge.f32.partialorder %v2834_v16, 0.0  ;;  %v2859_v59 = vmul.f32 0.1, %v2834_v16  ;;  %v3013_v28 = vsel %vm816_vm4, %v3010_v11, %v3012_v4  ;;  %v2751_v17 = vpop.f32.mrf.mxu2  ;;  %v2988_v14 = vsel %vm792_vm5, %v2985_v2, %v2987_v58 }
 0x388   : > { %3140 = vmatmul.f32.vlgmr.msra.gmra.mxu2 %v3013_v28  ;;  %v2752_v43 = vadd.f32 %v6348_v52, %v2751_v17 }
 0x389   : > { %v2868_v31 = vsel %vm2850_vm8, %v2834_v16, %v2859_v59 }
 0x38a   : > { %v2792_v51 = vpop.f32.mrf.mxu3  ;;  %v2946_v3 = vsel %vm2919_vm6, %v2868_v31, 0.0  ;;  %vm2922_vm6 = vmand %vm2904_vm2, %vm2913_vm3 }
 0x38b   : > { %v2793_v56 = vadd.f32 %v2792_v51, %v2749_v21  ;;  %v4077_v40 = vsel %vm3619_vm9, %v2946_v3, 0 }
 0x38c   : > { %v2836_v45 = vpop.f32.mrf.mxu0  ;;  %v6450_v24 = vsel %vm3668_vm11, %v2868_v31, %v4077_v40 }
 0x38d   : > { %v2837_v49 = vadd.f32 %v2836_v45, %v2793_v56  ;;  %v3014_v38 = vrot.slane %v6450_v24, 2  ;;  %3064 = vmatmul.f32.gmra.mxu3 %v6450_v24  ;;  %3093 = vmatmul.f32.gmra.mxu1 %v2984_v5  ;;  %v2989_v41 = vrot.slane %v6450_v24, 1  ;;  %v4267_v45 = vld [vmem:[%s6590_s6 + $0x2] ss:$0 sm:$0xff] }
 0x38f   : > { %vm2851_vm13 = vcmp.ge.f32.partialorder %v2837_v49, 0.0  ;;  %v2860_v39 = vmul.f32 0.1, %v2837_v49  ;;  %v3015_v0 = vsel %vm816_vm4, %v3012_v4, %v3014_v38  ;;  %v2754_v8 = vpop.f32.mrf.mxu2  ;;  %v2990_v4 = vsel %vm792_vm5, %v2987_v58, %v2989_v41 }
 0x390   : > { %3143 = vmatmul.f32.gmra.mxu2 %v3015_v0  ;;  %v2755_v25 = vadd.f32 %v6348_v52, %v2754_v8 }
 0x391   : > { %v2869_v18 = vsel %vm2851_vm13, %v2837_v49, %v2860_v39 }
 0x392   : > { %v2795_v37 = vpop.f32.mrf.mxu3  ;;  %v2947_v62 = vsel %vm2920_vm15, %v2869_v18, 0.0 }
 0x393   : > { %v2796_v34 = vadd.f32 %v2795_v37, %v2752_v43  ;;  %v4081_v44 = vsel %vm3619_vm9, %v2947_v62, 0 }
 0x394   : > { %v2839_v23 = vpop.f32.mrf.mxu0  ;;  %v4118_v12 = vsel %vm3668_vm11, %v2869_v18, %v4081_v44 }
 0x395   : > { %v2840_v1 = vadd.f32 %v2839_v23, %v2796_v34  ;;  %v3016_v19 = vrot.slane %v4118_v12, 2  ;;  %3067 = vmatmul.f32.gmra.mxu3 %v4118_v12  ;;  %3096 = vmatmul.f32.gmra.mxu1 %v2986_v35  ;;  %v2991_v26 = vrot.slane %v4118_v12, 1 }
 0x397   : > { %vm2852_vm12 = vcmp.ge.f32.partialorder %v2840_v1, 0.0  ;;  %v2861_v20 = vmul.f32 0.1, %v2840_v1  ;;  %v3017_v11 = vsel %vm816_vm4, %v3014_v38, %v3016_v19  ;;  %v2992_v21 = vsel %vm792_vm5, %v2989_v41, %v2991_v26 }
 0x398   : > { %3146 = vmatmul.f32.gmra.mxu2 %v3017_v11 }
 0x399   : > { %v2870_v60 = vsel %vm2852_vm12, %v2840_v1, %v2861_v20 }
 0x39a   : > { %v2798_v22 = vpop.f32.mrf.mxu3  ;;  %v2948_v15 = vsel %vm2921_vm7, %v2870_v60, 0.0 }
 0x39b   : > { %v2799_v32 = vadd.f32 %v2798_v22, %v2755_v25  ;;  %v4085_v48 = vsel %vm3619_vm9, %v2948_v15, 0 }
 0x39c   : > { %v2842_v13 = vpop.f32.mrf.mxu0  ;;  %v4122_v57 = vsel %vm3668_vm11, %v2870_v60, %v4085_v48 }
 0x39d   : > { %v2843_v53 = vadd.f32 %v2842_v13, %v2799_v32  ;;  %v3018_v6 = vrot.slane %v4122_v57, 2  ;;  %3070 = vmatmul.f32.gmra.mxu3 %v4122_v57  ;;  %3099 = vmatmul.f32.gmra.mxu1 %v2988_v14  ;;  %v2993_v31 = vrot.slane %v4122_v57, 1 }
 0x39f   : > { %vm2853_vm8 = vcmp.ge.f32.partialorder %v2843_v53, 0.0  ;;  %v2862_v52 = vmul.f32 0.1, %v2843_v53  ;;  %v3019_v61 = vsel %vm816_vm4, %v3016_v19, %v3018_v6  ;;  %v2994_v51 = vsel %vm792_vm5, %v2991_v26, %v2993_v31 }
 0x3a0   : > { %3149 = vmatmul.f32.gmra.mxu2 %v3019_v61 }
 0x3a1   : > { %v2871_v54 = vsel %vm2853_vm8, %v2843_v53, %v2862_v52 }
 0x3a2   : > { %v2949_v30 = vsel %vm2922_vm6, %v2871_v54, 0.0 }
 0x3a3   : > { %v4089_v16 = vsel %vm3619_vm9, %v2949_v30, 0 }
 0x3a4   : > { %v4126_v59 = vsel %vm3668_vm11, %v2871_v54, %v4089_v16 }
 0x3a5   : > { %3102 = vmatmul.f32.gmra.mxu1 %v2990_v4  ;;  %v3020_v28 = vrot.slane %v4126_v59, 2  ;;  %v2995_v46 = vrot.slane %v4126_v59, 1 }
 0x3a7   : > { %v3021_v42 = vsel %vm816_vm4, %v3018_v6, %v3020_v28  ;;  %v2996_v3 = vsel %vm792_vm5, %v2993_v31, %v2995_v46 }
 0x3a8   : > { %3152 = vmatmul.f32.gmra.mxu2 %v3021_v42 }
 0x3ad   : > { %3105 = vmatmul.f32.gmra.mxu1 %v2992_v21 }
 0x3b5   : > { %3108 = vmatmul.f32.gmra.mxu1 %v2994_v51 }
 0x3bd   : > { %3111 = vmatmul.f32.gmra.mxu1 %v2996_v3 }
 0x3e2   : > { %v3050_v55 = vpop.f32.mrf.mxu1 }
 0x3e3   : > { %v3051_v5 = vadd.f32 %v4267_v45, %v3050_v55 }
 0x3ea   : > { %v3053_v56 = vpop.f32.mrf.mxu1 }
 0x3eb   : > { %v3054_v2 = vadd.f32 %v4267_v45, %v3053_v56 }
 0x3ed   : > { %v3132_v24 = vpop.f32.mrf.mxu0 }
 0x3f2   : > { %v3056_v40 = vpop.f32.mrf.mxu1 }
 0x3f3   : > { %v3057_v34 = vadd.f32 %v4267_v45, %v3056_v40 }
 0x3f5   : > { %v3135_v27 = vpop.f32.mrf.mxu0 }
 0x3fa   : > { %v3059_v17 = vpop.f32.mrf.mxu1 }
 0x3fb   : > { %v3060_v8 = vadd.f32 %v4267_v45, %v3059_v17 }
 0x3fd   : > { %v3138_v12 = vpop.f32.mrf.mxu0 }
 0x402   : > { %v3091_v49 = vpop.f32.mrf.mxu1 }
 0x403   : > { %v3092_v38 = vadd.f32 %v3091_v49, %v3051_v5 }
 0x405   : > { %v3133_v39 = vadd.f32 %v3132_v24, %v3092_v38 }
 0x407   : > { %v3190_v0 = vadd.f32 %v6111_v50, %v3133_v39 }
 0x408   : > { %v3062_v19 = vpop.f32.mrf.mxu3 }
 0x409   : > { %3198 = vst [vmem:[%s6492_s9] sm:$0xff] %v3190_v0  ;;  %v3063_v25 = vadd.f32 %v4267_v45, %v3062_v19 }
 0x40a   : > { %v3094_v43 = vpop.f32.mrf.mxu1 }
 0x40b   : > { %v3095_v18 = vadd.f32 %v3094_v43, %v3054_v2  ;;  %v3141_v50 = vpop.f32.mrf.mxu2 }
 0x40d   : > { %v3136_v37 = vadd.f32 %v3135_v27, %v3095_v18 }
 0x40f   : > { %v3191_v62 = vadd.f32 %v6125_v36, %v3136_v37 }
 0x410   : > { %v3065_v60 = vpop.f32.mrf.mxu3 }
 0x411   : > { %3199 = vst [vmem:[%s6492_s9 + $0x8] sm:$0xff] %v3191_v62  ;;  %v3066_v13 = vadd.f32 %v4267_v45, %v3065_v60 }
 0x412   : > { %v3097_v44 = vpop.f32.mrf.mxu1 }
 0x413   : > { %v3098_v23 = vadd.f32 %v3097_v44, %v3057_v34  ;;  %v3144_v58 = vpop.f32.mrf.mxu2 }
 0x415   : > { %v3139_v35 = vadd.f32 %v3138_v12, %v3098_v23 }
 0x417   : > { %v3192_v1 = vadd.f32 %v6136_v7, %v3139_v35 }
 0x418   : > { %v3068_v53 = vpop.f32.mrf.mxu3 }
 0x419   : > { %3200 = vst [vmem:[%s6492_s9 + $0x10] sm:$0xff] %v3192_v1 }
 0x41a   : > { %v3100_v20 = vpop.f32.mrf.mxu1 }
 0x41b   : > { %v3101_v11 = vadd.f32 %v3100_v20, %v3060_v8  ;;  %v3147_v7 = vpop.f32.mrf.mxu2 }
 0x41d   : > { %v3142_v29 = vadd.f32 %v3141_v50, %v3101_v11 }
 0x41f   : > { %v3193_v36 = vadd.f32 %v6149_v63, %v3142_v29  ;;  %v3069_v63 = vadd.f32 %v4267_v45, %v3068_v53 }
 0x420   : > { %v3071_v16 = vpop.f32.mrf.mxu3 }
 0x421   : > { %3201 = vst [vmem:[%s6492_s9 + $0x18] sm:$0xff] %v3193_v36  ;;  %v3072_v4 = vadd.f32 %v4267_v45, %v3071_v16 }
 0x422   : > { %v3103_v22 = vpop.f32.mrf.mxu1 }
 0x423   : > { %v3104_v15 = vadd.f32 %v3103_v22, %v3063_v25  ;;  %v3150_v61 = vpop.f32.mrf.mxu2 }
 0x425   : > { %v3145_v32 = vadd.f32 %v3144_v58, %v3104_v15 }
 0x427   : > { %v3194_v48 = vadd.f32 %v6165_v47, %v3145_v32 }
 0x429   : > { %3202 = vst [vmem:[%s6492_s9 + $0x20] sm:$0xff] %v3194_v48 }
 0x42a   : > { %v3106_v57 = vpop.f32.mrf.mxu1 }
 0x42b   : > { %v3107_v14 = vadd.f32 %v3106_v57, %v3066_v13  ;;  %v3153_v42 = vpop.f32.mrf.mxu2 }
 0x42d   : > { %v3148_v6 = vadd.f32 %v3147_v7, %v3107_v14 }
 0x42f   : > { %v3195_v52 = vadd.f32 %v6181_v9, %v3148_v6 }
 0x431   : > { %3203 = vst [vmem:[%s6492_s9 + $0x28] sm:$0xff] %v3195_v52 }
 0x432   : > { %v3109_v41 = vpop.f32.mrf.mxu1 }
 0x433   : > { %v3110_v54 = vadd.f32 %v3109_v41, %v3069_v63 }
 0x435   : > { %v3151_v30 = vadd.f32 %v3150_v61, %v3110_v54 }
 0x437   : > { %v3196_v47 = vadd.f32 %v6210_v10, %v3151_v30 }
 0x439   : > { %3204 = vst [vmem:[%s6492_s9 + $0x30] sm:$0xff] %v3196_v47 }
 0x43a   : > { %v3112_v59 = vpop.f32.mrf.mxu1 }
 0x43b   : > { %v3113_v28 = vadd.f32 %v3112_v59, %v3072_v4 }
 0x43d   : > { %v3154_v26 = vadd.f32 %v3153_v42, %v3113_v28  ;;  %3213 = sbr.rel (!%p4469_p3) target bundleno = 1121 (0x461), region = 100 }
 0x43f   : > { %v3197_v21 = vadd.f32 %v6241_v33, %v3154_v26 }
 0x441   : > { %3205 = vst [vmem:[%s6492_s9 + $0x38] sm:$0xff] %v3197_v21 }
 0x442   : > { %s6657_s23 = smov (!%p3216_p9, %s3215_s23), 8 }
 0x443   : > { %s3570_s15 = sshll.u32 %s6657_s23, 3 }
 0x444   : > { %s3219_s27 = ssub.s32 64, %s3570_s15 }
 0x445   : > { %s3220_s29 = sshll.u32 %s3219_s27, 4 }
 0x446   : > { %3221 = vsyncadd %s6511_s19, %s3220_s29  ;;  %p6520_p10 = scmp.ne.s32.totalorder %s3570_s15, 0  ;;  %s3616_s14 = smul.u32 25, %s4361_s28 }
 0x447   : > { %s3228_s16 = sshll.u32 %s6492_s9, 4  ;;  %s3574_s10 = sshll.u32 %s6657_s23, 7  ;;  %s6528_s16 = int_to_ptr.vmem [resolvable:$true] %s3228_s16 }
 0x448   : > { %s3224_s12 = sadd.s32 %s3616_s14, %s4509_s22  ;;  %s4268_s13 = sshra.s32 %s6528_s16, 4  ;;  %s4269_s13 = int_to_ptr.vmem [resolvable:$true] %s4268_s13 }
 0x449   : > { %s3572_s17 = sshll.u32 %s3224_s12, 3  ;;  %s4270_s20 = sshrl.u32 %s3574_s10, 4 }
 0x44a   : > { %s3226_s11 = scalar_lea.hbm %s6591_s7, %s3572_s17  ;;  %s4275_s15 = scalar_lea.vmem %s4269_s13, %s4270_s20 }
 0x44b   : > { %s3230_s18 = sshll.u32 %s3226_s11, 4  ;;  %p4276_p3 = scmp.ne.s32.totalorder %s4269_s13, %s4275_s15  ;;  %s6533_s18 = int_to_ptr.hbm [resolvable:$true] %s3230_s18 }
 0x44c   : > { %s4375_s28 = smov [#allocation2]  }
 0x44d   : > { %p4277_p11 = pnand %p4276_p3, %p6520_p10  ;;  %s4279_s22 = scalar_lea.vmem %s4375_s28, 128 }
 0x44e   : > { %p4281_p13 = scmp.lt.s32.totalorder %s4279_s22, %s4275_s15 }
 0x44f   : > { %p4278_p12 = pneg %p4277_p11 }
 0x451   : > { %p4283_p0 = pnand %p4281_p13, %p4278_p12 }
 0x453   : > { %4286 = shalt.err (!%p4283_p0)
}
 0x454   : > { %s4287_s9 = sshra.s32 %s6533_s18, 4  ;;  %s4298_s12 = scalar_lea.hbm %s6591_s7, 400  ;;  %s4288_s9 = int_to_ptr.hbm [resolvable:$true] %s4287_s9 }
 0x455   : > { %s4294_s27 = scalar_lea.hbm %s4288_s9, %s4270_s20  ;;  %p4299_p5 = scmp.lt.s32.totalorder %s4288_s9, %s6591_s7 }
 0x456   : > { %p4295_p1 = scmp.ne.s32.totalorder %s4288_s9, %s4294_s27  ;;  %p4300_p6 = scmp.lt.s32.totalorder %s4298_s12, %s4294_s27 }
 0x458   : > { %p4296_p2 = pnand %p4295_p1, %p6520_p10  ;;  %p4301_p7 = por %p4300_p6, %p4299_p5 }
 0x45a   : > { %p4297_p4 = pneg %p4296_p2 }
 0x45c   : > { %p4302_p9 = pnand %p4301_p7, %p4297_p4 }
 0x45e   : > { %4305 = shalt.err (!%p4302_p9)
}
 0x45f   : > { %s4376_s26 = smov 128   ;;  %s4377_s11 = smov 8  }
 0x460   : > { %3236 = dma.vmem_to_hbm [thread:$0]  (%p6520_p10), %s6528_s16, %s3574_s10, %s6533_s18, %s6511_s19, %s4376_s26, %s4376_s26, %s4377_s11  }
 0x461 PF: > { %p4195_p3 = scmp.ge.s32.totalorder %s4373_s8, 2  ;;  %s3245_s20 = sand.u32 1, %s4345_s24  }
 0x462   : > { %s3246_s15 = scalar_lea.sflag [#allocation3], %s3245_s20 }
 0x463   : > { %p4129_p11 = pnand %p4195_p3, %p4478_p8 }
 0x465   : > { %p4130_p12 = pneg %p4129_p11 }
 0x467   : > { %4340 = dma.done.wait (%p4130_p12), %s3246_s15, 1024  }
 0x468   : > { %4342 = vsyncadd (%p4130_p12), %s3246_s15, 4294966272  ;;  %s20_s8 = sadd.s32 1, %s4373_s8   ;;  %s6634_s21 = sld [smem:[#allocation5_spill]] }
 0x469   : > { %p17_p13 = scmp.ge.s32.totalorder %s20_s8, 10   ;;  %s6635_s26 = sld [smem:[#allocation11_spill]] }
 0x46a   : > { %s6636_s27 = sld [smem:[#allocation6_spill]]  ;;  %s6640_s24 = smov %s4349_s25 }
 0x46b   : > { %s6637_s28 = sld [smem:[#allocation7_spill]]  ;;  %19 = sbr.rel (!%p17_p13) target bundleno = 5 (0x5), region = 145 }
 0x46c   : > { %s6638_s29 = sld [smem:[#allocation8_spill]] }
 0x46d   : > { %s6639_s30 = sld [smem:[#allocation9_spill]] }
 0x46e   : > { %s6641_s25 = smov %s6634_s21 }
 0x470   :  { %3252 = vsyncpa [#allocation3], 1 }
 0x471   :  { %3254 = vsyncpa [#allocation3 + $0x1], 1 }

</bundles_post_ra>
